<compile_context>
chip_gen: v5e
topology: v5e:2x2
jax: 0.10.0
libtpu: 0.0.40
codegen_flags: <defaults>
</compile_context>

<pallas_src>
import math
import functools

import jax
import jax.numpy as jnp
from jax import lax
from jax.experimental import pallas as pl
from jax.experimental.pallas import tpu as pltpu

# ---------------- config (stand-in for `args` / vocabulary) ----------------
EMB_DIM = 32      # args.emb_dim
HEADS = 2         # args.heads
PF_DIM = 64       # args.pf_dim
LAYERS = 2        # args.layers
V_LF = 40         # len(vocabulary)  (decoder output vocab)
V_IN = 50         # source vocab size (only used to draw example src tokens)
PAD_ID = 0
OUT_PAD = 128     # lane-dense padded width for the final projection

_LAYER_KEYS = ('w_qkv', 'b_qkv', 'w_o_self', 'b_o_self',
               'w_q_src', 'b_q_src', 'w_kv_src', 'b_kv_src',
               'w_o_src', 'b_o_src', 'w1', 'b1', 'w2', 'b2',
               'ln_g', 'ln_b')


# ====================== fully fused decoder kernel ======================

def _fused_decoder_kernel(x_ref, enc_ref, tmask_ref, smask_ref,
                          wqkv_ref, bqkv_ref, wo1_ref, bo1_ref,
                          wq2_ref, bq2_ref, wkv2_ref, bkv2_ref,
                          wo2_ref, bo2_ref,
                          w1_ref, b1_ref, w2_ref, b2_ref,
                          g_ref, beta_ref,
                          wout_ref, bout_ref,
                          h_ref, logits_ref,
                          attn_ref, *, heads):
    """All decoder layers + output projection for one grid step.

    x_ref:(M,E) with M = BB*T; enc_ref:(BB*S,E); tmask_ref:(M,T);
    smask_ref:(M,S).  Per-layer weights stacked on a leading layer axis,
    pre-transposed to (in,out); biases (L,1,out).  attn_ref: (M,E) VMEM scratch.
    """
    M, E = x_ref.shape
    T = tmask_ref.shape[-1]
    S = smask_ref.shape[-1]
    bb = M // T                       # batch elements folded into this step
    layers = wqkv_ref.shape[0]
    d = E // heads
    inv_scale = 1.0 / math.sqrt(d)

    x = x_ref[...]                    # (M, E)
    enc = enc_ref[...]                # (bb*S, E)
    tmask = tmask_ref[...] > 0.0      # (M, T) bool
    smask = smask_ref[...] > 0.0      # (M, S) bool

    def attend(q, k, v, mask, w_o):
        """q (M,E) pre-scaled; k,v (bb*KL,E); mask (M,KL) bool; w_o (E,E).
        Writes (ctx @ Wo) per batch element into attn_ref (no head concat:
        each head's context is folded straight into the out-projection)."""
        kl = k.shape[0] // bb
        w_o_h = [w_o[h * d:(h + 1) * d, :] for h in range(heads)]
        for b in range(bb):
            qb = q[b * T:(b + 1) * T, :]
            kb = k[b * kl:(b + 1) * kl, :]
            vb = v[b * kl:(b + 1) * kl, :]
            mb = mask[b * T:(b + 1) * T, :]
            acc = jnp.zeros((T, E), jnp.float32)
            for h in range(heads):
                sl = slice(h * d, (h + 1) * d)
                e = lax.dot_general(qb[:, sl], kb[:, sl],
                                    (((1,), (1,)), ((), ())),
                                    preferred_element_type=jnp.float32)
                e = jnp.where(mb, e, -1e10)          # masked_fill(mask==0,-1e10)
                p = jnp.exp(e - jnp.max(e, axis=-1, keepdims=True))
                p = p * pl.reciprocal(jnp.sum(p, axis=-1, keepdims=True),
                                      approx=True)
                ctx = jnp.dot(p, vb[:, sl], preferred_element_type=jnp.float32)
                acc = acc + jnp.dot(ctx, w_o_h[h],
                                    preferred_element_type=jnp.float32)
            attn_ref[b * T:(b + 1) * T, :] = acc

    for l in range(layers):           # static unroll over decoder layers
        g_b = jnp.broadcast_to(g_ref[l], (M, E))       # hoisted LN broadcasts
        beta_b = jnp.broadcast_to(beta_ref[l], (M, E))

        def layer_norm(v):
            mean = jnp.mean(v, axis=-1, keepdims=True)
            var = jnp.mean((v - mean) ** 2, axis=-1, keepdims=True)
            return (v - mean) * lax.rsqrt(var + 1e-5) * g_b + beta_b

        # ---- self attention (merged QKV projection) ----
        qkv = (jnp.dot(x, wqkv_ref[l], preferred_element_type=jnp.float32)
               + bqkv_ref[l])
        attend(qkv[:, :E] * inv_scale, qkv[:, E:2 * E], qkv[:, 2 * E:],
               tmask, wo1_ref[l])
        x = layer_norm(x + attn_ref[...] + bo1_ref[l])

        # ---- encoder-decoder attention (merged KV projection of enc out) ----
        q2 = (jnp.dot(x, wq2_ref[l], preferred_element_type=jnp.float32)
              + bq2_ref[l]) * inv_scale
        kv = (jnp.dot(enc, wkv2_ref[l], preferred_element_type=jnp.float32)
              + bkv2_ref[l])
        attend(q2, kv[:, :E], kv[:, E:], smask, wo2_ref[l])
        x = layer_norm(x + attn_ref[...] + bo2_ref[l])

        # ---- position-wise feed-forward ----
        hdn = jnp.maximum(
            jnp.dot(x, w1_ref[l], preferred_element_type=jnp.float32)
            + b1_ref[l], 0.0)
        f = (jnp.dot(hdn, w2_ref[l], preferred_element_type=jnp.float32)
             + b2_ref[l])
        x = layer_norm(x + f)

    # ---- epilogue: hidden state + lane-dense vocabulary projection ----
    h_ref[...] = x
    logits_ref[...] = (jnp.dot(x, wout_ref[...],
                               preferred_element_type=jnp.float32)
                       + bout_ref[...])


# ====================== wrapper (single pallas_call) ======================

def _pick_batch_block(B):
    """v7x (2 TensorCores/chip): one batch element per parallel grid step.
    Single-TC chips (v5e/v6e) or unknown: fold the whole batch into one step."""
    try:
        kind = jax.devices()[0].device_kind.lower()
    except Exception:
        kind = ""
    multi_tc = any(tag in kind for tag in ("v7", "7x"))
    return 1 if (multi_tc and B > 1) else B


def _const_spec(w):
    nd = w.ndim

    def idx(i):
        return (0,) * nd
    return pl.BlockSpec(w.shape, idx)


def _cost_estimate(B, T, S, E, PF, L, V_PAD, n_bytes):
    def mm(m, k, n):
        return 2 * m * k * n
    per_layer = (mm(B * T, E, 3 * E)                       # merged QKV
                 + mm(B * T, E, T) + mm(B * T, T, E)       # self scores + ctx
                 + mm(B * T, E, E)                         # self out-proj
                 + mm(B * T, E, E)                         # src Q
                 + mm(B * S, E, 2 * E)                     # merged src KV
                 + mm(B * T, E, S) + mm(B * T, S, E)       # src scores + ctx
                 + mm(B * T, E, E)                         # src out-proj
                 + mm(B * T, E, PF) + mm(B * T, PF, E))    # FFN
    flops = L * per_layer + mm(B * T, E, V_PAD)
    trans = L * B * T * (T + S)                            # softmax exps
    return pl.CostEstimate(flops=int(flops), transcendentals=int(trans),
                           bytes_accessed=int(n_bytes))


def fused_decoder_forward(params, x2d, enc2d, tmask2d, smask2d, B, T, S):
    """x2d:(B*T,E) enc2d:(B*S,E) tmask2d:(B*T,T) smask2d:(B*T,S) float32.
    Returns (h2d:(B*T,E), logits_pad:(B*T,OUT_PAD))."""
    E = x2d.shape[-1]
    BB = _pick_batch_block(B)
    M = BB * T

    layer_ws = [params[k] for k in _LAYER_KEYS]
    weights = layer_ws + [params['out_w_pad'], params['out_b_pad']]
    w_specs = [_const_spec(w) for w in weights]

    data_specs = [pl.BlockSpec((M, E), lambda i: (i, 0)),
                  pl.BlockSpec((BB * S, E), lambda i: (i, 0)),
                  pl.BlockSpec((M, T), lambda i: (i, 0)),
                  pl.BlockSpec((M, S), lambda i: (i, 0))]

    n_bytes = sum(int(a.size) * a.dtype.itemsize
                  for a in [x2d, enc2d, tmask2d, smask2d] + weights)
    n_bytes += B * T * (E + OUT_PAD) * 4                   # outputs
    cost = _cost_estimate(B, T, S, E, PF_DIM, LAYERS, OUT_PAD, n_bytes)

    return pl.pallas_call(
        functools.partial(_fused_decoder_kernel, heads=HEADS),
        out_shape=(jax.ShapeDtypeStruct((B * T, E), jnp.float32),
                   jax.ShapeDtypeStruct((B * T, OUT_PAD), jnp.float32)),
        grid=(B // BB,),
        in_specs=data_specs + w_specs,
        out_specs=(pl.BlockSpec((M, E), lambda i: (i, 0)),
                   pl.BlockSpec((M, OUT_PAD), lambda i: (i, 0))),
        scratch_shapes=[pltpu.VMEM((M, E), jnp.float32)],
        compiler_params=pltpu.CompilerParams(
            dimension_semantics=("parallel",)),
        cost_estimate=cost,
    )(x2d, enc2d, tmask2d, smask2d, *weights)


# ====================== Decoder forward (XLA glue) ======================

def positional_embedding(T, d_model):
    pos = jnp.arange(T, dtype=jnp.float32)[:, None]
    div = jnp.exp(jnp.arange(0, d_model, 2, dtype=jnp.float32)
                  * (-math.log(10000.0) / d_model))
    ang = pos * div
    pe = jnp.zeros((T, d_model), jnp.float32)
    pe = pe.at[:, 0::2].set(jnp.sin(ang))
    pe = pe.at[:, 1::2].set(jnp.cos(ang))
    return pe[None]                                    # (1, T, d_model)


def make_masks(src_tokens, trg_tokens):
    # Matches the PyTorch reference exactly:
    #   src_mask masks KEY positions (src padding), broadcast over queries.
    #   trg_mask masks QUERY rows (trg padding) AND applies the causal tril.
    B, T = trg_tokens.shape
    S = src_tokens.shape[1]
    src_pad = (src_tokens != PAD_ID)
    trg_pad = (trg_tokens != PAD_ID)
    causal = jnp.tril(jnp.ones((T, T), dtype=bool))
    trg_mask = (trg_pad[:, :, None] & causal[None]).astype(jnp.float32)     # (B,T,T)
    src_mask = jnp.broadcast_to(src_pad[:, None, :], (B, T, S)).astype(jnp.float32)
    return src_mask, trg_mask


def decoder_forward(params, src_tokens, trg_tokens, encoder_out):
    B, T = trg_tokens.shape
    S = encoder_out.shape[1]
    E = EMB_DIM
    src_mask, trg_mask = make_masks(src_tokens, trg_tokens)
    x = params['embed'][trg_tokens] * math.sqrt(E)
    x = x + positional_embedding(T, E)                 # dropout = identity
    h2d, logits_pad = fused_decoder_forward(
        params,
        x.reshape(B * T, E),
        encoder_out.reshape(B * S, E),
        trg_mask.reshape(B * T, T),
        src_mask.reshape(B * T, S),
        B, T, S)
    logits = logits_pad[:, :V_LF]                      # strip lane padding in XLA
    return logits, h2d.reshape(B, T, E)                # (B*T, V_LF), (B, T, E)


# ====================== deterministic parameter init ======================

class KeyGen:
    def __init__(self, key):
        self.key = key

    def __call__(self):
        self.key, k = jax.random.split(self.key)
        return k


def init_params(key):
    kg = KeyGen(key)

    def w(shape):
        return jax.random.normal(kg(), shape, jnp.float32) * 0.1

    L, E, PF = LAYERS, EMB_DIM, PF_DIM
    params = {
        'embed': w((V_LF, E)),
        # Per-layer weights stacked on a leading layer axis, pre-transposed to
        # (in, out); Q/K/V merged, src K/V merged.
        'w_qkv': w((L, E, 3 * E)),   'b_qkv': w((L, 1, 3 * E)),
        'w_o_self': w((L, E, E)),    'b_o_self': w((L, 1, E)),
        'w_q_src': w((L, E, E)),     'b_q_src': w((L, 1, E)),
        'w_kv_src': w((L, E, 2 * E)), 'b_kv_src': w((L, 1, 2 * E)),
        'w_o_src': w((L, E, E)),     'b_o_src': w((L, 1, E)),
        'w1': w((L, E, PF)),         'b1': w((L, 1, PF)),
        'w2': w((L, PF, E)),         'b2': w((L, 1, E)),
        # single LayerNorm per DecoderLayer, shared by its three sub-layers
        # (matches the PyTorch spec: one nn.LayerNorm per DecoderLayer).
        'ln_g': jnp.ones((L, 1, E), jnp.float32),
        'ln_b': jnp.zeros((L, 1, E), jnp.float32),
    }
    out_w = w((E, V_LF))
    out_b = w((1, V_LF))
    params['out_w_pad'] = jnp.zeros((E, OUT_PAD), jnp.float32).at[:, :V_LF].set(out_w)
    params['out_b_pad'] = jnp.zeros((1, OUT_PAD), jnp.float32).at[:, :V_LF].set(out_b)
    return params


# ====================== main ======================

if __name__ == "__main__":
    params = init_params(jax.random.PRNGKey(0))

    B, S, T = 2, 8, 8
    k1, k2, k3 = jax.random.split(jax.random.PRNGKey(0), 3)
    src_tokens = jax.random.randint(k1, (B, S), 1, V_IN, dtype=jnp.int32)
    trg_tokens = jax.random.randint(k2, (B, T), 1, V_LF, dtype=jnp.int32)
    # add some padding to exercise the masks
    src_tokens = src_tokens.at[1, -2:].set(PAD_ID)
    trg_tokens = trg_tokens.at[1, -1:].set(PAD_ID)
    encoder_out = jax.random.normal(k3, (B, S, EMB_DIM), jnp.float32)

    fwd = jax.jit(decoder_forward)
    logits, h = fwd(params, src_tokens, trg_tokens, encoder_out)
    jax.block_until_ready((logits, h))

    assert logits.shape == (B * T, V_LF)
    assert h.shape == (B, T, EMB_DIM)
    assert bool(jnp.all(jnp.isfinite(logits))) and bool(jnp.all(jnp.isfinite(h)))
    print("KERNEL_OK")
</pallas_src>

<mosaic_0001>
module attributes {stable_mosaic.version = 11 : i64} {
  func.func @_fused_decoder_kernel(%arg0: i32, %arg1: memref<16x32xf32, #tpu.memory_space<vmem>>, %arg2: memref<16x32xf32, #tpu.memory_space<vmem>>, %arg3: memref<16x8xf32, #tpu.memory_space<vmem>>, %arg4: memref<16x8xf32, #tpu.memory_space<vmem>>, %arg5: memref<2x32x96xf32, #tpu.memory_space<vmem>>, %arg6: memref<2x1x96xf32, #tpu.memory_space<vmem>>, %arg7: memref<2x32x32xf32, #tpu.memory_space<vmem>>, %arg8: memref<2x1x32xf32, #tpu.memory_space<vmem>>, %arg9: memref<2x32x32xf32, #tpu.memory_space<vmem>>, %arg10: memref<2x1x32xf32, #tpu.memory_space<vmem>>, %arg11: memref<2x32x64xf32, #tpu.memory_space<vmem>>, %arg12: memref<2x1x64xf32, #tpu.memory_space<vmem>>, %arg13: memref<2x32x32xf32, #tpu.memory_space<vmem>>, %arg14: memref<2x1x32xf32, #tpu.memory_space<vmem>>, %arg15: memref<2x32x64xf32, #tpu.memory_space<vmem>>, %arg16: memref<2x1x64xf32, #tpu.memory_space<vmem>>, %arg17: memref<2x64x32xf32, #tpu.memory_space<vmem>>, %arg18: memref<2x1x32xf32, #tpu.memory_space<vmem>>, %arg19: memref<2x1x32xf32, #tpu.memory_space<vmem>>, %arg20: memref<2x1x32xf32, #tpu.memory_space<vmem>>, %arg21: memref<32x128xf32, #tpu.memory_space<vmem>>, %arg22: memref<1x128xf32, #tpu.memory_space<vmem>>, %arg23: memref<16x32xf32, #tpu.memory_space<vmem>>, %arg24: memref<16x128xf32, #tpu.memory_space<vmem>>, %arg25: memref<16x32xf32, #tpu.memory_space<vmem>>) attributes {dimension_semantics = [#tpu.dimension_semantics<parallel>], iteration_bounds = array<i64: 1>, scalar_prefetch = 0 : i64, scratch_operands = 1 : i64, tpu.core_type = #tpu.core_type<tc>, window_params = [{transform_indices = @transform_0, window_bounds = array<i64: 16, 32>}, {transform_indices = @transform_1, window_bounds = array<i64: 16, 32>}, {transform_indices = @transform_2, window_bounds = array<i64: 16, 8>}, {transform_indices = @transform_3, window_bounds = array<i64: 16, 8>}, {pipeline_mode = #tpu.pipeline_mode<synchronous>, transform_indices = @transform_4, window_bounds = array<i64: 2, 32, 96>}, {pipeline_mode = #tpu.pipeline_mode<synchronous>, transform_indices = @transform_5, window_bounds = array<i64: 2, 1, 96>}, {pipeline_mode = #tpu.pipeline_mode<synchronous>, transform_indices = @transform_6, window_bounds = array<i64: 2, 32, 32>}, {pipeline_mode = #tpu.pipeline_mode<synchronous>, transform_indices = @transform_7, window_bounds = array<i64: 2, 1, 32>}, {pipeline_mode = #tpu.pipeline_mode<synchronous>, transform_indices = @transform_8, window_bounds = array<i64: 2, 32, 32>}, {pipeline_mode = #tpu.pipeline_mode<synchronous>, transform_indices = @transform_9, window_bounds = array<i64: 2, 1, 32>}, {pipeline_mode = #tpu.pipeline_mode<synchronous>, transform_indices = @transform_10, window_bounds = array<i64: 2, 32, 64>}, {pipeline_mode = #tpu.pipeline_mode<synchronous>, transform_indices = @transform_11, window_bounds = array<i64: 2, 1, 64>}, {pipeline_mode = #tpu.pipeline_mode<synchronous>, transform_indices = @transform_12, window_bounds = array<i64: 2, 32, 32>}, {pipeline_mode = #tpu.pipeline_mode<synchronous>, transform_indices = @transform_13, window_bounds = array<i64: 2, 1, 32>}, {pipeline_mode = #tpu.pipeline_mode<synchronous>, transform_indices = @transform_14, window_bounds = array<i64: 2, 32, 64>}, {pipeline_mode = #tpu.pipeline_mode<synchronous>, transform_indices = @transform_15, window_bounds = array<i64: 2, 1, 64>}, {pipeline_mode = #tpu.pipeline_mode<synchronous>, transform_indices = @transform_16, window_bounds = array<i64: 2, 64, 32>}, {pipeline_mode = #tpu.pipeline_mode<synchronous>, transform_indices = @transform_17, window_bounds = array<i64: 2, 1, 32>}, {pipeline_mode = #tpu.pipeline_mode<synchronous>, transform_indices = @transform_18, window_bounds = array<i64: 2, 1, 32>}, {pipeline_mode = #tpu.pipeline_mode<synchronous>, transform_indices = @transform_19, window_bounds = array<i64: 2, 1, 32>}, {pipeline_mode = #tpu.pipeline_mode<synchronous>, transform_indices = @transform_20, window_bounds = array<i64: 32, 128>}, {pipeline_mode = #tpu.pipeline_mode<synchronous>, transform_indices = @transform_21, window_bounds = array<i64: 1, 128>}, {transform_indices = @transform_22, window_bounds = array<i64: 16, 32>}, {transform_indices = @transform_23, window_bounds = array<i64: 16, 128>}]} {
    %c0 = arith.constant 0 : index
    %c0_0 = arith.constant 0 : index
    %0 = vector.load %arg1[%c0, %c0_0] : memref<16x32xf32, #tpu.memory_space<vmem>>, vector<16x32xf32>
    %c0_1 = arith.constant 0 : index
    %c0_2 = arith.constant 0 : index
    %1 = vector.load %arg2[%c0_1, %c0_2] : memref<16x32xf32, #tpu.memory_space<vmem>>, vector<16x32xf32>
    %c0_3 = arith.constant 0 : index
    %c0_4 = arith.constant 0 : index
    %2 = vector.load %arg3[%c0_3, %c0_4] : memref<16x8xf32, #tpu.memory_space<vmem>>, vector<16x8xf32>
    %cst = arith.constant 0.000000e+00 : f32
    %3 = vector.broadcast %cst : f32 to vector<16x8xf32>
    %4 = arith.cmpf ogt, %2, %3 : vector<16x8xf32>
    %c0_5 = arith.constant 0 : index
    %c0_6 = arith.constant 0 : index
    %5 = vector.load %arg4[%c0_5, %c0_6] : memref<16x8xf32, #tpu.memory_space<vmem>>, vector<16x8xf32>
    %cst_7 = arith.constant 0.000000e+00 : f32
    %6 = vector.broadcast %cst_7 : f32 to vector<16x8xf32>
    %7 = arith.cmpf ogt, %5, %6 : vector<16x8xf32>
    %c0_8 = arith.constant 0 : index
    %c0_9 = arith.constant 0 : index
    %c0_10 = arith.constant 0 : index
    %8 = vector.load %arg19[%c0_8, %c0_9, %c0_10] : memref<2x1x32xf32, #tpu.memory_space<vmem>>, vector<1x1x32xf32>
    %9 = vector.shape_cast %8 : vector<1x1x32xf32> to vector<1x32xf32>
    %10 = vector.shape_cast %9 : vector<1x32xf32> to vector<1x32xf32>
    %11 = vector.broadcast %10 : vector<1x32xf32> to vector<16x32xf32>
    %c0_11 = arith.constant 0 : index
    %c0_12 = arith.constant 0 : index
    %c0_13 = arith.constant 0 : index
    %12 = vector.load %arg20[%c0_11, %c0_12, %c0_13] : memref<2x1x32xf32, #tpu.memory_space<vmem>>, vector<1x1x32xf32>
    %13 = vector.shape_cast %12 : vector<1x1x32xf32> to vector<1x32xf32>
    %14 = vector.shape_cast %13 : vector<1x32xf32> to vector<1x32xf32>
    %15 = vector.broadcast %14 : vector<1x32xf32> to vector<16x32xf32>
    %c0_14 = arith.constant 0 : index
    %c0_15 = arith.constant 0 : index
    %c0_16 = arith.constant 0 : index
    %16 = vector.load %arg5[%c0_14, %c0_15, %c0_16] : memref<2x32x96xf32, #tpu.memory_space<vmem>>, vector<1x32x96xf32>
    %17 = vector.shape_cast %16 : vector<1x32x96xf32> to vector<32x96xf32>
    %cst_17 = arith.constant dense<0.000000e+00> : vector<16x96xf32>
    %18 = tpu.matmul %0, %17, %cst_17 {dimension_numbers = #tpu.dot_dimension_numbers<[1], [0], [0], [1], [0, 0, 1, 1], [], []>} : vector<16x32xf32>, vector<32x96xf32>, vector<16x96xf32> -> vector<16x96xf32>
    %c0_18 = arith.constant 0 : index
    %c0_19 = arith.constant 0 : index
    %c0_20 = arith.constant 0 : index
    %19 = vector.load %arg6[%c0_18, %c0_19, %c0_20] : memref<2x1x96xf32, #tpu.memory_space<vmem>>, vector<1x1x96xf32>
    %20 = vector.shape_cast %19 : vector<1x1x96xf32> to vector<1x96xf32>
    %21 = vector.broadcast %20 : vector<1x96xf32> to vector<16x96xf32>
    %22 = arith.addf %18, %21 : vector<16x96xf32>
    %23 = vector.extract_strided_slice %22 {offsets = [0, 0], sizes = [16, 32], strides = [1, 1]} : vector<16x96xf32> to vector<16x32xf32>
    %cst_21 = arith.constant 2.500000e-01 : f32
    %24 = vector.broadcast %cst_21 : f32 to vector<16x32xf32>
    %25 = arith.mulf %23, %24 : vector<16x32xf32>
    %26 = vector.extract_strided_slice %22 {offsets = [0, 32], sizes = [16, 32], strides = [1, 1]} : vector<16x96xf32> to vector<16x32xf32>
    %27 = vector.extract_strided_slice %22 {offsets = [0, 64], sizes = [16, 32], strides = [1, 1]} : vector<16x96xf32> to vector<16x32xf32>
    %c0_22 = arith.constant 0 : index
    %c0_23 = arith.constant 0 : index
    %c0_24 = arith.constant 0 : index
    %28 = vector.load %arg7[%c0_22, %c0_23, %c0_24] : memref<2x32x32xf32, #tpu.memory_space<vmem>>, vector<1x32x32xf32>
    %29 = vector.shape_cast %28 : vector<1x32x32xf32> to vector<32x32xf32>
    %30 = vector.extract_strided_slice %29 {offsets = [0, 0], sizes = [16, 32], strides = [1, 1]} : vector<32x32xf32> to vector<16x32xf32>
    %31 = vector.extract_strided_slice %29 {offsets = [16, 0], sizes = [16, 32], strides = [1, 1]} : vector<32x32xf32> to vector<16x32xf32>
    %32 = vector.extract_strided_slice %25 {offsets = [0, 0], sizes = [8, 32], strides = [1, 1]} : vector<16x32xf32> to vector<8x32xf32>
    %33 = vector.extract_strided_slice %26 {offsets = [0, 0], sizes = [8, 32], strides = [1, 1]} : vector<16x32xf32> to vector<8x32xf32>
    %34 = vector.extract_strided_slice %27 {offsets = [0, 0], sizes = [8, 32], strides = [1, 1]} : vector<16x32xf32> to vector<8x32xf32>
    %35 = vector.extract_strided_slice %4 {offsets = [0, 0], sizes = [8, 8], strides = [1, 1]} : vector<16x8xi1> to vector<8x8xi1>
    %cst_25 = arith.constant 0.000000e+00 : f32
    %36 = vector.broadcast %cst_25 : f32 to vector<8x32xf32>
    %37 = vector.extract_strided_slice %32 {offsets = [0, 0], sizes = [8, 16], strides = [1, 1]} : vector<8x32xf32> to vector<8x16xf32>
    %38 = vector.extract_strided_slice %33 {offsets = [0, 0], sizes = [8, 16], strides = [1, 1]} : vector<8x32xf32> to vector<8x16xf32>
    %cst_26 = arith.constant dense<0.000000e+00> : vector<8x8xf32>
    %39 = tpu.matmul %37, %38, %cst_26 {dimension_numbers = #tpu.dot_dimension_numbers<[1], [1], [0], [0], [0, 0, 1, 0], [], []>} : vector<8x16xf32>, vector<8x16xf32>, vector<8x8xf32> -> vector<8x8xf32>
    %cst_27 = arith.constant -1.000000e+10 : f32
    %40 = vector.broadcast %cst_27 : f32 to vector<8x8xf32>
    %41 = arith.select %35, %39, %40 : vector<8x8xi1>, vector<8x8xf32>
    %cst_28 = arith.constant dense<0xFF800000> : vector<8xf32>
    %42 = vector.multi_reduction <maximumf>, %41, %cst_28 [1] : vector<8x8xf32> to vector<8xf32>
    %43 = vector.shape_cast %42 : vector<8xf32> to vector<8x1xf32>
    %44 = vector.broadcast %43 : vector<8x1xf32> to vector<8x8xf32>
    %45 = arith.subf %41, %44 : vector<8x8xf32>
    %46 = math.exp %45 : vector<8x8xf32>
    %cst_29 = arith.constant dense<0.000000e+00> : vector<8xf32>
    %47 = vector.multi_reduction <add>, %46, %cst_29 [1] : vector<8x8xf32> to vector<8xf32>
    %48 = vector.shape_cast %47 : vector<8xf32> to vector<8x1xf32>
    %49 = tpu.reciprocal %48 {approx = true} : vector<8x1xf32> -> vector<8x1xf32>
    %50 = vector.broadcast %49 : vector<8x1xf32> to vector<8x8xf32>
    %51 = arith.mulf %46, %50 : vector<8x8xf32>
    %52 = vector.extract_strided_slice %34 {offsets = [0, 0], sizes = [8, 16], strides = [1, 1]} : vector<8x32xf32> to vector<8x16xf32>
    %cst_30 = arith.constant dense<0.000000e+00> : vector<8x16xf32>
    %53 = tpu.matmul %51, %52, %cst_30 {dimension_numbers = #tpu.dot_dimension_numbers<[1], [0], [0], [1], [0, 0, 1, 1], [], []>} : vector<8x8xf32>, vector<8x16xf32>, vector<8x16xf32> -> vector<8x16xf32>
    %cst_31 = arith.constant dense<0.000000e+00> : vector<8x32xf32>
    %54 = tpu.matmul %53, %30, %cst_31 {dimension_numbers = #tpu.dot_dimension_numbers<[1], [0], [0], [1], [0, 0, 1, 1], [], []>} : vector<8x16xf32>, vector<16x32xf32>, vector<8x32xf32> -> vector<8x32xf32>
    %55 = arith.addf %36, %54 : vector<8x32xf32>
    %56 = vector.extract_strided_slice %32 {offsets = [0, 16], sizes = [8, 16], strides = [1, 1]} : vector<8x32xf32> to vector<8x16xf32>
    %57 = vector.extract_strided_slice %33 {offsets = [0, 16], sizes = [8, 16], strides = [1, 1]} : vector<8x32xf32> to vector<8x16xf32>
    %cst_32 = arith.constant dense<0.000000e+00> : vector<8x8xf32>
    %58 = tpu.matmul %56, %57, %cst_32 {dimension_numbers = #tpu.dot_dimension_numbers<[1], [1], [0], [0], [0, 0, 1, 0], [], []>} : vector<8x16xf32>, vector<8x16xf32>, vector<8x8xf32> -> vector<8x8xf32>
    %cst_33 = arith.constant -1.000000e+10 : f32
    %59 = vector.broadcast %cst_33 : f32 to vector<8x8xf32>
    %60 = arith.select %35, %58, %59 : vector<8x8xi1>, vector<8x8xf32>
    %cst_34 = arith.constant dense<0xFF800000> : vector<8xf32>
    %61 = vector.multi_reduction <maximumf>, %60, %cst_34 [1] : vector<8x8xf32> to vector<8xf32>
    %62 = vector.shape_cast %61 : vector<8xf32> to vector<8x1xf32>
    %63 = vector.broadcast %62 : vector<8x1xf32> to vector<8x8xf32>
    %64 = arith.subf %60, %63 : vector<8x8xf32>
    %65 = math.exp %64 : vector<8x8xf32>
    %cst_35 = arith.constant dense<0.000000e+00> : vector<8xf32>
    %66 = vector.multi_reduction <add>, %65, %cst_35 [1] : vector<8x8xf32> to vector<8xf32>
    %67 = vector.shape_cast %66 : vector<8xf32> to vector<8x1xf32>
    %68 = tpu.reciprocal %67 {approx = true} : vector<8x1xf32> -> vector<8x1xf32>
    %69 = vector.broadcast %68 : vector<8x1xf32> to vector<8x8xf32>
    %70 = arith.mulf %65, %69 : vector<8x8xf32>
    %71 = vector.extract_strided_slice %34 {offsets = [0, 16], sizes = [8, 16], strides = [1, 1]} : vector<8x32xf32> to vector<8x16xf32>
    %cst_36 = arith.constant dense<0.000000e+00> : vector<8x16xf32>
    %72 = tpu.matmul %70, %71, %cst_36 {dimension_numbers = #tpu.dot_dimension_numbers<[1], [0], [0], [1], [0, 0, 1, 1], [], []>} : vector<8x8xf32>, vector<8x16xf32>, vector<8x16xf32> -> vector<8x16xf32>
    %cst_37 = arith.constant dense<0.000000e+00> : vector<8x32xf32>
    %73 = tpu.matmul %72, %31, %cst_37 {dimension_numbers = #tpu.dot_dimension_numbers<[1], [0], [0], [1], [0, 0, 1, 1], [], []>} : vector<8x16xf32>, vector<16x32xf32>, vector<8x32xf32> -> vector<8x32xf32>
    %74 = arith.addf %55, %73 : vector<8x32xf32>
    %c0_38 = arith.constant 0 : index
    %c0_39 = arith.constant 0 : index
    %75 = vector.load %arg25[%c0_38, %c0_39] : memref<16x32xf32, #tpu.memory_space<vmem>>, vector<8x32xf32>
    tpu.vector_store %arg25[%c0_38, %c0_39], %74 {strides = array<i32>} : memref<16x32xf32, #tpu.memory_space<vmem>>, vector<8x32xf32>,
    %76 = vector.extract_strided_slice %25 {offsets = [8, 0], sizes = [8, 32], strides = [1, 1]} : vector<16x32xf32> to vector<8x32xf32>
    %77 = vector.extract_strided_slice %26 {offsets = [8, 0], sizes = [8, 32], strides = [1, 1]} : vector<16x32xf32> to vector<8x32xf32>
    %78 = vector.extract_strided_slice %27 {offsets = [8, 0], sizes = [8, 32], strides = [1, 1]} : vector<16x32xf32> to vector<8x32xf32>
    %79 = vector.extract_strided_slice %4 {offsets = [8, 0], sizes = [8, 8], strides = [1, 1]} : vector<16x8xi1> to vector<8x8xi1>
    %cst_40 = arith.constant 0.000000e+00 : f32
    %80 = vector.broadcast %cst_40 : f32 to vector<8x32xf32>
    %81 = vector.extract_strided_slice %76 {offsets = [0, 0], sizes = [8, 16], strides = [1, 1]} : vector<8x32xf32> to vector<8x16xf32>
    %82 = vector.extract_strided_slice %77 {offsets = [0, 0], sizes = [8, 16], strides = [1, 1]} : vector<8x32xf32> to vector<8x16xf32>
    %cst_41 = arith.constant dense<0.000000e+00> : vector<8x8xf32>
    %83 = tpu.matmul %81, %82, %cst_41 {dimension_numbers = #tpu.dot_dimension_numbers<[1], [1], [0], [0], [0, 0, 1, 0], [], []>} : vector<8x16xf32>, vector<8x16xf32>, vector<8x8xf32> -> vector<8x8xf32>
    %cst_42 = arith.constant -1.000000e+10 : f32
    %84 = vector.broadcast %cst_42 : f32 to vector<8x8xf32>
    %85 = arith.select %79, %83, %84 : vector<8x8xi1>, vector<8x8xf32>
    %cst_43 = arith.constant dense<0xFF800000> : vector<8xf32>
    %86 = vector.multi_reduction <maximumf>, %85, %cst_43 [1] : vector<8x8xf32> to vector<8xf32>
    %87 = vector.shape_cast %86 : vector<8xf32> to vector<8x1xf32>
    %88 = vector.broadcast %87 : vector<8x1xf32> to vector<8x8xf32>
    %89 = arith.subf %85, %88 : vector<8x8xf32>
    %90 = math.exp %89 : vector<8x8xf32>
    %cst_44 = arith.constant dense<0.000000e+00> : vector<8xf32>
    %91 = vector.multi_reduction <add>, %90, %cst_44 [1] : vector<8x8xf32> to vector<8xf32>
    %92 = vector.shape_cast %91 : vector<8xf32> to vector<8x1xf32>
    %93 = tpu.reciprocal %92 {approx = true} : vector<8x1xf32> -> vector<8x1xf32>
    %94 = vector.broadcast %93 : vector<8x1xf32> to vector<8x8xf32>
    %95 = arith.mulf %90, %94 : vector<8x8xf32>
    %96 = vector.extract_strided_slice %78 {offsets = [0, 0], sizes = [8, 16], strides = [1, 1]} : vector<8x32xf32> to vector<8x16xf32>
    %cst_45 = arith.constant dense<0.000000e+00> : vector<8x16xf32>
    %97 = tpu.matmul %95, %96, %cst_45 {dimension_numbers = #tpu.dot_dimension_numbers<[1], [0], [0], [1], [0, 0, 1, 1], [], []>} : vector<8x8xf32>, vector<8x16xf32>, vector<8x16xf32> -> vector<8x16xf32>
    %cst_46 = arith.constant dense<0.000000e+00> : vector<8x32xf32>
    %98 = tpu.matmul %97, %30, %cst_46 {dimension_numbers = #tpu.dot_dimension_numbers<[1], [0], [0], [1], [0, 0, 1, 1], [], []>} : vector<8x16xf32>, vector<16x32xf32>, vector<8x32xf32> -> vector<8x32xf32>
    %99 = arith.addf %80, %98 : vector<8x32xf32>
    %100 = vector.extract_strided_slice %76 {offsets = [0, 16], sizes = [8, 16], strides = [1, 1]} : vector<8x32xf32> to vector<8x16xf32>
    %101 = vector.extract_strided_slice %77 {offsets = [0, 16], sizes = [8, 16], strides = [1, 1]} : vector<8x32xf32> to vector<8x16xf32>
    %cst_47 = arith.constant dense<0.000000e+00> : vector<8x8xf32>
    %102 = tpu.matmul %100, %101, %cst_47 {dimension_numbers = #tpu.dot_dimension_numbers<[1], [1], [0], [0], [0, 0, 1, 0], [], []>} : vector<8x16xf32>, vector<8x16xf32>, vector<8x8xf32> -> vector<8x8xf32>
    %cst_48 = arith.constant -1.000000e+10 : f32
    %103 = vector.broadcast %cst_48 : f32 to vector<8x8xf32>
    %104 = arith.select %79, %102, %103 : vector<8x8xi1>, vector<8x8xf32>
    %cst_49 = arith.constant dense<0xFF800000> : vector<8xf32>
    %105 = vector.multi_reduction <maximumf>, %104, %cst_49 [1] : vector<8x8xf32> to vector<8xf32>
    %106 = vector.shape_cast %105 : vector<8xf32> to vector<8x1xf32>
    %107 = vector.broadcast %106 : vector<8x1xf32> to vector<8x8xf32>
    %108 = arith.subf %104, %107 : vector<8x8xf32>
    %109 = math.exp %108 : vector<8x8xf32>
    %cst_50 = arith.constant dense<0.000000e+00> : vector<8xf32>
    %110 = vector.multi_reduction <add>, %109, %cst_50 [1] : vector<8x8xf32> to vector<8xf32>
    %111 = vector.shape_cast %110 : vector<8xf32> to vector<8x1xf32>
    %112 = tpu.reciprocal %111 {approx = true} : vector<8x1xf32> -> vector<8x1xf32>
    %113 = vector.broadcast %112 : vector<8x1xf32> to vector<8x8xf32>
    %114 = arith.mulf %109, %113 : vector<8x8xf32>
    %115 = vector.extract_strided_slice %78 {offsets = [0, 16], sizes = [8, 16], strides = [1, 1]} : vector<8x32xf32> to vector<8x16xf32>
    %cst_51 = arith.constant dense<0.000000e+00> : vector<8x16xf32>
    %116 = tpu.matmul %114, %115, %cst_51 {dimension_numbers = #tpu.dot_dimension_numbers<[1], [0], [0], [1], [0, 0, 1, 1], [], []>} : vector<8x8xf32>, vector<8x16xf32>, vector<8x16xf32> -> vector<8x16xf32>
    %cst_52 = arith.constant dense<0.000000e+00> : vector<8x32xf32>
    %117 = tpu.matmul %116, %31, %cst_52 {dimension_numbers = #tpu.dot_dimension_numbers<[1], [0], [0], [1], [0, 0, 1, 1], [], []>} : vector<8x16xf32>, vector<16x32xf32>, vector<8x32xf32> -> vector<8x32xf32>
    %118 = arith.addf %99, %117 : vector<8x32xf32>
    %c8 = arith.constant 8 : index
    %c0_53 = arith.constant 0 : index
    %119 = vector.load %arg25[%c8, %c0_53] : memref<16x32xf32, #tpu.memory_space<vmem>>, vector<8x32xf32>
    tpu.vector_store %arg25[%c8, %c0_53], %118 {strides = array<i32>} : memref<16x32xf32, #tpu.memory_space<vmem>>, vector<8x32xf32>,
    %c0_54 = arith.constant 0 : index
    %c0_55 = arith.constant 0 : index
    %120 = vector.load %arg25[%c0_54, %c0_55] : memref<16x32xf32, #tpu.memory_space<vmem>>, vector<16x32xf32>
    %121 = arith.addf %0, %120 : vector<16x32xf32>
    %c0_56 = arith.constant 0 : index
    %c0_57 = arith.constant 0 : index
    %c0_58 = arith.constant 0 : index
    %122 = vector.load %arg8[%c0_56, %c0_57, %c0_58] : memref<2x1x32xf32, #tpu.memory_space<vmem>>, vector<1x1x32xf32>
    %123 = vector.shape_cast %122 : vector<1x1x32xf32> to vector<1x32xf32>
    %124 = vector.broadcast %123 : vector<1x32xf32> to vector<16x32xf32>
    %125 = arith.addf %121, %124 : vector<16x32xf32>
    %cst_59 = arith.constant dense<0.000000e+00> : vector<16xf32>
    %126 = vector.multi_reduction <add>, %125, %cst_59 [1] : vector<16x32xf32> to vector<16xf32>
    %127 = vector.shape_cast %126 : vector<16xf32> to vector<16x1xf32>
    %cst_60 = arith.constant 3.200000e+01 : f32
    %128 = vector.broadcast %cst_60 : f32 to vector<16x1xf32>
    %129 = arith.divf %127, %128 : vector<16x1xf32>
    %130 = vector.broadcast %129 : vector<16x1xf32> to vector<16x32xf32>
    %131 = arith.subf %125, %130 : vector<16x32xf32>
    %132 = arith.mulf %131, %131 : vector<16x32xf32>
    %cst_61 = arith.constant dense<0.000000e+00> : vector<16xf32>
    %133 = vector.multi_reduction <add>, %132, %cst_61 [1] : vector<16x32xf32> to vector<16xf32>
    %134 = vector.shape_cast %133 : vector<16xf32> to vector<16x1xf32>
    %cst_62 = arith.constant 3.200000e+01 : f32
    %135 = vector.broadcast %cst_62 : f32 to vector<16x1xf32>
    %136 = arith.divf %134, %135 : vector<16x1xf32>
    %137 = vector.broadcast %129 : vector<16x1xf32> to vector<16x32xf32>
    %138 = arith.subf %125, %137 : vector<16x32xf32>
    %cst_63 = arith.constant 9.99999974E-6 : f32
    %139 = vector.broadcast %cst_63 : f32 to vector<16x1xf32>
    %140 = arith.addf %136, %139 : vector<16x1xf32>
    %141 = math.rsqrt %140 : vector<16x1xf32>
    %142 = vector.broadcast %141 : vector<16x1xf32> to vector<16x32xf32>
    %143 = arith.mulf %138, %142 : vector<16x32xf32>
    %144 = arith.mulf %143, %11 : vector<16x32xf32>
    %145 = arith.addf %144, %15 : vector<16x32xf32>
    %c0_64 = arith.constant 0 : index
    %c0_65 = arith.constant 0 : index
    %c0_66 = arith.constant 0 : index
    %146 = vector.load %arg9[%c0_64, %c0_65, %c0_66] : memref<2x32x32xf32, #tpu.memory_space<vmem>>, vector<1x32x32xf32>
    %147 = vector.shape_cast %146 : vector<1x32x32xf32> to vector<32x32xf32>
    %cst_67 = arith.constant dense<0.000000e+00> : vector<16x32xf32>
    %148 = tpu.matmul %145, %147, %cst_67 {dimension_numbers = #tpu.dot_dimension_numbers<[1], [0], [0], [1], [0, 0, 1, 1], [], []>} : vector<16x32xf32>, vector<32x32xf32>, vector<16x32xf32> -> vector<16x32xf32>
    %c0_68 = arith.constant 0 : index
    %c0_69 = arith.constant 0 : index
    %c0_70 = arith.constant 0 : index
    %149 = vector.load %arg10[%c0_68, %c0_69, %c0_70] : memref<2x1x32xf32, #tpu.memory_space<vmem>>, vector<1x1x32xf32>
    %150 = vector.shape_cast %149 : vector<1x1x32xf32> to vector<1x32xf32>
    %151 = vector.broadcast %150 : vector<1x32xf32> to vector<16x32xf32>
    %152 = arith.addf %148, %151 : vector<16x32xf32>
    %cst_71 = arith.constant 2.500000e-01 : f32
    %153 = vector.broadcast %cst_71 : f32 to vector<16x32xf32>
    %154 = arith.mulf %152, %153 : vector<16x32xf32>
    %c0_72 = arith.constant 0 : index
    %c0_73 = arith.constant 0 : index
    %c0_74 = arith.constant 0 : index
    %155 = vector.load %arg11[%c0_72, %c0_73, %c0_74] : memref<2x32x64xf32, #tpu.memory_space<vmem>>, vector<1x32x64xf32>
    %156 = vector.shape_cast %155 : vector<1x32x64xf32> to vector<32x64xf32>
    %cst_75 = arith.constant dense<0.000000e+00> : vector<16x64xf32>
    %157 = tpu.matmul %1, %156, %cst_75 {dimension_numbers = #tpu.dot_dimension_numbers<[1], [0], [0], [1], [0, 0, 1, 1], [], []>} : vector<16x32xf32>, vector<32x64xf32>, vector<16x64xf32> -> vector<16x64xf32>
    %c0_76 = arith.constant 0 : index
    %c0_77 = arith.constant 0 : index
    %c0_78 = arith.constant 0 : index
    %158 = vector.load %arg12[%c0_76, %c0_77, %c0_78] : memref<2x1x64xf32, #tpu.memory_space<vmem>>, vector<1x1x64xf32>
    %159 = vector.shape_cast %158 : vector<1x1x64xf32> to vector<1x64xf32>
    %160 = vector.broadcast %159 : vector<1x64xf32> to vector<16x64xf32>
    %161 = arith.addf %157, %160 : vector<16x64xf32>
    %162 = vector.extract_strided_slice %161 {offsets = [0, 0], sizes = [16, 32], strides = [1, 1]} : vector<16x64xf32> to vector<16x32xf32>
    %163 = vector.extract_strided_slice %161 {offsets = [0, 32], sizes = [16, 32], strides = [1, 1]} : vector<16x64xf32> to vector<16x32xf32>
    %c0_79 = arith.constant 0 : index
    %c0_80 = arith.constant 0 : index
    %c0_81 = arith.constant 0 : index
    %164 = vector.load %arg13[%c0_79, %c0_80, %c0_81] : memref<2x32x32xf32, #tpu.memory_space<vmem>>, vector<1x32x32xf32>
    %165 = vector.shape_cast %164 : vector<1x32x32xf32> to vector<32x32xf32>
    %166 = vector.extract_strided_slice %165 {offsets = [0, 0], sizes = [16, 32], strides = [1, 1]} : vector<32x32xf32> to vector<16x32xf32>
    %167 = vector.extract_strided_slice %165 {offsets = [16, 0], sizes = [16, 32], strides = [1, 1]} : vector<32x32xf32> to vector<16x32xf32>
    %168 = vector.extract_strided_slice %154 {offsets = [0, 0], sizes = [8, 32], strides = [1, 1]} : vector<16x32xf32> to vector<8x32xf32>
    %169 = vector.extract_strided_slice %162 {offsets = [0, 0], sizes = [8, 32], strides = [1, 1]} : vector<16x32xf32> to vector<8x32xf32>
    %170 = vector.extract_strided_slice %163 {offsets = [0, 0], sizes = [8, 32], strides = [1, 1]} : vector<16x32xf32> to vector<8x32xf32>
    %171 = vector.extract_strided_slice %7 {offsets = [0, 0], sizes = [8, 8], strides = [1, 1]} : vector<16x8xi1> to vector<8x8xi1>
    %cst_82 = arith.constant 0.000000e+00 : f32
    %172 = vector.broadcast %cst_82 : f32 to vector<8x32xf32>
    %173 = vector.extract_strided_slice %168 {offsets = [0, 0], sizes = [8, 16], strides = [1, 1]} : vector<8x32xf32> to vector<8x16xf32>
    %174 = vector.extract_strided_slice %169 {offsets = [0, 0], sizes = [8, 16], strides = [1, 1]} : vector<8x32xf32> to vector<8x16xf32>
    %cst_83 = arith.constant dense<0.000000e+00> : vector<8x8xf32>
    %175 = tpu.matmul %173, %174, %cst_83 {dimension_numbers = #tpu.dot_dimension_numbers<[1], [1], [0], [0], [0, 0, 1, 0], [], []>} : vector<8x16xf32>, vector<8x16xf32>, vector<8x8xf32> -> vector<8x8xf32>
    %cst_84 = arith.constant -1.000000e+10 : f32
    %176 = vector.broadcast %cst_84 : f32 to vector<8x8xf32>
    %177 = arith.select %171, %175, %176 : vector<8x8xi1>, vector<8x8xf32>
    %cst_85 = arith.constant dense<0xFF800000> : vector<8xf32>
    %178 = vector.multi_reduction <maximumf>, %177, %cst_85 [1] : vector<8x8xf32> to vector<8xf32>
    %179 = vector.shape_cast %178 : vector<8xf32> to vector<8x1xf32>
    %180 = vector.broadcast %179 : vector<8x1xf32> to vector<8x8xf32>
    %181 = arith.subf %177, %180 : vector<8x8xf32>
    %182 = math.exp %181 : vector<8x8xf32>
    %cst_86 = arith.constant dense<0.000000e+00> : vector<8xf32>
    %183 = vector.multi_reduction <add>, %182, %cst_86 [1] : vector<8x8xf32> to vector<8xf32>
    %184 = vector.shape_cast %183 : vector<8xf32> to vector<8x1xf32>
    %185 = tpu.reciprocal %184 {approx = true} : vector<8x1xf32> -> vector<8x1xf32>
    %186 = vector.broadcast %185 : vector<8x1xf32> to vector<8x8xf32>
    %187 = arith.mulf %182, %186 : vector<8x8xf32>
    %188 = vector.extract_strided_slice %170 {offsets = [0, 0], sizes = [8, 16], strides = [1, 1]} : vector<8x32xf32> to vector<8x16xf32>
    %cst_87 = arith.constant dense<0.000000e+00> : vector<8x16xf32>
    %189 = tpu.matmul %187, %188, %cst_87 {dimension_numbers = #tpu.dot_dimension_numbers<[1], [0], [0], [1], [0, 0, 1, 1], [], []>} : vector<8x8xf32>, vector<8x16xf32>, vector<8x16xf32> -> vector<8x16xf32>
    %cst_88 = arith.constant dense<0.000000e+00> : vector<8x32xf32>
    %190 = tpu.matmul %189, %166, %cst_88 {dimension_numbers = #tpu.dot_dimension_numbers<[1], [0], [0], [1], [0, 0, 1, 1], [], []>} : vector<8x16xf32>, vector<16x32xf32>, vector<8x32xf32> -> vector<8x32xf32>
    %191 = arith.addf %172, %190 : vector<8x32xf32>
    %192 = vector.extract_strided_slice %168 {offsets = [0, 16], sizes = [8, 16], strides = [1, 1]} : vector<8x32xf32> to vector<8x16xf32>
    %193 = vector.extract_strided_slice %169 {offsets = [0, 16], sizes = [8, 16], strides = [1, 1]} : vector<8x32xf32> to vector<8x16xf32>
    %cst_89 = arith.constant dense<0.000000e+00> : vector<8x8xf32>
    %194 = tpu.matmul %192, %193, %cst_89 {dimension_numbers = #tpu.dot_dimension_numbers<[1], [1], [0], [0], [0, 0, 1, 0], [], []>} : vector<8x16xf32>, vector<8x16xf32>, vector<8x8xf32> -> vector<8x8xf32>
    %cst_90 = arith.constant -1.000000e+10 : f32
    %195 = vector.broadcast %cst_90 : f32 to vector<8x8xf32>
    %196 = arith.select %171, %194, %195 : vector<8x8xi1>, vector<8x8xf32>
    %cst_91 = arith.constant dense<0xFF800000> : vector<8xf32>
    %197 = vector.multi_reduction <maximumf>, %196, %cst_91 [1] : vector<8x8xf32> to vector<8xf32>
    %198 = vector.shape_cast %197 : vector<8xf32> to vector<8x1xf32>
    %199 = vector.broadcast %198 : vector<8x1xf32> to vector<8x8xf32>
    %200 = arith.subf %196, %199 : vector<8x8xf32>
    %201 = math.exp %200 : vector<8x8xf32>
    %cst_92 = arith.constant dense<0.000000e+00> : vector<8xf32>
    %202 = vector.multi_reduction <add>, %201, %cst_92 [1] : vector<8x8xf32> to vector<8xf32>
    %203 = vector.shape_cast %202 : vector<8xf32> to vector<8x1xf32>
    %204 = tpu.reciprocal %203 {approx = true} : vector<8x1xf32> -> vector<8x1xf32>
    %205 = vector.broadcast %204 : vector<8x1xf32> to vector<8x8xf32>
    %206 = arith.mulf %201, %205 : vector<8x8xf32>
    %207 = vector.extract_strided_slice %170 {offsets = [0, 16], sizes = [8, 16], strides = [1, 1]} : vector<8x32xf32> to vector<8x16xf32>
    %cst_93 = arith.constant dense<0.000000e+00> : vector<8x16xf32>
    %208 = tpu.matmul %206, %207, %cst_93 {dimension_numbers = #tpu.dot_dimension_numbers<[1], [0], [0], [1], [0, 0, 1, 1], [], []>} : vector<8x8xf32>, vector<8x16xf32>, vector<8x16xf32> -> vector<8x16xf32>
    %cst_94 = arith.constant dense<0.000000e+00> : vector<8x32xf32>
    %209 = tpu.matmul %208, %167, %cst_94 {dimension_numbers = #tpu.dot_dimension_numbers<[1], [0], [0], [1], [0, 0, 1, 1], [], []>} : vector<8x16xf32>, vector<16x32xf32>, vector<8x32xf32> -> vector<8x32xf32>
    %210 = arith.addf %191, %209 : vector<8x32xf32>
    %c0_95 = arith.constant 0 : index
    %c0_96 = arith.constant 0 : index
    %211 = vector.load %arg25[%c0_95, %c0_96] : memref<16x32xf32, #tpu.memory_space<vmem>>, vector<8x32xf32>
    tpu.vector_store %arg25[%c0_95, %c0_96], %210 {strides = array<i32>} : memref<16x32xf32, #tpu.memory_space<vmem>>, vector<8x32xf32>,
    %212 = vector.extract_strided_slice %154 {offsets = [8, 0], sizes = [8, 32], strides = [1, 1]} : vector<16x32xf32> to vector<8x32xf32>
    %213 = vector.extract_strided_slice %162 {offsets = [8, 0], sizes = [8, 32], strides = [1, 1]} : vector<16x32xf32> to vector<8x32xf32>
    %214 = vector.extract_strided_slice %163 {offsets = [8, 0], sizes = [8, 32], strides = [1, 1]} : vector<16x32xf32> to vector<8x32xf32>
    %215 = vector.extract_strided_slice %7 {offsets = [8, 0], sizes = [8, 8], strides = [1, 1]} : vector<16x8xi1> to vector<8x8xi1>
    %cst_97 = arith.constant 0.000000e+00 : f32
    %216 = vector.broadcast %cst_97 : f32 to vector<8x32xf32>
    %217 = vector.extract_strided_slice %212 {offsets = [0, 0], sizes = [8, 16], strides = [1, 1]} : vector<8x32xf32> to vector<8x16xf32>
    %218 = vector.extract_strided_slice %213 {offsets = [0, 0], sizes = [8, 16], strides = [1, 1]} : vector<8x32xf32> to vector<8x16xf32>
    %cst_98 = arith.constant dense<0.000000e+00> : vector<8x8xf32>
    %219 = tpu.matmul %217, %218, %cst_98 {dimension_numbers = #tpu.dot_dimension_numbers<[1], [1], [0], [0], [0, 0, 1, 0], [], []>} : vector<8x16xf32>, vector<8x16xf32>, vector<8x8xf32> -> vector<8x8xf32>
    %cst_99 = arith.constant -1.000000e+10 : f32
    %220 = vector.broadcast %cst_99 : f32 to vector<8x8xf32>
    %221 = arith.select %215, %219, %220 : vector<8x8xi1>, vector<8x8xf32>
    %cst_100 = arith.constant dense<0xFF800000> : vector<8xf32>
    %222 = vector.multi_reduction <maximumf>, %221, %cst_100 [1] : vector<8x8xf32> to vector<8xf32>
    %223 = vector.shape_cast %222 : vector<8xf32> to vector<8x1xf32>
    %224 = vector.broadcast %223 : vector<8x1xf32> to vector<8x8xf32>
    %225 = arith.subf %221, %224 : vector<8x8xf32>
    %226 = math.exp %225 : vector<8x8xf32>
    %cst_101 = arith.constant dense<0.000000e+00> : vector<8xf32>
    %227 = vector.multi_reduction <add>, %226, %cst_101 [1] : vector<8x8xf32> to vector<8xf32>
    %228 = vector.shape_cast %227 : vector<8xf32> to vector<8x1xf32>
    %229 = tpu.reciprocal %228 {approx = true} : vector<8x1xf32> -> vector<8x1xf32>
    %230 = vector.broadcast %229 : vector<8x1xf32> to vector<8x8xf32>
    %231 = arith.mulf %226, %230 : vector<8x8xf32>
    %232 = vector.extract_strided_slice %214 {offsets = [0, 0], sizes = [8, 16], strides = [1, 1]} : vector<8x32xf32> to vector<8x16xf32>
    %cst_102 = arith.constant dense<0.000000e+00> : vector<8x16xf32>
    %233 = tpu.matmul %231, %232, %cst_102 {dimension_numbers = #tpu.dot_dimension_numbers<[1], [0], [0], [1], [0, 0, 1, 1], [], []>} : vector<8x8xf32>, vector<8x16xf32>, vector<8x16xf32> -> vector<8x16xf32>
    %cst_103 = arith.constant dense<0.000000e+00> : vector<8x32xf32>
    %234 = tpu.matmul %233, %166, %cst_103 {dimension_numbers = #tpu.dot_dimension_numbers<[1], [0], [0], [1], [0, 0, 1, 1], [], []>} : vector<8x16xf32>, vector<16x32xf32>, vector<8x32xf32> -> vector<8x32xf32>
    %235 = arith.addf %216, %234 : vector<8x32xf32>
    %236 = vector.extract_strided_slice %212 {offsets = [0, 16], sizes = [8, 16], strides = [1, 1]} : vector<8x32xf32> to vector<8x16xf32>
    %237 = vector.extract_strided_slice %213 {offsets = [0, 16], sizes = [8, 16], strides = [1, 1]} : vector<8x32xf32> to vector<8x16xf32>
    %cst_104 = arith.constant dense<0.000000e+00> : vector<8x8xf32>
    %238 = tpu.matmul %236, %237, %cst_104 {dimension_numbers = #tpu.dot_dimension_numbers<[1], [1], [0], [0], [0, 0, 1, 0], [], []>} : vector<8x16xf32>, vector<8x16xf32>, vector<8x8xf32> -> vector<8x8xf32>
    %cst_105 = arith.constant -1.000000e+10 : f32
    %239 = vector.broadcast %cst_105 : f32 to vector<8x8xf32>
    %240 = arith.select %215, %238, %239 : vector<8x8xi1>, vector<8x8xf32>
    %cst_106 = arith.constant dense<0xFF800000> : vector<8xf32>
    %241 = vector.multi_reduction <maximumf>, %240, %cst_106 [1] : vector<8x8xf32> to vector<8xf32>
    %242 = vector.shape_cast %241 : vector<8xf32> to vector<8x1xf32>
    %243 = vector.broadcast %242 : vector<8x1xf32> to vector<8x8xf32>
    %244 = arith.subf %240, %243 : vector<8x8xf32>
    %245 = math.exp %244 : vector<8x8xf32>
    %cst_107 = arith.constant dense<0.000000e+00> : vector<8xf32>
    %246 = vector.multi_reduction <add>, %245, %cst_107 [1] : vector<8x8xf32> to vector<8xf32>
    %247 = vector.shape_cast %246 : vector<8xf32> to vector<8x1xf32>
    %248 = tpu.reciprocal %247 {approx = true} : vector<8x1xf32> -> vector<8x1xf32>
    %249 = vector.broadcast %248 : vector<8x1xf32> to vector<8x8xf32>
    %250 = arith.mulf %245, %249 : vector<8x8xf32>
    %251 = vector.extract_strided_slice %214 {offsets = [0, 16], sizes = [8, 16], strides = [1, 1]} : vector<8x32xf32> to vector<8x16xf32>
    %cst_108 = arith.constant dense<0.000000e+00> : vector<8x16xf32>
    %252 = tpu.matmul %250, %251, %cst_108 {dimension_numbers = #tpu.dot_dimension_numbers<[1], [0], [0], [1], [0, 0, 1, 1], [], []>} : vector<8x8xf32>, vector<8x16xf32>, vector<8x16xf32> -> vector<8x16xf32>
    %cst_109 = arith.constant dense<0.000000e+00> : vector<8x32xf32>
    %253 = tpu.matmul %252, %167, %cst_109 {dimension_numbers = #tpu.dot_dimension_numbers<[1], [0], [0], [1], [0, 0, 1, 1], [], []>} : vector<8x16xf32>, vector<16x32xf32>, vector<8x32xf32> -> vector<8x32xf32>
    %254 = arith.addf %235, %253 : vector<8x32xf32>
    %c8_110 = arith.constant 8 : index
    %c0_111 = arith.constant 0 : index
    %255 = vector.load %arg25[%c8_110, %c0_111] : memref<16x32xf32, #tpu.memory_space<vmem>>, vector<8x32xf32>
    tpu.vector_store %arg25[%c8_110, %c0_111], %254 {strides = array<i32>} : memref<16x32xf32, #tpu.memory_space<vmem>>, vector<8x32xf32>,
    %c0_112 = arith.constant 0 : index
    %c0_113 = arith.constant 0 : index
    %256 = vector.load %arg25[%c0_112, %c0_113] : memref<16x32xf32, #tpu.memory_space<vmem>>, vector<16x32xf32>
    %257 = arith.addf %145, %256 : vector<16x32xf32>
    %c0_114 = arith.constant 0 : index
    %c0_115 = arith.constant 0 : index
    %c0_116 = arith.constant 0 : index
    %258 = vector.load %arg14[%c0_114, %c0_115, %c0_116] : memref<2x1x32xf32, #tpu.memory_space<vmem>>, vector<1x1x32xf32>
    %259 = vector.shape_cast %258 : vector<1x1x32xf32> to vector<1x32xf32>
    %260 = vector.broadcast %259 : vector<1x32xf32> to vector<16x32xf32>
    %261 = arith.addf %257, %260 : vector<16x32xf32>
    %cst_117 = arith.constant dense<0.000000e+00> : vector<16xf32>
    %262 = vector.multi_reduction <add>, %261, %cst_117 [1] : vector<16x32xf32> to vector<16xf32>
    %263 = vector.shape_cast %262 : vector<16xf32> to vector<16x1xf32>
    %cst_118 = arith.constant 3.200000e+01 : f32
    %264 = vector.broadcast %cst_118 : f32 to vector<16x1xf32>
    %265 = arith.divf %263, %264 : vector<16x1xf32>
    %266 = vector.broadcast %265 : vector<16x1xf32> to vector<16x32xf32>
    %267 = arith.subf %261, %266 : vector<16x32xf32>
    %268 = arith.mulf %267, %267 : vector<16x32xf32>
    %cst_119 = arith.constant dense<0.000000e+00> : vector<16xf32>
    %269 = vector.multi_reduction <add>, %268, %cst_119 [1] : vector<16x32xf32> to vector<16xf32>
    %270 = vector.shape_cast %269 : vector<16xf32> to vector<16x1xf32>
    %cst_120 = arith.constant 3.200000e+01 : f32
    %271 = vector.broadcast %cst_120 : f32 to vector<16x1xf32>
    %272 = arith.divf %270, %271 : vector<16x1xf32>
    %273 = vector.broadcast %265 : vector<16x1xf32> to vector<16x32xf32>
    %274 = arith.subf %261, %273 : vector<16x32xf32>
    %cst_121 = arith.constant 9.99999974E-6 : f32
    %275 = vector.broadcast %cst_121 : f32 to vector<16x1xf32>
    %276 = arith.addf %272, %275 : vector<16x1xf32>
    %277 = math.rsqrt %276 : vector<16x1xf32>
    %278 = vector.broadcast %277 : vector<16x1xf32> to vector<16x32xf32>
    %279 = arith.mulf %274, %278 : vector<16x32xf32>
    %280 = arith.mulf %279, %11 : vector<16x32xf32>
    %281 = arith.addf %280, %15 : vector<16x32xf32>
    %c0_122 = arith.constant 0 : index
    %c0_123 = arith.constant 0 : index
    %c0_124 = arith.constant 0 : index
    %282 = vector.load %arg15[%c0_122, %c0_123, %c0_124] : memref<2x32x64xf32, #tpu.memory_space<vmem>>, vector<1x32x64xf32>
    %283 = vector.shape_cast %282 : vector<1x32x64xf32> to vector<32x64xf32>
    %cst_125 = arith.constant dense<0.000000e+00> : vector<16x64xf32>
    %284 = tpu.matmul %281, %283, %cst_125 {dimension_numbers = #tpu.dot_dimension_numbers<[1], [0], [0], [1], [0, 0, 1, 1], [], []>} : vector<16x32xf32>, vector<32x64xf32>, vector<16x64xf32> -> vector<16x64xf32>
    %c0_126 = arith.constant 0 : index
    %c0_127 = arith.constant 0 : index
    %c0_128 = arith.constant 0 : index
    %285 = vector.load %arg16[%c0_126, %c0_127, %c0_128] : memref<2x1x64xf32, #tpu.memory_space<vmem>>, vector<1x1x64xf32>
    %286 = vector.shape_cast %285 : vector<1x1x64xf32> to vector<1x64xf32>
    %287 = vector.broadcast %286 : vector<1x64xf32> to vector<16x64xf32>
    %288 = arith.addf %284, %287 : vector<16x64xf32>
    %cst_129 = arith.constant 0.000000e+00 : f32
    %289 = vector.broadcast %cst_129 : f32 to vector<16x64xf32>
    %290 = arith.maximumf %288, %289 : vector<16x64xf32>
    %c0_130 = arith.constant 0 : index
    %c0_131 = arith.constant 0 : index
    %c0_132 = arith.constant 0 : index
    %291 = vector.load %arg17[%c0_130, %c0_131, %c0_132] : memref<2x64x32xf32, #tpu.memory_space<vmem>>, vector<1x64x32xf32>
    %292 = vector.shape_cast %291 : vector<1x64x32xf32> to vector<64x32xf32>
    %cst_133 = arith.constant dense<0.000000e+00> : vector<16x32xf32>
    %293 = tpu.matmul %290, %292, %cst_133 {dimension_numbers = #tpu.dot_dimension_numbers<[1], [0], [0], [1], [0, 0, 1, 1], [], []>} : vector<16x64xf32>, vector<64x32xf32>, vector<16x32xf32> -> vector<16x32xf32>
    %c0_134 = arith.constant 0 : index
    %c0_135 = arith.constant 0 : index
    %c0_136 = arith.constant 0 : index
    %294 = vector.load %arg18[%c0_134, %c0_135, %c0_136] : memref<2x1x32xf32, #tpu.memory_space<vmem>>, vector<1x1x32xf32>
    %295 = vector.shape_cast %294 : vector<1x1x32xf32> to vector<1x32xf32>
    %296 = vector.broadcast %295 : vector<1x32xf32> to vector<16x32xf32>
    %297 = arith.addf %293, %296 : vector<16x32xf32>
    %298 = arith.addf %281, %297 : vector<16x32xf32>
    %cst_137 = arith.constant dense<0.000000e+00> : vector<16xf32>
    %299 = vector.multi_reduction <add>, %298, %cst_137 [1] : vector<16x32xf32> to vector<16xf32>
    %300 = vector.shape_cast %299 : vector<16xf32> to vector<16x1xf32>
    %cst_138 = arith.constant 3.200000e+01 : f32
    %301 = vector.broadcast %cst_138 : f32 to vector<16x1xf32>
    %302 = arith.divf %300, %301 : vector<16x1xf32>
    %303 = vector.broadcast %302 : vector<16x1xf32> to vector<16x32xf32>
    %304 = arith.subf %298, %303 : vector<16x32xf32>
    %305 = arith.mulf %304, %304 : vector<16x32xf32>
    %cst_139 = arith.constant dense<0.000000e+00> : vector<16xf32>
    %306 = vector.multi_reduction <add>, %305, %cst_139 [1] : vector<16x32xf32> to vector<16xf32>
    %307 = vector.shape_cast %306 : vector<16xf32> to vector<16x1xf32>
    %cst_140 = arith.constant 3.200000e+01 : f32
    %308 = vector.broadcast %cst_140 : f32 to vector<16x1xf32>
    %309 = arith.divf %307, %308 : vector<16x1xf32>
    %310 = vector.broadcast %302 : vector<16x1xf32> to vector<16x32xf32>
    %311 = arith.subf %298, %310 : vector<16x32xf32>
    %cst_141 = arith.constant 9.99999974E-6 : f32
    %312 = vector.broadcast %cst_141 : f32 to vector<16x1xf32>
    %313 = arith.addf %309, %312 : vector<16x1xf32>
    %314 = math.rsqrt %313 : vector<16x1xf32>
    %315 = vector.broadcast %314 : vector<16x1xf32> to vector<16x32xf32>
    %316 = arith.mulf %311, %315 : vector<16x32xf32>
    %317 = arith.mulf %316, %11 : vector<16x32xf32>
    %318 = arith.addf %317, %15 : vector<16x32xf32>
    %c1 = arith.constant 1 : index
    %c0_142 = arith.constant 0 : index
    %c0_143 = arith.constant 0 : index
    %319 = vector.load %arg19[%c1, %c0_142, %c0_143] : memref<2x1x32xf32, #tpu.memory_space<vmem>>, vector<1x1x32xf32>
    %320 = vector.shape_cast %319 : vector<1x1x32xf32> to vector<1x32xf32>
    %321 = vector.shape_cast %320 : vector<1x32xf32> to vector<1x32xf32>
    %322 = vector.broadcast %321 : vector<1x32xf32> to vector<16x32xf32>
    %c1_144 = arith.constant 1 : index
    %c0_145 = arith.constant 0 : index
    %c0_146 = arith.constant 0 : index
    %323 = vector.load %arg20[%c1_144, %c0_145, %c0_146] : memref<2x1x32xf32, #tpu.memory_space<vmem>>, vector<1x1x32xf32>
    %324 = vector.shape_cast %323 : vector<1x1x32xf32> to vector<1x32xf32>
    %325 = vector.shape_cast %324 : vector<1x32xf32> to vector<1x32xf32>
    %326 = vector.broadcast %325 : vector<1x32xf32> to vector<16x32xf32>
    %c1_147 = arith.constant 1 : index
    %c0_148 = arith.constant 0 : index
    %c0_149 = arith.constant 0 : index
    %327 = vector.load %arg5[%c1_147, %c0_148, %c0_149] : memref<2x32x96xf32, #tpu.memory_space<vmem>>, vector<1x32x96xf32>
    %328 = vector.shape_cast %327 : vector<1x32x96xf32> to vector<32x96xf32>
    %cst_150 = arith.constant dense<0.000000e+00> : vector<16x96xf32>
    %329 = tpu.matmul %318, %328, %cst_150 {dimension_numbers = #tpu.dot_dimension_numbers<[1], [0], [0], [1], [0, 0, 1, 1], [], []>} : vector<16x32xf32>, vector<32x96xf32>, vector<16x96xf32> -> vector<16x96xf32>
    %c1_151 = arith.constant 1 : index
    %c0_152 = arith.constant 0 : index
    %c0_153 = arith.constant 0 : index
    %330 = vector.load %arg6[%c1_151, %c0_152, %c0_153] : memref<2x1x96xf32, #tpu.memory_space<vmem>>, vector<1x1x96xf32>
    %331 = vector.shape_cast %330 : vector<1x1x96xf32> to vector<1x96xf32>
    %332 = vector.broadcast %331 : vector<1x96xf32> to vector<16x96xf32>
    %333 = arith.addf %329, %332 : vector<16x96xf32>
    %334 = vector.extract_strided_slice %333 {offsets = [0, 0], sizes = [16, 32], strides = [1, 1]} : vector<16x96xf32> to vector<16x32xf32>
    %cst_154 = arith.constant 2.500000e-01 : f32
    %335 = vector.broadcast %cst_154 : f32 to vector<16x32xf32>
    %336 = arith.mulf %334, %335 : vector<16x32xf32>
    %337 = vector.extract_strided_slice %333 {offsets = [0, 32], sizes = [16, 32], strides = [1, 1]} : vector<16x96xf32> to vector<16x32xf32>
    %338 = vector.extract_strided_slice %333 {offsets = [0, 64], sizes = [16, 32], strides = [1, 1]} : vector<16x96xf32> to vector<16x32xf32>
    %c1_155 = arith.constant 1 : index
    %c0_156 = arith.constant 0 : index
    %c0_157 = arith.constant 0 : index
    %339 = vector.load %arg7[%c1_155, %c0_156, %c0_157] : memref<2x32x32xf32, #tpu.memory_space<vmem>>, vector<1x32x32xf32>
    %340 = vector.shape_cast %339 : vector<1x32x32xf32> to vector<32x32xf32>
    %341 = vector.extract_strided_slice %340 {offsets = [0, 0], sizes = [16, 32], strides = [1, 1]} : vector<32x32xf32> to vector<16x32xf32>
    %342 = vector.extract_strided_slice %340 {offsets = [16, 0], sizes = [16, 32], strides = [1, 1]} : vector<32x32xf32> to vector<16x32xf32>
    %343 = vector.extract_strided_slice %336 {offsets = [0, 0], sizes = [8, 32], strides = [1, 1]} : vector<16x32xf32> to vector<8x32xf32>
    %344 = vector.extract_strided_slice %337 {offsets = [0, 0], sizes = [8, 32], strides = [1, 1]} : vector<16x32xf32> to vector<8x32xf32>
    %345 = vector.extract_strided_slice %338 {offsets = [0, 0], sizes = [8, 32], strides = [1, 1]} : vector<16x32xf32> to vector<8x32xf32>
    %346 = vector.extract_strided_slice %4 {offsets = [0, 0], sizes = [8, 8], strides = [1, 1]} : vector<16x8xi1> to vector<8x8xi1>
    %cst_158 = arith.constant 0.000000e+00 : f32
    %347 = vector.broadcast %cst_158 : f32 to vector<8x32xf32>
    %348 = vector.extract_strided_slice %343 {offsets = [0, 0], sizes = [8, 16], strides = [1, 1]} : vector<8x32xf32> to vector<8x16xf32>
    %349 = vector.extract_strided_slice %344 {offsets = [0, 0], sizes = [8, 16], strides = [1, 1]} : vector<8x32xf32> to vector<8x16xf32>
    %cst_159 = arith.constant dense<0.000000e+00> : vector<8x8xf32>
    %350 = tpu.matmul %348, %349, %cst_159 {dimension_numbers = #tpu.dot_dimension_numbers<[1], [1], [0], [0], [0, 0, 1, 0], [], []>} : vector<8x16xf32>, vector<8x16xf32>, vector<8x8xf32> -> vector<8x8xf32>
    %cst_160 = arith.constant -1.000000e+10 : f32
    %351 = vector.broadcast %cst_160 : f32 to vector<8x8xf32>
    %352 = arith.select %346, %350, %351 : vector<8x8xi1>, vector<8x8xf32>
    %cst_161 = arith.constant dense<0xFF800000> : vector<8xf32>
    %353 = vector.multi_reduction <maximumf>, %352, %cst_161 [1] : vector<8x8xf32> to vector<8xf32>
    %354 = vector.shape_cast %353 : vector<8xf32> to vector<8x1xf32>
    %355 = vector.broadcast %354 : vector<8x1xf32> to vector<8x8xf32>
    %356 = arith.subf %352, %355 : vector<8x8xf32>
    %357 = math.exp %356 : vector<8x8xf32>
    %cst_162 = arith.constant dense<0.000000e+00> : vector<8xf32>
    %358 = vector.multi_reduction <add>, %357, %cst_162 [1] : vector<8x8xf32> to vector<8xf32>
    %359 = vector.shape_cast %358 : vector<8xf32> to vector<8x1xf32>
    %360 = tpu.reciprocal %359 {approx = true} : vector<8x1xf32> -> vector<8x1xf32>
    %361 = vector.broadcast %360 : vector<8x1xf32> to vector<8x8xf32>
    %362 = arith.mulf %357, %361 : vector<8x8xf32>
    %363 = vector.extract_strided_slice %345 {offsets = [0, 0], sizes = [8, 16], strides = [1, 1]} : vector<8x32xf32> to vector<8x16xf32>
    %cst_163 = arith.constant dense<0.000000e+00> : vector<8x16xf32>
    %364 = tpu.matmul %362, %363, %cst_163 {dimension_numbers = #tpu.dot_dimension_numbers<[1], [0], [0], [1], [0, 0, 1, 1], [], []>} : vector<8x8xf32>, vector<8x16xf32>, vector<8x16xf32> -> vector<8x16xf32>
    %cst_164 = arith.constant dense<0.000000e+00> : vector<8x32xf32>
    %365 = tpu.matmul %364, %341, %cst_164 {dimension_numbers = #tpu.dot_dimension_numbers<[1], [0], [0], [1], [0, 0, 1, 1], [], []>} : vector<8x16xf32>, vector<16x32xf32>, vector<8x32xf32> -> vector<8x32xf32>
    %366 = arith.addf %347, %365 : vector<8x32xf32>
    %367 = vector.extract_strided_slice %343 {offsets = [0, 16], sizes = [8, 16], strides = [1, 1]} : vector<8x32xf32> to vector<8x16xf32>
    %368 = vector.extract_strided_slice %344 {offsets = [0, 16], sizes = [8, 16], strides = [1, 1]} : vector<8x32xf32> to vector<8x16xf32>
    %cst_165 = arith.constant dense<0.000000e+00> : vector<8x8xf32>
    %369 = tpu.matmul %367, %368, %cst_165 {dimension_numbers = #tpu.dot_dimension_numbers<[1], [1], [0], [0], [0, 0, 1, 0], [], []>} : vector<8x16xf32>, vector<8x16xf32>, vector<8x8xf32> -> vector<8x8xf32>
    %cst_166 = arith.constant -1.000000e+10 : f32
    %370 = vector.broadcast %cst_166 : f32 to vector<8x8xf32>
    %371 = arith.select %346, %369, %370 : vector<8x8xi1>, vector<8x8xf32>
    %cst_167 = arith.constant dense<0xFF800000> : vector<8xf32>
    %372 = vector.multi_reduction <maximumf>, %371, %cst_167 [1] : vector<8x8xf32> to vector<8xf32>
    %373 = vector.shape_cast %372 : vector<8xf32> to vector<8x1xf32>
    %374 = vector.broadcast %373 : vector<8x1xf32> to vector<8x8xf32>
    %375 = arith.subf %371, %374 : vector<8x8xf32>
    %376 = math.exp %375 : vector<8x8xf32>
    %cst_168 = arith.constant dense<0.000000e+00> : vector<8xf32>
    %377 = vector.multi_reduction <add>, %376, %cst_168 [1] : vector<8x8xf32> to vector<8xf32>
    %378 = vector.shape_cast %377 : vector<8xf32> to vector<8x1xf32>
    %379 = tpu.reciprocal %378 {approx = true} : vector<8x1xf32> -> vector<8x1xf32>
    %380 = vector.broadcast %379 : vector<8x1xf32> to vector<8x8xf32>
    %381 = arith.mulf %376, %380 : vector<8x8xf32>
    %382 = vector.extract_strided_slice %345 {offsets = [0, 16], sizes = [8, 16], strides = [1, 1]} : vector<8x32xf32> to vector<8x16xf32>
    %cst_169 = arith.constant dense<0.000000e+00> : vector<8x16xf32>
    %383 = tpu.matmul %381, %382, %cst_169 {dimension_numbers = #tpu.dot_dimension_numbers<[1], [0], [0], [1], [0, 0, 1, 1], [], []>} : vector<8x8xf32>, vector<8x16xf32>, vector<8x16xf32> -> vector<8x16xf32>
    %cst_170 = arith.constant dense<0.000000e+00> : vector<8x32xf32>
    %384 = tpu.matmul %383, %342, %cst_170 {dimension_numbers = #tpu.dot_dimension_numbers<[1], [0], [0], [1], [0, 0, 1, 1], [], []>} : vector<8x16xf32>, vector<16x32xf32>, vector<8x32xf32> -> vector<8x32xf32>
    %385 = arith.addf %366, %384 : vector<8x32xf32>
    %c0_171 = arith.constant 0 : index
    %c0_172 = arith.constant 0 : index
    %386 = vector.load %arg25[%c0_171, %c0_172] : memref<16x32xf32, #tpu.memory_space<vmem>>, vector<8x32xf32>
    tpu.vector_store %arg25[%c0_171, %c0_172], %385 {strides = array<i32>} : memref<16x32xf32, #tpu.memory_space<vmem>>, vector<8x32xf32>,
    %387 = vector.extract_strided_slice %336 {offsets = [8, 0], sizes = [8, 32], strides = [1, 1]} : vector<16x32xf32> to vector<8x32xf32>
    %388 = vector.extract_strided_slice %337 {offsets = [8, 0], sizes = [8, 32], strides = [1, 1]} : vector<16x32xf32> to vector<8x32xf32>
    %389 = vector.extract_strided_slice %338 {offsets = [8, 0], sizes = [8, 32], strides = [1, 1]} : vector<16x32xf32> to vector<8x32xf32>
    %390 = vector.extract_strided_slice %4 {offsets = [8, 0], sizes = [8, 8], strides = [1, 1]} : vector<16x8xi1> to vector<8x8xi1>
    %cst_173 = arith.constant 0.000000e+00 : f32
    %391 = vector.broadcast %cst_173 : f32 to vector<8x32xf32>
    %392 = vector.extract_strided_slice %387 {offsets = [0, 0], sizes = [8, 16], strides = [1, 1]} : vector<8x32xf32> to vector<8x16xf32>
    %393 = vector.extract_strided_slice %388 {offsets = [0, 0], sizes = [8, 16], strides = [1, 1]} : vector<8x32xf32> to vector<8x16xf32>
    %cst_174 = arith.constant dense<0.000000e+00> : vector<8x8xf32>
    %394 = tpu.matmul %392, %393, %cst_174 {dimension_numbers = #tpu.dot_dimension_numbers<[1], [1], [0], [0], [0, 0, 1, 0], [], []>} : vector<8x16xf32>, vector<8x16xf32>, vector<8x8xf32> -> vector<8x8xf32>
    %cst_175 = arith.constant -1.000000e+10 : f32
    %395 = vector.broadcast %cst_175 : f32 to vector<8x8xf32>
    %396 = arith.select %390, %394, %395 : vector<8x8xi1>, vector<8x8xf32>
    %cst_176 = arith.constant dense<0xFF800000> : vector<8xf32>
    %397 = vector.multi_reduction <maximumf>, %396, %cst_176 [1] : vector<8x8xf32> to vector<8xf32>
    %398 = vector.shape_cast %397 : vector<8xf32> to vector<8x1xf32>
    %399 = vector.broadcast %398 : vector<8x1xf32> to vector<8x8xf32>
    %400 = arith.subf %396, %399 : vector<8x8xf32>
    %401 = math.exp %400 : vector<8x8xf32>
    %cst_177 = arith.constant dense<0.000000e+00> : vector<8xf32>
    %402 = vector.multi_reduction <add>, %401, %cst_177 [1] : vector<8x8xf32> to vector<8xf32>
    %403 = vector.shape_cast %402 : vector<8xf32> to vector<8x1xf32>
    %404 = tpu.reciprocal %403 {approx = true} : vector<8x1xf32> -> vector<8x1xf32>
    %405 = vector.broadcast %404 : vector<8x1xf32> to vector<8x8xf32>
    %406 = arith.mulf %401, %405 : vector<8x8xf32>
    %407 = vector.extract_strided_slice %389 {offsets = [0, 0], sizes = [8, 16], strides = [1, 1]} : vector<8x32xf32> to vector<8x16xf32>
    %cst_178 = arith.constant dense<0.000000e+00> : vector<8x16xf32>
    %408 = tpu.matmul %406, %407, %cst_178 {dimension_numbers = #tpu.dot_dimension_numbers<[1], [0], [0], [1], [0, 0, 1, 1], [], []>} : vector<8x8xf32>, vector<8x16xf32>, vector<8x16xf32> -> vector<8x16xf32>
    %cst_179 = arith.constant dense<0.000000e+00> : vector<8x32xf32>
    %409 = tpu.matmul %408, %341, %cst_179 {dimension_numbers = #tpu.dot_dimension_numbers<[1], [0], [0], [1], [0, 0, 1, 1], [], []>} : vector<8x16xf32>, vector<16x32xf32>, vector<8x32xf32> -> vector<8x32xf32>
    %410 = arith.addf %391, %409 : vector<8x32xf32>
    %411 = vector.extract_strided_slice %387 {offsets = [0, 16], sizes = [8, 16], strides = [1, 1]} : vector<8x32xf32> to vector<8x16xf32>
    %412 = vector.extract_strided_slice %388 {offsets = [0, 16], sizes = [8, 16], strides = [1, 1]} : vector<8x32xf32> to vector<8x16xf32>
    %cst_180 = arith.constant dense<0.000000e+00> : vector<8x8xf32>
    %413 = tpu.matmul %411, %412, %cst_180 {dimension_numbers = #tpu.dot_dimension_numbers<[1], [1], [0], [0], [0, 0, 1, 0], [], []>} : vector<8x16xf32>, vector<8x16xf32>, vector<8x8xf32> -> vector<8x8xf32>
    %cst_181 = arith.constant -1.000000e+10 : f32
    %414 = vector.broadcast %cst_181 : f32 to vector<8x8xf32>
    %415 = arith.select %390, %413, %414 : vector<8x8xi1>, vector<8x8xf32>
    %cst_182 = arith.constant dense<0xFF800000> : vector<8xf32>
    %416 = vector.multi_reduction <maximumf>, %415, %cst_182 [1] : vector<8x8xf32> to vector<8xf32>
    %417 = vector.shape_cast %416 : vector<8xf32> to vector<8x1xf32>
    %418 = vector.broadcast %417 : vector<8x1xf32> to vector<8x8xf32>
    %419 = arith.subf %415, %418 : vector<8x8xf32>
    %420 = math.exp %419 : vector<8x8xf32>
    %cst_183 = arith.constant dense<0.000000e+00> : vector<8xf32>
    %421 = vector.multi_reduction <add>, %420, %cst_183 [1] : vector<8x8xf32> to vector<8xf32>
    %422 = vector.shape_cast %421 : vector<8xf32> to vector<8x1xf32>
    %423 = tpu.reciprocal %422 {approx = true} : vector<8x1xf32> -> vector<8x1xf32>
    %424 = vector.broadcast %423 : vector<8x1xf32> to vector<8x8xf32>
    %425 = arith.mulf %420, %424 : vector<8x8xf32>
    %426 = vector.extract_strided_slice %389 {offsets = [0, 16], sizes = [8, 16], strides = [1, 1]} : vector<8x32xf32> to vector<8x16xf32>
    %cst_184 = arith.constant dense<0.000000e+00> : vector<8x16xf32>
    %427 = tpu.matmul %425, %426, %cst_184 {dimension_numbers = #tpu.dot_dimension_numbers<[1], [0], [0], [1], [0, 0, 1, 1], [], []>} : vector<8x8xf32>, vector<8x16xf32>, vector<8x16xf32> -> vector<8x16xf32>
    %cst_185 = arith.constant dense<0.000000e+00> : vector<8x32xf32>
    %428 = tpu.matmul %427, %342, %cst_185 {dimension_numbers = #tpu.dot_dimension_numbers<[1], [0], [0], [1], [0, 0, 1, 1], [], []>} : vector<8x16xf32>, vector<16x32xf32>, vector<8x32xf32> -> vector<8x32xf32>
    %429 = arith.addf %410, %428 : vector<8x32xf32>
    %c8_186 = arith.constant 8 : index
    %c0_187 = arith.constant 0 : index
    %430 = vector.load %arg25[%c8_186, %c0_187] : memref<16x32xf32, #tpu.memory_space<vmem>>, vector<8x32xf32>
    tpu.vector_store %arg25[%c8_186, %c0_187], %429 {strides = array<i32>} : memref<16x32xf32, #tpu.memory_space<vmem>>, vector<8x32xf32>,
    %c0_188 = arith.constant 0 : index
    %c0_189 = arith.constant 0 : index
    %431 = vector.load %arg25[%c0_188, %c0_189] : memref<16x32xf32, #tpu.memory_space<vmem>>, vector<16x32xf32>
    %432 = arith.addf %318, %431 : vector<16x32xf32>
    %c1_190 = arith.constant 1 : index
    %c0_191 = arith.constant 0 : index
    %c0_192 = arith.constant 0 : index
    %433 = vector.load %arg8[%c1_190, %c0_191, %c0_192] : memref<2x1x32xf32, #tpu.memory_space<vmem>>, vector<1x1x32xf32>
    %434 = vector.shape_cast %433 : vector<1x1x32xf32> to vector<1x32xf32>
    %435 = vector.broadcast %434 : vector<1x32xf32> to vector<16x32xf32>
    %436 = arith.addf %432, %435 : vector<16x32xf32>
    %cst_193 = arith.constant dense<0.000000e+00> : vector<16xf32>
    %437 = vector.multi_reduction <add>, %436, %cst_193 [1] : vector<16x32xf32> to vector<16xf32>
    %438 = vector.shape_cast %437 : vector<16xf32> to vector<16x1xf32>
    %cst_194 = arith.constant 3.200000e+01 : f32
    %439 = vector.broadcast %cst_194 : f32 to vector<16x1xf32>
    %440 = arith.divf %438, %439 : vector<16x1xf32>
    %441 = vector.broadcast %440 : vector<16x1xf32> to vector<16x32xf32>
    %442 = arith.subf %436, %441 : vector<16x32xf32>
    %443 = arith.mulf %442, %442 : vector<16x32xf32>
    %cst_195 = arith.constant dense<0.000000e+00> : vector<16xf32>
    %444 = vector.multi_reduction <add>, %443, %cst_195 [1] : vector<16x32xf32> to vector<16xf32>
    %445 = vector.shape_cast %444 : vector<16xf32> to vector<16x1xf32>
    %cst_196 = arith.constant 3.200000e+01 : f32
    %446 = vector.broadcast %cst_196 : f32 to vector<16x1xf32>
    %447 = arith.divf %445, %446 : vector<16x1xf32>
    %448 = vector.broadcast %440 : vector<16x1xf32> to vector<16x32xf32>
    %449 = arith.subf %436, %448 : vector<16x32xf32>
    %cst_197 = arith.constant 9.99999974E-6 : f32
    %450 = vector.broadcast %cst_197 : f32 to vector<16x1xf32>
    %451 = arith.addf %447, %450 : vector<16x1xf32>
    %452 = math.rsqrt %451 : vector<16x1xf32>
    %453 = vector.broadcast %452 : vector<16x1xf32> to vector<16x32xf32>
    %454 = arith.mulf %449, %453 : vector<16x32xf32>
    %455 = arith.mulf %454, %322 : vector<16x32xf32>
    %456 = arith.addf %455, %326 : vector<16x32xf32>
    %c1_198 = arith.constant 1 : index
    %c0_199 = arith.constant 0 : index
    %c0_200 = arith.constant 0 : index
    %457 = vector.load %arg9[%c1_198, %c0_199, %c0_200] : memref<2x32x32xf32, #tpu.memory_space<vmem>>, vector<1x32x32xf32>
    %458 = vector.shape_cast %457 : vector<1x32x32xf32> to vector<32x32xf32>
    %cst_201 = arith.constant dense<0.000000e+00> : vector<16x32xf32>
    %459 = tpu.matmul %456, %458, %cst_201 {dimension_numbers = #tpu.dot_dimension_numbers<[1], [0], [0], [1], [0, 0, 1, 1], [], []>} : vector<16x32xf32>, vector<32x32xf32>, vector<16x32xf32> -> vector<16x32xf32>
    %c1_202 = arith.constant 1 : index
    %c0_203 = arith.constant 0 : index
    %c0_204 = arith.constant 0 : index
    %460 = vector.load %arg10[%c1_202, %c0_203, %c0_204] : memref<2x1x32xf32, #tpu.memory_space<vmem>>, vector<1x1x32xf32>
    %461 = vector.shape_cast %460 : vector<1x1x32xf32> to vector<1x32xf32>
    %462 = vector.broadcast %461 : vector<1x32xf32> to vector<16x32xf32>
    %463 = arith.addf %459, %462 : vector<16x32xf32>
    %cst_205 = arith.constant 2.500000e-01 : f32
    %464 = vector.broadcast %cst_205 : f32 to vector<16x32xf32>
    %465 = arith.mulf %463, %464 : vector<16x32xf32>
    %c1_206 = arith.constant 1 : index
    %c0_207 = arith.constant 0 : index
    %c0_208 = arith.constant 0 : index
    %466 = vector.load %arg11[%c1_206, %c0_207, %c0_208] : memref<2x32x64xf32, #tpu.memory_space<vmem>>, vector<1x32x64xf32>
    %467 = vector.shape_cast %466 : vector<1x32x64xf32> to vector<32x64xf32>
    %cst_209 = arith.constant dense<0.000000e+00> : vector<16x64xf32>
    %468 = tpu.matmul %1, %467, %cst_209 {dimension_numbers = #tpu.dot_dimension_numbers<[1], [0], [0], [1], [0, 0, 1, 1], [], []>} : vector<16x32xf32>, vector<32x64xf32>, vector<16x64xf32> -> vector<16x64xf32>
    %c1_210 = arith.constant 1 : index
    %c0_211 = arith.constant 0 : index
    %c0_212 = arith.constant 0 : index
    %469 = vector.load %arg12[%c1_210, %c0_211, %c0_212] : memref<2x1x64xf32, #tpu.memory_space<vmem>>, vector<1x1x64xf32>
    %470 = vector.shape_cast %469 : vector<1x1x64xf32> to vector<1x64xf32>
    %471 = vector.broadcast %470 : vector<1x64xf32> to vector<16x64xf32>
    %472 = arith.addf %468, %471 : vector<16x64xf32>
    %473 = vector.extract_strided_slice %472 {offsets = [0, 0], sizes = [16, 32], strides = [1, 1]} : vector<16x64xf32> to vector<16x32xf32>
    %474 = vector.extract_strided_slice %472 {offsets = [0, 32], sizes = [16, 32], strides = [1, 1]} : vector<16x64xf32> to vector<16x32xf32>
    %c1_213 = arith.constant 1 : index
    %c0_214 = arith.constant 0 : index
    %c0_215 = arith.constant 0 : index
    %475 = vector.load %arg13[%c1_213, %c0_214, %c0_215] : memref<2x32x32xf32, #tpu.memory_space<vmem>>, vector<1x32x32xf32>
    %476 = vector.shape_cast %475 : vector<1x32x32xf32> to vector<32x32xf32>
    %477 = vector.extract_strided_slice %476 {offsets = [0, 0], sizes = [16, 32], strides = [1, 1]} : vector<32x32xf32> to vector<16x32xf32>
    %478 = vector.extract_strided_slice %476 {offsets = [16, 0], sizes = [16, 32], strides = [1, 1]} : vector<32x32xf32> to vector<16x32xf32>
    %479 = vector.extract_strided_slice %465 {offsets = [0, 0], sizes = [8, 32], strides = [1, 1]} : vector<16x32xf32> to vector<8x32xf32>
    %480 = vector.extract_strided_slice %473 {offsets = [0, 0], sizes = [8, 32], strides = [1, 1]} : vector<16x32xf32> to vector<8x32xf32>
    %481 = vector.extract_strided_slice %474 {offsets = [0, 0], sizes = [8, 32], strides = [1, 1]} : vector<16x32xf32> to vector<8x32xf32>
    %482 = vector.extract_strided_slice %7 {offsets = [0, 0], sizes = [8, 8], strides = [1, 1]} : vector<16x8xi1> to vector<8x8xi1>
    %cst_216 = arith.constant 0.000000e+00 : f32
    %483 = vector.broadcast %cst_216 : f32 to vector<8x32xf32>
    %484 = vector.extract_strided_slice %479 {offsets = [0, 0], sizes = [8, 16], strides = [1, 1]} : vector<8x32xf32> to vector<8x16xf32>
    %485 = vector.extract_strided_slice %480 {offsets = [0, 0], sizes = [8, 16], strides = [1, 1]} : vector<8x32xf32> to vector<8x16xf32>
    %cst_217 = arith.constant dense<0.000000e+00> : vector<8x8xf32>
    %486 = tpu.matmul %484, %485, %cst_217 {dimension_numbers = #tpu.dot_dimension_numbers<[1], [1], [0], [0], [0, 0, 1, 0], [], []>} : vector<8x16xf32>, vector<8x16xf32>, vector<8x8xf32> -> vector<8x8xf32>
    %cst_218 = arith.constant -1.000000e+10 : f32
    %487 = vector.broadcast %cst_218 : f32 to vector<8x8xf32>
    %488 = arith.select %482, %486, %487 : vector<8x8xi1>, vector<8x8xf32>
    %cst_219 = arith.constant dense<0xFF800000> : vector<8xf32>
    %489 = vector.multi_reduction <maximumf>, %488, %cst_219 [1] : vector<8x8xf32> to vector<8xf32>
    %490 = vector.shape_cast %489 : vector<8xf32> to vector<8x1xf32>
    %491 = vector.broadcast %490 : vector<8x1xf32> to vector<8x8xf32>
    %492 = arith.subf %488, %491 : vector<8x8xf32>
    %493 = math.exp %492 : vector<8x8xf32>
    %cst_220 = arith.constant dense<0.000000e+00> : vector<8xf32>
    %494 = vector.multi_reduction <add>, %493, %cst_220 [1] : vector<8x8xf32> to vector<8xf32>
    %495 = vector.shape_cast %494 : vector<8xf32> to vector<8x1xf32>
    %496 = tpu.reciprocal %495 {approx = true} : vector<8x1xf32> -> vector<8x1xf32>
    %497 = vector.broadcast %496 : vector<8x1xf32> to vector<8x8xf32>
    %498 = arith.mulf %493, %497 : vector<8x8xf32>
    %499 = vector.extract_strided_slice %481 {offsets = [0, 0], sizes = [8, 16], strides = [1, 1]} : vector<8x32xf32> to vector<8x16xf32>
    %cst_221 = arith.constant dense<0.000000e+00> : vector<8x16xf32>
    %500 = tpu.matmul %498, %499, %cst_221 {dimension_numbers = #tpu.dot_dimension_numbers<[1], [0], [0], [1], [0, 0, 1, 1], [], []>} : vector<8x8xf32>, vector<8x16xf32>, vector<8x16xf32> -> vector<8x16xf32>
    %cst_222 = arith.constant dense<0.000000e+00> : vector<8x32xf32>
    %501 = tpu.matmul %500, %477, %cst_222 {dimension_numbers = #tpu.dot_dimension_numbers<[1], [0], [0], [1], [0, 0, 1, 1], [], []>} : vector<8x16xf32>, vector<16x32xf32>, vector<8x32xf32> -> vector<8x32xf32>
    %502 = arith.addf %483, %501 : vector<8x32xf32>
    %503 = vector.extract_strided_slice %479 {offsets = [0, 16], sizes = [8, 16], strides = [1, 1]} : vector<8x32xf32> to vector<8x16xf32>
    %504 = vector.extract_strided_slice %480 {offsets = [0, 16], sizes = [8, 16], strides = [1, 1]} : vector<8x32xf32> to vector<8x16xf32>
    %cst_223 = arith.constant dense<0.000000e+00> : vector<8x8xf32>
    %505 = tpu.matmul %503, %504, %cst_223 {dimension_numbers = #tpu.dot_dimension_numbers<[1], [1], [0], [0], [0, 0, 1, 0], [], []>} : vector<8x16xf32>, vector<8x16xf32>, vector<8x8xf32> -> vector<8x8xf32>
    %cst_224 = arith.constant -1.000000e+10 : f32
    %506 = vector.broadcast %cst_224 : f32 to vector<8x8xf32>
    %507 = arith.select %482, %505, %506 : vector<8x8xi1>, vector<8x8xf32>
    %cst_225 = arith.constant dense<0xFF800000> : vector<8xf32>
    %508 = vector.multi_reduction <maximumf>, %507, %cst_225 [1] : vector<8x8xf32> to vector<8xf32>
    %509 = vector.shape_cast %508 : vector<8xf32> to vector<8x1xf32>
    %510 = vector.broadcast %509 : vector<8x1xf32> to vector<8x8xf32>
    %511 = arith.subf %507, %510 : vector<8x8xf32>
    %512 = math.exp %511 : vector<8x8xf32>
    %cst_226 = arith.constant dense<0.000000e+00> : vector<8xf32>
    %513 = vector.multi_reduction <add>, %512, %cst_226 [1] : vector<8x8xf32> to vector<8xf32>
    %514 = vector.shape_cast %513 : vector<8xf32> to vector<8x1xf32>
    %515 = tpu.reciprocal %514 {approx = true} : vector<8x1xf32> -> vector<8x1xf32>
    %516 = vector.broadcast %515 : vector<8x1xf32> to vector<8x8xf32>
    %517 = arith.mulf %512, %516 : vector<8x8xf32>
    %518 = vector.extract_strided_slice %481 {offsets = [0, 16], sizes = [8, 16], strides = [1, 1]} : vector<8x32xf32> to vector<8x16xf32>
    %cst_227 = arith.constant dense<0.000000e+00> : vector<8x16xf32>
    %519 = tpu.matmul %517, %518, %cst_227 {dimension_numbers = #tpu.dot_dimension_numbers<[1], [0], [0], [1], [0, 0, 1, 1], [], []>} : vector<8x8xf32>, vector<8x16xf32>, vector<8x16xf32> -> vector<8x16xf32>
    %cst_228 = arith.constant dense<0.000000e+00> : vector<8x32xf32>
    %520 = tpu.matmul %519, %478, %cst_228 {dimension_numbers = #tpu.dot_dimension_numbers<[1], [0], [0], [1], [0, 0, 1, 1], [], []>} : vector<8x16xf32>, vector<16x32xf32>, vector<8x32xf32> -> vector<8x32xf32>
    %521 = arith.addf %502, %520 : vector<8x32xf32>
    %c0_229 = arith.constant 0 : index
    %c0_230 = arith.constant 0 : index
    %522 = vector.load %arg25[%c0_229, %c0_230] : memref<16x32xf32, #tpu.memory_space<vmem>>, vector<8x32xf32>
    tpu.vector_store %arg25[%c0_229, %c0_230], %521 {strides = array<i32>} : memref<16x32xf32, #tpu.memory_space<vmem>>, vector<8x32xf32>,
    %523 = vector.extract_strided_slice %465 {offsets = [8, 0], sizes = [8, 32], strides = [1, 1]} : vector<16x32xf32> to vector<8x32xf32>
    %524 = vector.extract_strided_slice %473 {offsets = [8, 0], sizes = [8, 32], strides = [1, 1]} : vector<16x32xf32> to vector<8x32xf32>
    %525 = vector.extract_strided_slice %474 {offsets = [8, 0], sizes = [8, 32], strides = [1, 1]} : vector<16x32xf32> to vector<8x32xf32>
    %526 = vector.extract_strided_slice %7 {offsets = [8, 0], sizes = [8, 8], strides = [1, 1]} : vector<16x8xi1> to vector<8x8xi1>
    %cst_231 = arith.constant 0.000000e+00 : f32
    %527 = vector.broadcast %cst_231 : f32 to vector<8x32xf32>
    %528 = vector.extract_strided_slice %523 {offsets = [0, 0], sizes = [8, 16], strides = [1, 1]} : vector<8x32xf32> to vector<8x16xf32>
    %529 = vector.extract_strided_slice %524 {offsets = [0, 0], sizes = [8, 16], strides = [1, 1]} : vector<8x32xf32> to vector<8x16xf32>
    %cst_232 = arith.constant dense<0.000000e+00> : vector<8x8xf32>
    %530 = tpu.matmul %528, %529, %cst_232 {dimension_numbers = #tpu.dot_dimension_numbers<[1], [1], [0], [0], [0, 0, 1, 0], [], []>} : vector<8x16xf32>, vector<8x16xf32>, vector<8x8xf32> -> vector<8x8xf32>
    %cst_233 = arith.constant -1.000000e+10 : f32
    %531 = vector.broadcast %cst_233 : f32 to vector<8x8xf32>
    %532 = arith.select %526, %530, %531 : vector<8x8xi1>, vector<8x8xf32>
    %cst_234 = arith.constant dense<0xFF800000> : vector<8xf32>
    %533 = vector.multi_reduction <maximumf>, %532, %cst_234 [1] : vector<8x8xf32> to vector<8xf32>
    %534 = vector.shape_cast %533 : vector<8xf32> to vector<8x1xf32>
    %535 = vector.broadcast %534 : vector<8x1xf32> to vector<8x8xf32>
    %536 = arith.subf %532, %535 : vector<8x8xf32>
    %537 = math.exp %536 : vector<8x8xf32>
    %cst_235 = arith.constant dense<0.000000e+00> : vector<8xf32>
    %538 = vector.multi_reduction <add>, %537, %cst_235 [1] : vector<8x8xf32> to vector<8xf32>
    %539 = vector.shape_cast %538 : vector<8xf32> to vector<8x1xf32>
    %540 = tpu.reciprocal %539 {approx = true} : vector<8x1xf32> -> vector<8x1xf32>
    %541 = vector.broadcast %540 : vector<8x1xf32> to vector<8x8xf32>
    %542 = arith.mulf %537, %541 : vector<8x8xf32>
    %543 = vector.extract_strided_slice %525 {offsets = [0, 0], sizes = [8, 16], strides = [1, 1]} : vector<8x32xf32> to vector<8x16xf32>
    %cst_236 = arith.constant dense<0.000000e+00> : vector<8x16xf32>
    %544 = tpu.matmul %542, %543, %cst_236 {dimension_numbers = #tpu.dot_dimension_numbers<[1], [0], [0], [1], [0, 0, 1, 1], [], []>} : vector<8x8xf32>, vector<8x16xf32>, vector<8x16xf32> -> vector<8x16xf32>
    %cst_237 = arith.constant dense<0.000000e+00> : vector<8x32xf32>
    %545 = tpu.matmul %544, %477, %cst_237 {dimension_numbers = #tpu.dot_dimension_numbers<[1], [0], [0], [1], [0, 0, 1, 1], [], []>} : vector<8x16xf32>, vector<16x32xf32>, vector<8x32xf32> -> vector<8x32xf32>
    %546 = arith.addf %527, %545 : vector<8x32xf32>
    %547 = vector.extract_strided_slice %523 {offsets = [0, 16], sizes = [8, 16], strides = [1, 1]} : vector<8x32xf32> to vector<8x16xf32>
    %548 = vector.extract_strided_slice %524 {offsets = [0, 16], sizes = [8, 16], strides = [1, 1]} : vector<8x32xf32> to vector<8x16xf32>
    %cst_238 = arith.constant dense<0.000000e+00> : vector<8x8xf32>
    %549 = tpu.matmul %547, %548, %cst_238 {dimension_numbers = #tpu.dot_dimension_numbers<[1], [1], [0], [0], [0, 0, 1, 0], [], []>} : vector<8x16xf32>, vector<8x16xf32>, vector<8x8xf32> -> vector<8x8xf32>
    %cst_239 = arith.constant -1.000000e+10 : f32
    %550 = vector.broadcast %cst_239 : f32 to vector<8x8xf32>
    %551 = arith.select %526, %549, %550 : vector<8x8xi1>, vector<8x8xf32>
    %cst_240 = arith.constant dense<0xFF800000> : vector<8xf32>
    %552 = vector.multi_reduction <maximumf>, %551, %cst_240 [1] : vector<8x8xf32> to vector<8xf32>
    %553 = vector.shape_cast %552 : vector<8xf32> to vector<8x1xf32>
    %554 = vector.broadcast %553 : vector<8x1xf32> to vector<8x8xf32>
    %555 = arith.subf %551, %554 : vector<8x8xf32>
    %556 = math.exp %555 : vector<8x8xf32>
    %cst_241 = arith.constant dense<0.000000e+00> : vector<8xf32>
    %557 = vector.multi_reduction <add>, %556, %cst_241 [1] : vector<8x8xf32> to vector<8xf32>
    %558 = vector.shape_cast %557 : vector<8xf32> to vector<8x1xf32>
    %559 = tpu.reciprocal %558 {approx = true} : vector<8x1xf32> -> vector<8x1xf32>
    %560 = vector.broadcast %559 : vector<8x1xf32> to vector<8x8xf32>
    %561 = arith.mulf %556, %560 : vector<8x8xf32>
    %562 = vector.extract_strided_slice %525 {offsets = [0, 16], sizes = [8, 16], strides = [1, 1]} : vector<8x32xf32> to vector<8x16xf32>
    %cst_242 = arith.constant dense<0.000000e+00> : vector<8x16xf32>
    %563 = tpu.matmul %561, %562, %cst_242 {dimension_numbers = #tpu.dot_dimension_numbers<[1], [0], [0], [1], [0, 0, 1, 1], [], []>} : vector<8x8xf32>, vector<8x16xf32>, vector<8x16xf32> -> vector<8x16xf32>
    %cst_243 = arith.constant dense<0.000000e+00> : vector<8x32xf32>
    %564 = tpu.matmul %563, %478, %cst_243 {dimension_numbers = #tpu.dot_dimension_numbers<[1], [0], [0], [1], [0, 0, 1, 1], [], []>} : vector<8x16xf32>, vector<16x32xf32>, vector<8x32xf32> -> vector<8x32xf32>
    %565 = arith.addf %546, %564 : vector<8x32xf32>
    %c8_244 = arith.constant 8 : index
    %c0_245 = arith.constant 0 : index
    %566 = vector.load %arg25[%c8_244, %c0_245] : memref<16x32xf32, #tpu.memory_space<vmem>>, vector<8x32xf32>
    tpu.vector_store %arg25[%c8_244, %c0_245], %565 {strides = array<i32>} : memref<16x32xf32, #tpu.memory_space<vmem>>, vector<8x32xf32>,
    %c0_246 = arith.constant 0 : index
    %c0_247 = arith.constant 0 : index
    %567 = vector.load %arg25[%c0_246, %c0_247] : memref<16x32xf32, #tpu.memory_space<vmem>>, vector<16x32xf32>
    %568 = arith.addf %456, %567 : vector<16x32xf32>
    %c1_248 = arith.constant 1 : index
    %c0_249 = arith.constant 0 : index
    %c0_250 = arith.constant 0 : index
    %569 = vector.load %arg14[%c1_248, %c0_249, %c0_250] : memref<2x1x32xf32, #tpu.memory_space<vmem>>, vector<1x1x32xf32>
    %570 = vector.shape_cast %569 : vector<1x1x32xf32> to vector<1x32xf32>
    %571 = vector.broadcast %570 : vector<1x32xf32> to vector<16x32xf32>
    %572 = arith.addf %568, %571 : vector<16x32xf32>
    %cst_251 = arith.constant dense<0.000000e+00> : vector<16xf32>
    %573 = vector.multi_reduction <add>, %572, %cst_251 [1] : vector<16x32xf32> to vector<16xf32>
    %574 = vector.shape_cast %573 : vector<16xf32> to vector<16x1xf32>
    %cst_252 = arith.constant 3.200000e+01 : f32
    %575 = vector.broadcast %cst_252 : f32 to vector<16x1xf32>
    %576 = arith.divf %574, %575 : vector<16x1xf32>
    %577 = vector.broadcast %576 : vector<16x1xf32> to vector<16x32xf32>
    %578 = arith.subf %572, %577 : vector<16x32xf32>
    %579 = arith.mulf %578, %578 : vector<16x32xf32>
    %cst_253 = arith.constant dense<0.000000e+00> : vector<16xf32>
    %580 = vector.multi_reduction <add>, %579, %cst_253 [1] : vector<16x32xf32> to vector<16xf32>
    %581 = vector.shape_cast %580 : vector<16xf32> to vector<16x1xf32>
    %cst_254 = arith.constant 3.200000e+01 : f32
    %582 = vector.broadcast %cst_254 : f32 to vector<16x1xf32>
    %583 = arith.divf %581, %582 : vector<16x1xf32>
    %584 = vector.broadcast %576 : vector<16x1xf32> to vector<16x32xf32>
    %585 = arith.subf %572, %584 : vector<16x32xf32>
    %cst_255 = arith.constant 9.99999974E-6 : f32
    %586 = vector.broadcast %cst_255 : f32 to vector<16x1xf32>
    %587 = arith.addf %583, %586 : vector<16x1xf32>
    %588 = math.rsqrt %587 : vector<16x1xf32>
    %589 = vector.broadcast %588 : vector<16x1xf32> to vector<16x32xf32>
    %590 = arith.mulf %585, %589 : vector<16x32xf32>
    %591 = arith.mulf %590, %322 : vector<16x32xf32>
    %592 = arith.addf %591, %326 : vector<16x32xf32>
    %c1_256 = arith.constant 1 : index
    %c0_257 = arith.constant 0 : index
    %c0_258 = arith.constant 0 : index
    %593 = vector.load %arg15[%c1_256, %c0_257, %c0_258] : memref<2x32x64xf32, #tpu.memory_space<vmem>>, vector<1x32x64xf32>
    %594 = vector.shape_cast %593 : vector<1x32x64xf32> to vector<32x64xf32>
    %cst_259 = arith.constant dense<0.000000e+00> : vector<16x64xf32>
    %595 = tpu.matmul %592, %594, %cst_259 {dimension_numbers = #tpu.dot_dimension_numbers<[1], [0], [0], [1], [0, 0, 1, 1], [], []>} : vector<16x32xf32>, vector<32x64xf32>, vector<16x64xf32> -> vector<16x64xf32>
    %c1_260 = arith.constant 1 : index
    %c0_261 = arith.constant 0 : index
    %c0_262 = arith.constant 0 : index
    %596 = vector.load %arg16[%c1_260, %c0_261, %c0_262] : memref<2x1x64xf32, #tpu.memory_space<vmem>>, vector<1x1x64xf32>
    %597 = vector.shape_cast %596 : vector<1x1x64xf32> to vector<1x64xf32>
    %598 = vector.broadcast %597 : vector<1x64xf32> to vector<16x64xf32>
    %599 = arith.addf %595, %598 : vector<16x64xf32>
    %cst_263 = arith.constant 0.000000e+00 : f32
    %600 = vector.broadcast %cst_263 : f32 to vector<16x64xf32>
    %601 = arith.maximumf %599, %600 : vector<16x64xf32>
    %c1_264 = arith.constant 1 : index
    %c0_265 = arith.constant 0 : index
    %c0_266 = arith.constant 0 : index
    %602 = vector.load %arg17[%c1_264, %c0_265, %c0_266] : memref<2x64x32xf32, #tpu.memory_space<vmem>>, vector<1x64x32xf32>
    %603 = vector.shape_cast %602 : vector<1x64x32xf32> to vector<64x32xf32>
    %cst_267 = arith.constant dense<0.000000e+00> : vector<16x32xf32>
    %604 = tpu.matmul %601, %603, %cst_267 {dimension_numbers = #tpu.dot_dimension_numbers<[1], [0], [0], [1], [0, 0, 1, 1], [], []>} : vector<16x64xf32>, vector<64x32xf32>, vector<16x32xf32> -> vector<16x32xf32>
    %c1_268 = arith.constant 1 : index
    %c0_269 = arith.constant 0 : index
    %c0_270 = arith.constant 0 : index
    %605 = vector.load %arg18[%c1_268, %c0_269, %c0_270] : memref<2x1x32xf32, #tpu.memory_space<vmem>>, vector<1x1x32xf32>
    %606 = vector.shape_cast %605 : vector<1x1x32xf32> to vector<1x32xf32>
    %607 = vector.broadcast %606 : vector<1x32xf32> to vector<16x32xf32>
    %608 = arith.addf %604, %607 : vector<16x32xf32>
    %609 = arith.addf %592, %608 : vector<16x32xf32>
    %cst_271 = arith.constant dense<0.000000e+00> : vector<16xf32>
    %610 = vector.multi_reduction <add>, %609, %cst_271 [1] : vector<16x32xf32> to vector<16xf32>
    %611 = vector.shape_cast %610 : vector<16xf32> to vector<16x1xf32>
    %cst_272 = arith.constant 3.200000e+01 : f32
    %612 = vector.broadcast %cst_272 : f32 to vector<16x1xf32>
    %613 = arith.divf %611, %612 : vector<16x1xf32>
    %614 = vector.broadcast %613 : vector<16x1xf32> to vector<16x32xf32>
    %615 = arith.subf %609, %614 : vector<16x32xf32>
    %616 = arith.mulf %615, %615 : vector<16x32xf32>
    %cst_273 = arith.constant dense<0.000000e+00> : vector<16xf32>
    %617 = vector.multi_reduction <add>, %616, %cst_273 [1] : vector<16x32xf32> to vector<16xf32>
    %618 = vector.shape_cast %617 : vector<16xf32> to vector<16x1xf32>
    %cst_274 = arith.constant 3.200000e+01 : f32
    %619 = vector.broadcast %cst_274 : f32 to vector<16x1xf32>
    %620 = arith.divf %618, %619 : vector<16x1xf32>
    %621 = vector.broadcast %613 : vector<16x1xf32> to vector<16x32xf32>
    %622 = arith.subf %609, %621 : vector<16x32xf32>
    %cst_275 = arith.constant 9.99999974E-6 : f32
    %623 = vector.broadcast %cst_275 : f32 to vector<16x1xf32>
    %624 = arith.addf %620, %623 : vector<16x1xf32>
    %625 = math.rsqrt %624 : vector<16x1xf32>
    %626 = vector.broadcast %625 : vector<16x1xf32> to vector<16x32xf32>
    %627 = arith.mulf %622, %626 : vector<16x32xf32>
    %628 = arith.mulf %627, %322 : vector<16x32xf32>
    %629 = arith.addf %628, %326 : vector<16x32xf32>
    %c0_276 = arith.constant 0 : index
    %c0_277 = arith.constant 0 : index
    %630 = vector.load %arg23[%c0_276, %c0_277] : memref<16x32xf32, #tpu.memory_space<vmem>>, vector<16x32xf32>
    tpu.vector_store %arg23[%c0_276, %c0_277], %629 {strides = array<i32>} : memref<16x32xf32, #tpu.memory_space<vmem>>, vector<16x32xf32>,
    %c0_278 = arith.constant 0 : index
    %c0_279 = arith.constant 0 : index
    %631 = vector.load %arg21[%c0_278, %c0_279] : memref<32x128xf32, #tpu.memory_space<vmem>>, vector<32x128xf32>
    %cst_280 = arith.constant dense<0.000000e+00> : vector<16x128xf32>
    %632 = tpu.matmul %629, %631, %cst_280 {dimension_numbers = #tpu.dot_dimension_numbers<[1], [0], [0], [1], [0, 0, 1, 1], [], []>} : vector<16x32xf32>, vector<32x128xf32>, vector<16x128xf32> -> vector<16x128xf32>
    %c0_281 = arith.constant 0 : index
    %c0_282 = arith.constant 0 : index
    %633 = vector.load %arg22[%c0_281, %c0_282] : memref<1x128xf32, #tpu.memory_space<vmem>>, vector<1x128xf32>
    %634 = vector.broadcast %633 : vector<1x128xf32> to vector<16x128xf32>
    %635 = arith.addf %632, %634 : vector<16x128xf32>
    %c0_283 = arith.constant 0 : index
    %c0_284 = arith.constant 0 : index
    %636 = vector.load %arg24[%c0_283, %c0_284] : memref<16x128xf32, #tpu.memory_space<vmem>>, vector<16x128xf32>
    tpu.vector_store %arg24[%c0_283, %c0_284], %635 {strides = array<i32>} : memref<16x128xf32, #tpu.memory_space<vmem>>, vector<16x128xf32>,
    return
  }
  func.func @transform_0(%arg0: i32) -> (i32, i32) {
    %c0_i32 = arith.constant 0 : i32
    %c0_i32_0 = arith.constant 0 : i32
    return %arg0, %c0_i32 : i32, i32
  }
  func.func @transform_1(%arg0: i32) -> (i32, i32) {
    %c0_i32 = arith.constant 0 : i32
    %c0_i32_0 = arith.constant 0 : i32
    return %arg0, %c0_i32 : i32, i32
  }
  func.func @transform_2(%arg0: i32) -> (i32, i32) {
    %c0_i32 = arith.constant 0 : i32
    %c0_i32_0 = arith.constant 0 : i32
    return %arg0, %c0_i32 : i32, i32
  }
  func.func @transform_3(%arg0: i32) -> (i32, i32) {
    %c0_i32 = arith.constant 0 : i32
    %c0_i32_0 = arith.constant 0 : i32
    return %arg0, %c0_i32 : i32, i32
  }
  func.func @transform_4(%arg0: i32) -> (i32, i32, i32) {
    %c0_i32 = arith.constant 0 : i32
    %c0_i32_0 = arith.constant 0 : i32
    %c0_i32_1 = arith.constant 0 : i32
    %c0_i32_2 = arith.constant 0 : i32
    return %c0_i32, %c0_i32_0, %c0_i32_1 : i32, i32, i32
  }
  func.func @transform_5(%arg0: i32) -> (i32, i32, i32) {
    %c0_i32 = arith.constant 0 : i32
    %c0_i32_0 = arith.constant 0 : i32
    %c0_i32_1 = arith.constant 0 : i32
    %c0_i32_2 = arith.constant 0 : i32
    return %c0_i32, %c0_i32_0, %c0_i32_1 : i32, i32, i32
  }
  func.func @transform_6(%arg0: i32) -> (i32, i32, i32) {
    %c0_i32 = arith.constant 0 : i32
    %c0_i32_0 = arith.constant 0 : i32
    %c0_i32_1 = arith.constant 0 : i32
    %c0_i32_2 = arith.constant 0 : i32
    return %c0_i32, %c0_i32_0, %c0_i32_1 : i32, i32, i32
  }
  func.func @transform_7(%arg0: i32) -> (i32, i32, i32) {
    %c0_i32 = arith.constant 0 : i32
    %c0_i32_0 = arith.constant 0 : i32
    %c0_i32_1 = arith.constant 0 : i32
    %c0_i32_2 = arith.constant 0 : i32
    return %c0_i32, %c0_i32_0, %c0_i32_1 : i32, i32, i32
  }
  func.func @transform_8(%arg0: i32) -> (i32, i32, i32) {
    %c0_i32 = arith.constant 0 : i32
    %c0_i32_0 = arith.constant 0 : i32
    %c0_i32_1 = arith.constant 0 : i32
    %c0_i32_2 = arith.constant 0 : i32
    return %c0_i32, %c0_i32_0, %c0_i32_1 : i32, i32, i32
  }
  func.func @transform_9(%arg0: i32) -> (i32, i32, i32) {
    %c0_i32 = arith.constant 0 : i32
    %c0_i32_0 = arith.constant 0 : i32
    %c0_i32_1 = arith.constant 0 : i32
    %c0_i32_2 = arith.constant 0 : i32
    return %c0_i32, %c0_i32_0, %c0_i32_1 : i32, i32, i32
  }
  func.func @transform_10(%arg0: i32) -> (i32, i32, i32) {
    %c0_i32 = arith.constant 0 : i32
    %c0_i32_0 = arith.constant 0 : i32
    %c0_i32_1 = arith.constant 0 : i32
    %c0_i32_2 = arith.constant 0 : i32
    return %c0_i32, %c0_i32_0, %c0_i32_1 : i32, i32, i32
  }
  func.func @transform_11(%arg0: i32) -> (i32, i32, i32) {
    %c0_i32 = arith.constant 0 : i32
    %c0_i32_0 = arith.constant 0 : i32
    %c0_i32_1 = arith.constant 0 : i32
    %c0_i32_2 = arith.constant 0 : i32
    return %c0_i32, %c0_i32_0, %c0_i32_1 : i32, i32, i32
  }
  func.func @transform_12(%arg0: i32) -> (i32, i32, i32) {
    %c0_i32 = arith.constant 0 : i32
    %c0_i32_0 = arith.constant 0 : i32
    %c0_i32_1 = arith.constant 0 : i32
    %c0_i32_2 = arith.constant 0 : i32
    return %c0_i32, %c0_i32_0, %c0_i32_1 : i32, i32, i32
  }
  func.func @transform_13(%arg0: i32) -> (i32, i32, i32) {
    %c0_i32 = arith.constant 0 : i32
    %c0_i32_0 = arith.constant 0 : i32
    %c0_i32_1 = arith.constant 0 : i32
    %c0_i32_2 = arith.constant 0 : i32
    return %c0_i32, %c0_i32_0, %c0_i32_1 : i32, i32, i32
  }
  func.func @transform_14(%arg0: i32) -> (i32, i32, i32) {
    %c0_i32 = arith.constant 0 : i32
    %c0_i32_0 = arith.constant 0 : i32
    %c0_i32_1 = arith.constant 0 : i32
    %c0_i32_2 = arith.constant 0 : i32
    return %c0_i32, %c0_i32_0, %c0_i32_1 : i32, i32, i32
  }
  func.func @transform_15(%arg0: i32) -> (i32, i32, i32) {
    %c0_i32 = arith.constant 0 : i32
    %c0_i32_0 = arith.constant 0 : i32
    %c0_i32_1 = arith.constant 0 : i32
    %c0_i32_2 = arith.constant 0 : i32
    return %c0_i32, %c0_i32_0, %c0_i32_1 : i32, i32, i32
  }
  func.func @transform_16(%arg0: i32) -> (i32, i32, i32) {
    %c0_i32 = arith.constant 0 : i32
    %c0_i32_0 = arith.constant 0 : i32
    %c0_i32_1 = arith.constant 0 : i32
    %c0_i32_2 = arith.constant 0 : i32
    return %c0_i32, %c0_i32_0, %c0_i32_1 : i32, i32, i32
  }
  func.func @transform_17(%arg0: i32) -> (i32, i32, i32) {
    %c0_i32 = arith.constant 0 : i32
    %c0_i32_0 = arith.constant 0 : i32
    %c0_i32_1 = arith.constant 0 : i32
    %c0_i32_2 = arith.constant 0 : i32
    return %c0_i32, %c0_i32_0, %c0_i32_1 : i32, i32, i32
  }
  func.func @transform_18(%arg0: i32) -> (i32, i32, i32) {
    %c0_i32 = arith.constant 0 : i32
    %c0_i32_0 = arith.constant 0 : i32
    %c0_i32_1 = arith.constant 0 : i32
    %c0_i32_2 = arith.constant 0 : i32
    return %c0_i32, %c0_i32_0, %c0_i32_1 : i32, i32, i32
  }
  func.func @transform_19(%arg0: i32) -> (i32, i32, i32) {
    %c0_i32 = arith.constant 0 : i32
    %c0_i32_0 = arith.constant 0 : i32
    %c0_i32_1 = arith.constant 0 : i32
    %c0_i32_2 = arith.constant 0 : i32
    return %c0_i32, %c0_i32_0, %c0_i32_1 : i32, i32, i32
  }
  func.func @transform_20(%arg0: i32) -> (i32, i32) {
    %c0_i32 = arith.constant 0 : i32
    %c0_i32_0 = arith.constant 0 : i32
    %c0_i32_1 = arith.constant 0 : i32
    return %c0_i32, %c0_i32_0 : i32, i32
  }
  func.func @transform_21(%arg0: i32) -> (i32, i32) {
    %c0_i32 = arith.constant 0 : i32
    %c0_i32_0 = arith.constant 0 : i32
    %c0_i32_1 = arith.constant 0 : i32
    return %c0_i32, %c0_i32_0 : i32, i32
  }
  func.func @transform_22(%arg0: i32) -> (i32, i32) {
    %c0_i32 = arith.constant 0 : i32
    %c0_i32_0 = arith.constant 0 : i32
    return %arg0, %c0_i32 : i32, i32
  }
  func.func @transform_23(%arg0: i32) -> (i32, i32) {
    %c0_i32 = arith.constant 0 : i32
    %c0_i32_0 = arith.constant 0 : i32
    return %arg0, %c0_i32 : i32, i32
  }
}

</mosaic_0001>

<bundles_post_ra>
// kernel: decoder_forward.1
= control target key start
LH: loop header
LB: loop body
LE: loop exit
PB: predicated region body
PF: predicated region fallthrough
CT: control target
= control target key end

     0   :  { %s3519_s0 = inlined_call_operand.vmem [shape: f32[16,32], index: 0, kind: input, shape index: {}]   ;;  %s3520_s1 = inlined_call_operand.vmem [shape: f32[16,32], index: 1, kind: input, shape index: {}]   ;;  %s3521_s2 = inlined_call_operand.vmem [shape: f32[16,8], index: 2, kind: input, shape index: {}]   ;;  %s3522_s3 = inlined_call_operand.vmem [shape: f32[16,8], index: 3, kind: input, shape index: {}]   ;;  %s3523_s4 = inlined_call_operand.vmem [shape: f32[2,32,96], index: 4, kind: input, shape index: {}]   ;;  %s3524_s5 = inlined_call_operand.vmem [shape: f32[2,1,96], index: 5, kind: input, shape index: {}]   ;;  %s3525_s6 = inlined_call_operand.vmem [shape: f32[2,32,32], index: 6, kind: input, shape index: {}]   ;;  %s3526_s7 = inlined_call_operand.vmem [shape: f32[2,1,32], index: 7, kind: input, shape index: {}]   ;;  %s3527_s8 = inlined_call_operand.vmem [shape: f32[2,32,32], index: 8, kind: input, shape index: {}]   ;;  %s3528_s9 = inlined_call_operand.vmem [shape: f32[2,1,32], index: 9, kind: input, shape index: {}]   ;;  %s3529_s10 = inlined_call_operand.vmem [shape: f32[2,32,64], index: 10, kind: input, shape index: {}]   ;;  %s3530_s11 = inlined_call_operand.vmem [shape: f32[2,1,64], index: 11, kind: input, shape index: {}]   ;;  %s3531_s12 = inlined_call_operand.vmem [shape: f32[2,32,32], index: 12, kind: input, shape index: {}]   ;;  %s3532_s13 = inlined_call_operand.vmem [shape: f32[2,1,32], index: 13, kind: input, shape index: {}]   ;;  %s3533_s14 = inlined_call_operand.vmem [shape: f32[2,32,64], index: 14, kind: input, shape index: {}]   ;;  %s3534_s15 = inlined_call_operand.vmem [shape: f32[2,1,64], index: 15, kind: input, shape index: {}]   ;;  %s3535_s16 = inlined_call_operand.vmem [shape: f32[2,64,32], index: 16, kind: input, shape index: {}]   ;;  %s3536_s17 = inlined_call_operand.vmem [shape: f32[2,1,32], index: 17, kind: input, shape index: {}]   ;;  %s3537_s18 = inlined_call_operand.vmem [shape: f32[2,1,32], index: 18, kind: input, shape index: {}]   ;;  %s3538_s19 = inlined_call_operand.vmem [shape: f32[2,1,32], index: 19, kind: input, shape index: {}]   ;;  %s3539_s20 = inlined_call_operand.vmem [shape: f32[32,128], index: 20, kind: input, shape index: {}]   ;;  %s3540_s21 = inlined_call_operand.vmem [shape: f32[1,128], index: 21, kind: input, shape index: {}]   ;;  %s3541_s22 = inlined_call_operand.hbm [shape: f32[16,32], index: 22, kind: output, shape index: {0}]   ;;  %s3542_s23 = inlined_call_operand.hbm [shape: f32[16,128], index: 23, kind: output, shape index: {1}]  }
   0x1   :  { %3561 = sst [smem:[#allocation9_spill]] %s3519_s0 }
   0x2   :  { %3562 = sst [smem:[#allocation10_spill]] %s3520_s1 }
   0x3   :  { %3563 = sst [smem:[#allocation11_spill]] %s3521_s2 }
   0x4   :  { %3564 = sst [smem:[#allocation12_spill]] %s3522_s3 }
   0x5   :  { %3565 = sst [smem:[#allocation13_spill]] %s3523_s4 }
   0x6   :  { %3566 = sst [smem:[#allocation14_spill]] %s3524_s5 }
   0x7   :  { %3567 = sst [smem:[#allocation15_spill]] %s3525_s6 }
   0x8   :  { %3568 = sst [smem:[#allocation16_spill]] %s3526_s7 }
   0x9   :  { %3569 = sst [smem:[#allocation17_spill]] %s3542_s23 }
   0xa   :  { %29 = vsyncpa [#allocation4], 0  ;;  %s3570_s24 = sld [smem:[#allocation13_spill]]  ;;  %vm103_vm0 = vcmask 261120  }
   0xb   :  { %s3571_s28 = sld [smem:[#allocation9_spill]] }
  0x10   :  { %v98_v0 = vld [vmem:[%s3570_s24 + $0x18] sm:$0xff]  ;;  %v97_v1 = vld [vmem:[%s3570_s24 + $0x10] sm:$0xff]  ;;  %v96_v2 = vld [vmem:[%s3570_s24 + $0x8] sm:$0xff] }
  0x11   :  { %122 = vmatpush.msra.mxu0 %v98_v0  ;;  %v95_v3 = vld [vmem:[%s3570_s24] sm:$0xff] }
  0x12   :  { %v2807_v4 = vld [vmem:[%s3571_s28] sm:$0xff] }
  0x13   :  { %123 = vmatpush.msra.mxu0 %v97_v1 }
  0x15   :  { %124 = vmatpush.msra.mxu0 %v96_v2 }
  0x17   :  { %125 = vmatpush.msra.mxu0 %v95_v3 }
  0x18   :  { %2363 = vmatmul.msk.f32.vlgmr.msra.gmra.mxu0 %vm103_vm0, %v2807_v4 }
  0x19   :  { %30 = vsyncpa [#allocation6], 0  ;;  %s3572_s0 = sld [smem:[#allocation14_spill]]  ;;  %s3553_s4 = smov 80   ;;  %vm142_vm1 = vcmask 130048   ;;  %vm169_vm3 = vcmask 64512  }
  0x1a   :  { %s3559_s30 = smov 96   ;;  %s3557_s25 = smov 112   ;;  %v2834_v19 = vld [vmem:[%s3571_s28 + $0x8] sm:$0xff] }
  0x1b   :  { %s3573_s26 = sld [smem:[#allocation11_spill]]  ;;  %s3555_s2 = smov 48  }
  0x1c   :  { %s3551_s6 = smov 64   ;;  %s3574_s5 = sld [smem:[#allocation15_spill]] }
  0x1d   :  { %s3575_s7 = sld [smem:[#allocation16_spill]]  ;;  %s3578_s1 = smov 80  }
  0x1e   :  { %s3577_s28 = sld [smem:[#allocation12_spill]]  ;;  %s3579_s27 = smov 112  }
  0x1f   :  { %v2500_v5 = vld [vmem:[%s3572_s0] ss:$0 sm:$0xff] }
  0x20   :  { %2364 = vmatmul.msk.f32.gmra.mxu0 %vm103_vm0, %v2834_v19 }
  0x21   :  { %v2822_v10 = vld [vmem:[%s3573_s26] sm:$0xff]  ;;  %v2875_v48 = vld [vmem:[%s3573_s26 + $0x8] sm:$0xff] }
  0x22   :  { %vm81_vm2 = vcmp.gt.f32.partialorder %v2822_v10, 0.0  ;;  %v2839_v20 = vld [vmem:[%s3574_s5 + $0x8] sm:$0xff]  ;;  %v2850_v28 = vld [vmem:[%s3574_s5] sm:$0xff]  ;;  %v138_v43 = vld [vmem:[%s3574_s5 + $0x18] sm:$0xff]  ;;  %vm82_vm4 = vcmp.gt.f32.partialorder %v2875_v48, 0.0 }
  0x23   :  { %313 = vmatpush.msra.mxu3 %v2839_v20  ;;  %v137_v53 = vld [vmem:[%s3574_s5 + $0x10] sm:$0xff]  ;;  %v2898_v1 = vld [vmem:[%s3575_s7] ss:$0 sm:$0xff] }
  0x25   :  { %314 = vmatpush.msra.mxu3 %v2850_v28 }
  0x95   :  { %v127_v6 = vpop.f32.mrf.mxu0 }
  0x96   :  { %v128_v7 = vadd.f32 %v2500_v5, %v127_v6 }
  0x98   :  { %209 = vrot.lane.b32.xlu2 %v128_v7, %s3553_s4  ;;  %140 = vrot.lane.b32.xlu0 %v128_v7, %s3559_s30  ;;  %v133_v8 = vmul.f32 0.25, %v128_v7 }
  0x9d   :  { %v130_v29 = vpop.f32.mrf.mxu0 }
  0x9e   :  { %v2853_v30 = vadd.f32 %v2500_v5, %v130_v29 }
  0xa0   :  { %207 = vrot.lane.b32.xlu2 %v133_v8, %s3557_s25  ;;  %v134_v31 = vmul.f32 0.25, %v2853_v30 }
  0xf2   :  { %v210_v23 = vpop.permute.xlu2 %209 }
  0xfa   :  { %v208_v27 = vpop.permute.xlu2 %207 }
 0x10a   :  { %v141_v9 = vpop.permute.xlu0 %140 }
 0x10b   :  { %2365 = vmatpush.xpose.msk.msra.mxu1 %vm142_vm1, %v141_v9 }
 0x10e   :  { %2366 = vmatmul.msk.f32.vlgmr.msra.gmra.mxu1 %vm142_vm1, %v133_v8 }
 0x10f   :  { %290 = vmatpush.msrb.mxu1 %v138_v43 }
 0x111   :  { %291 = vmatpush.msrb.mxu1 %v137_v53 }
 0x18b   :  { %v165_v11 = vpop.f32.mrf.mxu1 }
 0x18c   :  { %v168_v12 = vsel %vm81_vm2, %v165_v11, -1e+10 }
 0x18d   :  { %v170_v13 = vsel %vm169_vm3, %v168_v12, -inf }
 0x18e   :  { %171 = vmax.xlane.f32.xlu0 %v170_v13  ;;  %v2667_v13 = vmov 32.0  }
 0x1a2   :  { %247 = vrot.lane.b32.xlu0 %v128_v7, %s3555_s2 }
 0x1aa   :  { %386 = vrot.lane.b32.xlu0 %v134_v31, %s3557_s25 }
 0x201   :  { %v172_v14 = vpop.xlane.xlu0 %171 }
 0x202   :  { %v173_v15 = vsub.f32 %v168_v12, %v172_v14 }
 0x204   :  { %v174_v16 = vmul.f32 1.442695, %v173_v15 }
 0x206   :  { %2519 = vpow2.f32 %v174_v16 }
 0x20c   :  { %v2520_v17 = vpop.eup %2519 }
 0x20d   :  { %v176_v18 = vsel %vm169_vm3, %v2520_v17, 0.0 }
 0x20e   :  { %177 = vadd.xlane.f32.xlu1 %v176_v18 }
 0x214   :  { %v248_v26 = vpop.permute.xlu0 %247 }
 0x21c   :  { %v387_v40 = vpop.permute.xlu0 %386 }
 0x227   :  { %181 = vrot.lane.b32.xlu1 %v128_v7, %s3551_s6 }
 0x281   :  { %v178_v21 = vpop.xlane.xlu1 %177 }
 0x282   :  { %2521 = vrcp.f32 %v178_v21 }
 0x288   :  { %v2522_v22 = vpop.eup %2521 }
 0x289   :  { %v180_v25 = vmul.f32 %v2522_v22, %v2520_v17 }
 0x299   :  { %v182_v24 = vpop.permute.xlu1 %181 }
 0x29a   :  { %202 = vmatpush.msra.mxu2 %v182_v24 }
 0x29b   :  { %2367 = vmatmul.msk.f32.vlgmr.msra.gmra.mxu2 %vm169_vm3, %v180_v25 }
 0x29c   :  { %2368 = vmatpush.xpose.msk.msrb.mxu2 %vm142_vm1, %v210_v23 }
 0x2a0   :  { %268 = vmatpush.msra.mxu2 %v248_v26 }
 0x2a3   :  { %2369 = vmatmul.msk.f32.vlgmr.msrb.gmra.mxu2 %vm142_vm1, %v208_v27 }
 0x31e   :  { %v204_v32 = vpop.f32.mrf.mxu2 }
 0x31f   :  { %2372 = vmatmul.msk.f32.vlgmr.msra.gmra.mxu3 %vm142_vm1, %v204_v32 }
 0x326   :  { %v232_v33 = vpop.f32.mrf.mxu2 }
 0x327   :  { %v235_v34 = vsel %vm81_vm2, %v232_v33, -1e+10  ;;  %v567_v33 = vld [vmem:[%s3527_s8 + $0x18] sm:$0xff] }
 0x328   :  { %v236_v35 = vsel %vm169_vm3, %v235_v34, -inf }
 0x329   :  { %237 = vmax.xlane.f32.xlu2 %v236_v35  ;;  %v565_v35 = vld [vmem:[%s3527_s8 + $0x8] sm:$0xff] }
 0x341   :  { %388 = vrot.lane.b32.xlu2 %v2853_v30, %s3553_s4 }
 0x39c   :  { %v238_v36 = vpop.xlane.xlu2 %237 }
 0x39d   :  { %v239_v37 = vsub.f32 %v235_v34, %v238_v36  ;;  %v566_v34 = vld [vmem:[%s3527_s8 + $0x10] sm:$0xff] }
 0x39f   :  { %v240_v38 = vmul.f32 1.442695, %v239_v37 }
 0x3a1   :  { %2523 = vpow2.f32 %v240_v38 }
 0x3a2   :  { %v316_v46 = vpop.f32.mrf.mxu3 }
 0x3a4   :  { %v389_v39 = vpop.permute.xlu2 %388 }
 0x3a5   :  { %2376 = vmatpush.xpose.msk.msrb.mxu3 %vm142_vm1, %v389_v39 }
 0x3a7   :  { %v2524_v41 = vpop.eup %2523 }
 0x3a8   :  { %v242_v42 = vsel %vm169_vm3, %v2524_v41, 0.0  ;;  %2377 = vmatmul.msk.f32.vlgmr.msrb.gmra.mxu3 %vm142_vm1, %v387_v40  ;;  %v606_v40 = vld [vmem:[%s3529_s10 + $0x18] sm:$0xff] }
 0x3a9   :  { %243 = vadd.xlane.f32.xlu1 %v242_v42  ;;  %590 = vmatpush.msra.mxu3 %v567_v33 }
 0x3ab   :  { %591 = vmatpush.msra.mxu3 %v566_v34 }
 0x3ad   :  { %592 = vmatpush.msra.mxu3 %v565_v35 }
 0x3c2   :  { %321 = vrot.lane.b32.xlu1 %v2853_v30, %s3559_s30 }
 0x41c   :  { %v244_v44 = vpop.xlane.xlu1 %243 }
 0x41d   :  { %2525 = vrcp.f32 %v244_v44  ;;  %v604_v44 = vld [vmem:[%s3529_s10 + $0x8] sm:$0xff] }
 0x423   :  { %v2526_v45 = vpop.eup %2525 }
 0x424   :  { %v246_v47 = vmul.f32 %v2526_v45, %v2524_v41  ;;  %v605_v41 = vld [vmem:[%s3529_s10 + $0x10] sm:$0xff] }
 0x426   :  { %2370 = vmatmul.msk.f32.vlgmr.msra.gmra.mxu2 %vm169_vm3, %v246_v47 }
 0x42b   :  { %v411_v49 = vpop.f32.mrf.mxu3 }
 0x42c   :  { %v414_v50 = vsel %vm82_vm4, %v411_v49, -1e+10 }
 0x42d   :  { %v415_v51 = vsel %vm169_vm3, %v414_v50, -inf }
 0x42e   :  { %416 = vmax.xlane.f32.xlu0 %v415_v51 }
 0x434   :  { %v322_v52 = vpop.permute.xlu1 %321 }
 0x435   :  { %2373 = vmatpush.xpose.msk.msrb.mxu2 %vm142_vm1, %v322_v52  ;;  %v2949_v52 = vld [vmem:[%s3537_s18] ss:$0 sm:$0xff] }
 0x438   :  { %2374 = vmatmul.msk.f32.vlgmr.msrb.gmra.mxu2 %vm142_vm1, %v134_v31 }
 0x439   :  { %469 = vmatpush.msra.mxu2 %v138_v43 }
 0x43b   :  { %470 = vmatpush.msra.mxu2 %v137_v53 }
 0x4a1   :  { %v417_v54 = vpop.xlane.xlu0 %416 }
 0x4a2   :  { %v418_v55 = vsub.f32 %v414_v50, %v417_v54 }
 0x4a4   :  { %v419_v56 = vmul.f32 1.442695, %v418_v55  ;;  %v2954_v55 = vld [vmem:[%s3538_s19] ss:$0 sm:$0xff] }
 0x4a6   :  { %2527 = vpow2.f32 %v419_v56 }
 0x4a9   :  { %v270_v57 = vpop.f32.mrf.mxu2 }
 0x4aa   :  { %2371 = vmatmul.msk.f32.vlgmr.msrb.gmra.mxu1 %vm142_vm1, %v270_v57 }
 0x4ac   :  { %v2887_v58 = vpop.eup %2527 }
 0x4ad   :  { %v421_v59 = vsel %vm169_vm3, %v2887_v58, 0.0 }
 0x4ae   :  { %422 = vadd.xlane.f32.xlu0 %v421_v59 }
 0x4bb   :  { %v345_v60 = vpop.f32.mrf.mxu2 }
 0x4bc   :  { %v348_v61 = vsel %vm82_vm4, %v345_v60, -1e+10  ;;  %v2967_v60 = vld [vmem:[%s3530_s11] ss:$0 sm:$0xff] }
 0x4bd   :  { %v349_v62 = vsel %vm169_vm3, %v348_v61, -inf }
 0x4be   :  { %350 = vmax.xlane.f32.xlu1 %v349_v62 }
 0x521   :  { %v423_v25 = vpop.xlane.xlu0 %422 }
 0x527   :  { %v293_v63 = vpop.f32.mrf.mxu1 }
 0x528   :  { %v317_v0 = vadd.f32 %v316_v46, %v293_v63  ;;  %v603_v46 = vld [vmem:[%s3529_s10] sm:$0xff] }
 0x529   :  { %v2975_v63 = vld [vmem:[%s3528_s9] ss:$0 sm:$0xff] }
 0x52a   :  { %319 = vst.msk [vmem:[#allocation2] sm:$0xff] %vm103_vm0, %v317_v0 }
 0x531   :  { %v351_v2 = vpop.xlane.xlu1 %350  ;;  %v499_v3 = vld [vmem:[#allocation2] sm:$0xff] }
 0x532   :  { %v352_v5 = vsub.f32 %v348_v61, %v351_v2  ;;  %v501_v6 = vadd.f32 %v499_v3, %v2807_v4 }
 0x534   :  { %v353_v7 = vmul.f32 1.442695, %v352_v5  ;;  %v507_v8 = vadd.f32 %v2898_v1, %v501_v6 }
 0x536   :  { %2529 = vpow2.f32 %v353_v7  ;;  %v509_v9 = vsel %vm103_vm0, %v507_v8, 0.0 }
 0x537   :  { %510 = vadd.xlane.f32.xlu2 %v509_v9  ;;  %2531 = vrcp.f32 %v2667_v13 }
 0x53c   :  { %v2530_v11 = vpop.eup %2529 }
 0x53d   :  { %v355_v12 = vsel %vm169_vm3, %v2530_v11, 0.0  ;;  %v2532_v14 = vpop.eup %2531 }
 0x53e   :  { %356 = vadd.xlane.f32.xlu0 %v355_v12  ;;  %v516_v15 = vmul.f32 32.0, %v2532_v14  ;;  %vm520_vm5 = vweird.f32 %v2532_v14 }
 0x540   :  { %v517_v16 = vsub.f32 1.0, %v516_v15  ;;  %v2989_v15 = vld [vmem:[%s3577_s28] sm:$0xff] }
 0x541   :  { %vm85_vm9 = vcmp.gt.f32.partialorder %v2989_v15, 0.0 }
 0x542   :  { %v518_v4 = vmul.f32 %v2532_v14, %v517_v16 }
 0x544   :  { %v519_v17 = vadd.f32 %v2532_v14, %v518_v4 }
 0x546   :  { %v2906_v18 = vsel %vm520_vm5, %v2532_v14, %v519_v17 }
 0x552   :  { %360 = vrot.lane.b32.xlu0 %v2853_v30, %s3551_s6 }
 0x5aa   :  { %v511_v21 = vpop.xlane.xlu2 %510 }
 0x5ab   :  { %v522_v22 = vmul.f32 %v2906_v18, %v511_v21 }
 0x5ad   :  { %v524_v23 = vsub.f32 %v507_v8, %v522_v22 }
 0x5af   :  { %v526_v24 = vmul.f32 %v524_v23, %v524_v23 }
 0x5b1   :  { %v528_v26 = vsel %vm103_vm0, %v526_v24, 0.0  ;;  %v357_v27 = vpop.xlane.xlu0 %356 }
 0x5b2   :  { %529 = vadd.xlane.f32.xlu2 %v528_v26  ;;  %2533 = vrcp.f32 %v357_v27 }
 0x5b3   :  { %2535 = vrcp.f32 %v423_v25 }
 0x5b8   :  { %v2534_v29 = vpop.eup %2533 }
 0x5b9   :  { %v359_v31 = vmul.f32 %v2534_v29, %v2530_v11  ;;  %v2536_v37 = vpop.eup %2535 }
 0x5ba   :  { %v425_v39 = vmul.f32 %v2536_v37, %v2887_v58 }
 0x5c4   :  { %v361_v32 = vpop.permute.xlu0 %360 }
 0x5c5   :  { %381 = vmatpush.msra.mxu1 %v361_v32 }
 0x5c6   :  { %2375 = vmatmul.msk.f32.vlgmr.msra.gmra.mxu1 %vm169_vm3, %v359_v31 }
 0x5c7   :  { %492 = vmatpush.msrb.mxu1 %v2839_v20  ;;  %v564_v20 = vld [vmem:[%s3527_s8] sm:$0xff] }
 0x5c8   :  { %593 = vmatpush.msra.mxu3 %v564_v20 }
 0x5c9   :  { %493 = vmatpush.msrb.mxu1 %v2850_v28 }
 0x5ca   :  { %426 = vrot.lane.b32.xlu2 %v2853_v30, %s3555_s2  ;;  %s3576_s2 = sld [smem:[#allocation10_spill]] }
 0x5d0   :  { %v77_v47 = vld [vmem:[%s3576_s2] sm:$0xff] }
 0x625   :  { %v530_v28 = vpop.xlane.xlu2 %529 }
 0x626   :  { %v534_v30 = vmul.f32 %v530_v28, %v2906_v18 }
 0x628   :  { %v536_v36 = vadd.f32 1e-05, %v534_v30  ;;  %v3006_v30 = vld [vmem:[%s3576_s2 + $0x8] sm:$0xff] }
 0x62a   :  { %2537 = vrsqrt.f32 %v536_v36  ;;  %vm544_vm7 = vweird.f32 %v536_v36 }
 0x62d   :  { %v427_v38 = vpop.permute.xlu2 %426 }
 0x62e   :  { %447 = vmatpush.msrb.mxu0 %v427_v38 }
 0x62f   :  { %2378 = vmatmul.msk.f32.vlgmr.msrb.gmra.mxu0 %vm169_vm3, %v425_v39 }
 0x630   :  { %v2538_v42 = vpop.eup %2537  ;;  %629 = vmatpush.msra.mxu0 %v606_v40 }
 0x631   :  { %v539_v43 = vmul.f32 %v2538_v42, %v536_v36  ;;  %vm545_vm6 = vweird.f32 %v2538_v42 }
 0x632   :  { %630 = vmatpush.msra.mxu0 %v605_v41  ;;  %vm546_vm8 = vmor %vm544_vm7, %vm545_vm6  ;;  %vm1107_vm6 = vcmask 523264  }
 0x633   :  { %v540_v45 = vmul.f32 %v2538_v42, %v539_v43 }
 0x634   :  { %631 = vmatpush.msra.mxu0 %v604_v44 }
 0x635   :  { %v541_v49 = vmul.f32 0.5, %v540_v45 }
 0x636   :  { %632 = vmatpush.msra.mxu0 %v603_v46 }
 0x637   :  { %v542_v50 = vsub.f32 1.5, %v541_v49  ;;  %2383 = vmatmul.msk.f32.vlgmr.msra.gmra.mxu0 %vm103_vm0, %v77_v47 }
 0x639   :  { %v543_v51 = vmul.f32 %v2538_v42, %v542_v50 }
 0x63b   :  { %v547_v53 = vsel %vm546_vm8, %v2538_v42, %v543_v51 }
 0x63c   :  { %v558_v54 = vmul.f32 %v547_v53, %v524_v23 }
 0x63e   :  { %v560_v56 = vmul.f32 %v2949_v52, %v558_v54 }
 0x63f   :  { %2384 = vmatmul.msk.f32.gmra.mxu0 %vm103_vm0, %v3006_v30 }
 0x640   :  { %v2958_v57 = vadd.f32 %v2954_v55, %v560_v56 }
 0x642   :  { %2381 = vmatmul.msk.f32.vlgmr.msra.gmra.mxu3 %vm103_vm0, %v2958_v57 }
 0x643   :  { %v383_v58 = vpop.f32.mrf.mxu1 }
 0x644   :  { %2380 = vmatmul.msk.f32.vlgmr.msrb.gmra.mxu1 %vm142_vm1, %v383_v58 }
 0x6ac   :  { %v449_v59 = vpop.f32.mrf.mxu0 }
 0x6ad   :  { %2379 = vmatmul.msk.f32.vlgmr.msra.gmra.mxu2 %vm142_vm1, %v449_v59  ;;  %v3022_v59 = vld [vmem:[%s3531_s12 + $0x8] sm:$0xff] }
 0x6ae   :  { %814 = vmatpush.msrb.mxu0 %v3022_v59 }
 0x6b4   :  { %v634_v61 = vpop.f32.mrf.mxu0 }
 0x6b5   :  { %v635_v62 = vadd.f32 %v2967_v60, %v634_v61 }
 0x6b7   :  { %710 = vrot.lane.b32.xlu1 %v635_v62, %s3557_s25  ;;  %2385 = vmatpush.xpose.msk.msrb.mxu2 %vm142_vm1, %v635_v62 }
 0x6c1   :  { %v495_v7 = vpop.f32.mrf.mxu1 }
 0x6c5   :  { %v595_v0 = vpop.f32.mrf.mxu3 }
 0x6c6   :  { %v596_v2 = vadd.f32 %v2975_v63, %v595_v0 }
 0x6c8   :  { %v601_v3 = vmul.f32 0.25, %v596_v2  ;;  %v3031_v2 = vld [vmem:[%s3531_s12] sm:$0xff] }
 0x6c9   :  { %815 = vmatpush.msrb.mxu0 %v3031_v2 }
 0x6ca   :  { %708 = vrot.lane.b32.xlu2 %v601_v3, %s3557_s25  ;;  %2386 = vmatmul.msk.f32.vlgmr.msrb.gmra.mxu2 %vm142_vm1, %v601_v3 }
 0x724   :  { %v709_v6 = vpop.permute.xlu2 %708 }
 0x729   :  { %v711_v5 = vpop.permute.xlu1 %710 }
 0x72a   :  { %2388 = vmatpush.xpose.msk.msra.mxu2 %vm142_vm1, %v711_v5 }
 0x72d   :  { %2389 = vmatmul.msk.f32.vlgmr.msra.gmra.mxu2 %vm142_vm1, %v709_v6 }
 0x730   :  { %v472_v8 = vpop.f32.mrf.mxu2 }
 0x731   :  { %v496_v9 = vadd.f32 %v495_v7, %v472_v8 }
 0x733   :  { %498 = vst.msk [vmem:[#allocation2 + $0x8] sm:$0xff] %vm103_vm0, %v496_v9 }
 0x73a   :  { %v500_v11 = vld [vmem:[#allocation2 + $0x8] sm:$0xff] }
 0x73b   :  { %v502_v12 = vadd.f32 %v500_v11, %v2834_v19  ;;  %v642_v11 = vld [vmem:[%s3531_s12 + $0x10] sm:$0xff] }
 0x73d   :  { %v508_v13 = vadd.f32 %v2898_v1, %v502_v12 }
 0x73f   :  { %v512_v14 = vsel %vm103_vm0, %v508_v13, 0.0 }
 0x740   :  { %513 = vadd.xlane.f32.xlu0 %v512_v14 }
 0x74d   :  { %v667_v16 = vpop.f32.mrf.mxu2 }
 0x74e   :  { %v670_v4 = vsel %vm85_vm9, %v667_v16, -1e+10 }
 0x74f   :  { %v671_v17 = vsel %vm169_vm3, %v670_v4, -inf }
 0x750   :  { %672 = vmax.xlane.f32.xlu1 %v671_v17 }
 0x769   :  { %682 = vrot.lane.b32.xlu1 %v635_v62, %s3559_s30 }
 0x7b0   :  { %v733_v19 = vpop.f32.mrf.mxu2 }
 0x7b1   :  { %v736_v1 = vsel %vm85_vm9, %v733_v19, -1e+10 }
 0x7b2   :  { %v737_v21 = vsel %vm169_vm3, %v736_v1, -inf }
 0x7b3   :  { %738 = vmax.xlane.f32.xlu0 %v737_v21  ;;  %v514_v22 = vpop.xlane.xlu0 %513 }
 0x7b4   :  { %v523_v23 = vmul.f32 %v2906_v18, %v514_v22  ;;  %v3065_v22 = vld [vmem:[%s3532_s13] ss:$0 sm:$0xff] }
 0x7b6   :  { %v525_v24 = vsub.f32 %v508_v13, %v523_v23 }
 0x7b8   :  { %v527_v25 = vmul.f32 %v525_v24, %v525_v24 }
 0x7ba   :  { %v531_v26 = vsel %vm103_vm0, %v527_v25, 0.0 }
 0x7bb   :  { %532 = vadd.xlane.f32.xlu2 %v531_v26 }
 0x7c3   :  { %v673_v27 = vpop.xlane.xlu1 %672 }
 0x7c4   :  { %v674_v29 = vsub.f32 %v670_v4, %v673_v27 }
 0x7c6   :  { %v675_v31 = vmul.f32 1.442695, %v674_v29 }
 0x7c8   :  { %2539 = vpow2.f32 %v675_v31 }
 0x7ce   :  { %v2540_v32 = vpop.eup %2539 }
 0x7cf   :  { %v677_v33 = vsel %vm169_vm3, %v2540_v32, 0.0 }
 0x7d0   :  { %678 = vadd.xlane.f32.xlu2 %v677_v33 }
 0x7db   :  { %v683_v34 = vpop.permute.xlu1 %682 }
 0x7dc   :  { %703 = vmatpush.msra.mxu1 %v683_v34 }
 0x7e8   :  { %748 = vrot.lane.b32.xlu2 %v635_v62, %s3578_s1  ;;  %v637_v62 = vpop.f32.mrf.mxu0 }
 0x7e9   :  { %v3026_v0 = vadd.f32 %v2967_v60, %v637_v62  ;;  %v643_v60 = vld [vmem:[%s3531_s12 + $0x18] sm:$0xff] }
 0x7ea   :  { %791 = vmatpush.msrb.mxu3 %v643_v60 }
 0x7eb   :  { %2393 = vmatpush.xpose.msk.msrb.mxu2 %vm142_vm1, %v3026_v0 }
 0x7ec   :  { %792 = vmatpush.msrb.mxu3 %v642_v11 }
 0x7ef   :  { %968 = vmatpush.msra.mxu2 %v643_v60 }
 0x7f1   :  { %969 = vmatpush.msra.mxu2 %v642_v11 }
 0x826   :  { %v739_v35 = vpop.xlane.xlu0 %738 }
 0x827   :  { %v740_v20 = vsub.f32 %v736_v1, %v739_v35 }
 0x829   :  { %v741_v28 = vmul.f32 1.442695, %v740_v20 }
 0x82b   :  { %2541 = vpow2.f32 %v741_v28 }
 0x82e   :  { %v533_v36 = vpop.xlane.xlu2 %532 }
 0x82f   :  { %v535_v37 = vmul.f32 %v533_v36, %v2906_v18 }
 0x831   :  { %v2542_v38 = vpop.eup %2541  ;;  %v537_v39 = vadd.f32 1e-05, %v535_v37 }
 0x832   :  { %v743_v40 = vsel %vm169_vm3, %v2542_v38, 0.0 }
 0x833   :  { %2543 = vrsqrt.f32 %v537_v39  ;;  %744 = vadd.xlane.f32.xlu0 %v743_v40  ;;  %vm554_vm11 = vweird.f32 %v537_v39 }
 0x839   :  { %v2544_v41 = vpop.eup %2543 }
 0x83a   :  { %v549_v42 = vmul.f32 %v2544_v41, %v537_v39  ;;  %vm555_vm10 = vweird.f32 %v2544_v41 }
 0x83b   :  { %vm556_vm12 = vmor %vm554_vm11, %vm555_vm10 }
 0x83c   :  { %v550_v43 = vmul.f32 %v2544_v41, %v549_v42 }
 0x83e   :  { %v551_v44 = vmul.f32 0.5, %v550_v43 }
 0x840   :  { %v552_v45 = vsub.f32 1.5, %v551_v44  ;;  %v1059_v44 = vld [vmem:[%s3533_s14 + $0x18] sm:$0xff] }
 0x842   :  { %v553_v46 = vmul.f32 %v2544_v41, %v552_v45  ;;  %v1058_v45 = vld [vmem:[%s3533_s14 + $0x10] sm:$0xff] }
 0x843   :  { %v679_v47 = vpop.xlane.xlu2 %678 }
 0x844   :  { %v557_v49 = vsel %vm556_vm12, %v2544_v41, %v553_v46  ;;  %2545 = vrcp.f32 %v679_v47  ;;  %v1057_v46 = vld [vmem:[%s3533_s14 + $0x8] sm:$0xff]  ;;  %v1056_v47 = vld [vmem:[%s3533_s14] sm:$0xff] }
 0x845   :  { %v559_v50 = vmul.f32 %v557_v49, %v525_v24 }
 0x847   :  { %v561_v51 = vmul.f32 %v2949_v52, %v559_v50  ;;  %887 = vrot.lane.b32.xlu0 %v3026_v0, %s3557_s25 }
 0x849   :  { %v3014_v53 = vadd.f32 %v2954_v55, %v561_v51 }
 0x84a   :  { %v2546_v54 = vpop.eup %2545 }
 0x84b   :  { %v681_v56 = vmul.f32 %v2546_v54, %v2540_v32  ;;  %2382 = vmatmul.msk.f32.gmra.mxu3 %vm103_vm0, %v3014_v53  ;;  %v749_v58 = vpop.permute.xlu2 %748 }
 0x84c   :  { %769 = vmatpush.msrb.mxu1 %v749_v58 }
 0x84d   :  { %2387 = vmatmul.msk.f32.vlgmr.msra.gmra.mxu1 %vm169_vm3, %v681_v56 }
 0x8a6   :  { %v745_v61 = vpop.xlane.xlu0 %744 }
 0x8a7   :  { %2547 = vrcp.f32 %v745_v61 }
 0x8ad   :  { %v2548_v3 = vpop.eup %2547 }
 0x8ae   :  { %v747_v5 = vmul.f32 %v2548_v3, %v2542_v38 }
 0x8b0   :  { %2390 = vmatmul.msk.f32.vlgmr.msrb.gmra.mxu1 %vm169_vm3, %v747_v5 }
 0x8b9   :  { %v888_v12 = vpop.permute.xlu0 %887 }
 0x8ba   :  { %2396 = vmatpush.xpose.msk.msra.mxu3 %vm142_vm1, %v888_v12 }
 0x8ca   :  { %v705_v6 = vpop.f32.mrf.mxu1 }
 0x8cb   :  { %2392 = vmatmul.msk.f32.vlgmr.msrb.gmra.mxu0 %vm142_vm1, %v705_v6 }
 0x8ce   :  { %v598_v7 = vpop.f32.mrf.mxu3 }
 0x8cf   :  { %v599_v8 = vadd.f32 %v2975_v63, %v598_v7  ;;  %v3055_v63 = vld [vmem:[%s3577_s28 + $0x8] sm:$0xff]  ;;  %s3582_s28 = smov 48  }
 0x8d0   :  { %vm86_vm13 = vcmp.gt.f32.partialorder %v3055_v63, 0.0 }
 0x8d1   :  { %v602_v9 = vmul.f32 0.25, %v599_v8 }
 0x8d3   :  { %2394 = vmatmul.msk.f32.vlgmr.msrb.gmra.mxu2 %vm142_vm1, %v602_v9  ;;  %885 = vrot.lane.b32.xlu0 %v602_v9, %s3557_s25  ;;  %s3580_s25 = smov 96  }
 0x92d   :  { %v771_v13 = vpop.f32.mrf.mxu1 }
 0x92e   :  { %2391 = vmatmul.msk.f32.vlgmr.msrb.gmra.mxu3 %vm142_vm1, %v771_v13 }
 0x92f   :  { %1082 = vmatpush.msrb.mxu3 %v1059_v44 }
 0x931   :  { %1083 = vmatpush.msrb.mxu3 %v1058_v45 }
 0x933   :  { %1084 = vmatpush.msrb.mxu3 %v1057_v46 }
 0x935   :  { %1085 = vmatpush.msrb.mxu3 %v1056_v47 }
 0x945   :  { %v886_v14 = vpop.permute.xlu0 %885 }
 0x946   :  { %2397 = vmatmul.msk.f32.vlgmr.msra.gmra.mxu3 %vm142_vm1, %v886_v14  ;;  %v1102_v14 = vld [vmem:[%s3535_s16 + $0x38] sm:$0xff] }
 0x948   :  { %v817_v19 = vpop.f32.mrf.mxu0 }
 0x956   :  { %v844_v16 = vpop.f32.mrf.mxu2 }
 0x957   :  { %v847_v4 = vsel %vm86_vm13, %v844_v16, -1e+10  ;;  %v1101_v16 = vld [vmem:[%s3535_s16 + $0x30] sm:$0xff] }
 0x958   :  { %v848_v17 = vsel %vm169_vm3, %v847_v4, -inf }
 0x959   :  { %849 = vmax.xlane.f32.xlu0 %v848_v17  ;;  %v1099_v17 = vld [vmem:[%s3535_s16 + $0x20] sm:$0xff] }
 0x9b1   :  { %v794_v1 = vpop.f32.mrf.mxu3 }
 0x9b2   :  { %v818_v21 = vadd.f32 %v817_v19, %v794_v1  ;;  %v1098_v19 = vld [vmem:[%s3535_s16 + $0x18] sm:$0xff]  ;;  %v1097_v1 = vld [vmem:[%s3535_s16 + $0x10] sm:$0xff] }
 0x9b4   :  { %820 = vst.msk [vmem:[#allocation2] sm:$0xff] %vm103_vm0, %v818_v21  ;;  %v1096_v21 = vld [vmem:[%s3535_s16 + $0x8] sm:$0xff] }
 0x9bb   :  { %v998_v23 = vld [vmem:[#allocation2] sm:$0xff] }
 0x9bc   :  { %v1000_v24 = vadd.f32 %v998_v23, %v2958_v57  ;;  %v1095_v23 = vld [vmem:[%s3535_s16] sm:$0xff] }
 0x9be   :  { %v1006_v25 = vadd.f32 %v3065_v22, %v1000_v24 }
 0x9c0   :  { %v1008_v26 = vsel %vm103_vm0, %v1006_v25, 0.0 }
 0x9c1   :  { %1009 = vadd.xlane.f32.xlu2 %v1008_v26 }
 0x9c9   :  { %v910_v27 = vpop.f32.mrf.mxu3 }
 0x9ca   :  { %v913_v29 = vsel %vm86_vm13, %v910_v27, -1e+10 }
 0x9cb   :  { %v914_v31 = vsel %vm169_vm3, %v913_v29, -inf }
 0x9cc   :  { %915 = vmax.xlane.f32.xlu1 %v914_v31  ;;  %v850_v32 = vpop.xlane.xlu0 %849 }
 0x9cd   :  { %v851_v33 = vsub.f32 %v847_v4, %v850_v32  ;;  %v1100_v4 = vld [vmem:[%s3535_s16 + $0x28] sm:$0xff] }
 0x9cf   :  { %v852_v34 = vmul.f32 1.442695, %v851_v33 }
 0x9d1   :  { %2549 = vpow2.f32 %v852_v34 }
 0x9d7   :  { %v2550_v35 = vpop.eup %2549 }
 0x9d8   :  { %v854_v20 = vsel %vm169_vm3, %v2550_v35, 0.0 }
 0x9d9   :  { %855 = vadd.xlane.f32.xlu0 %v854_v20  ;;  %v3138_v20 = vld [vmem:[%s3536_s17] ss:$0 sm:$0xff] }
 0xa34   :  { %v1010_v57 = vpop.xlane.xlu2 %1009 }
 0xa35   :  { %v1014_v28 = vmul.f32 %v1010_v57, %v2906_v18 }
 0xa37   :  { %v1016_v36 = vsub.f32 %v1006_v25, %v1014_v28  ;;  %v3129_v25 = vld [vmem:[%s3534_s15] ss:$0 sm:$0xff] }
 0xa39   :  { %v1018_v37 = vmul.f32 %v1016_v36, %v1016_v36 }
 0xa3b   :  { %v1020_v38 = vsel %vm103_vm0, %v1018_v37, 0.0 }
 0xa3c   :  { %1021 = vadd.xlane.f32.xlu2 %v1020_v38 }
 0xa3f   :  { %v916_v39 = vpop.xlane.xlu1 %915 }
 0xa40   :  { %v917_v40 = vsub.f32 %v913_v29, %v916_v39 }
 0xa42   :  { %v918_v41 = vmul.f32 1.442695, %v917_v40 }
 0xa44   :  { %2551 = vpow2.f32 %v918_v41 }
 0xa4a   :  { %v2552_v42 = vpop.eup %2551 }
 0xa4b   :  { %v920_v43 = vsel %vm169_vm3, %v2552_v42, 0.0 }
 0xa4c   :  { %921 = vadd.xlane.f32.xlu1 %v920_v43  ;;  %v856_v49 = vpop.xlane.xlu0 %855 }
 0xa4d   :  { %2553 = vrcp.f32 %v856_v49 }
 0xa53   :  { %v2554_v56 = vpop.eup %2553 }
 0xa54   :  { %859 = vrot.lane.b32.xlu2 %v3026_v0, %s3559_s30  ;;  %v858_v58 = vmul.f32 %v2554_v56, %v2550_v35 }
 0xa65   :  { %925 = vrot.lane.b32.xlu1 %v3026_v0, %s3578_s1 }
 0xaaf   :  { %v1022_v50 = vpop.xlane.xlu2 %1021 }
 0xab0   :  { %v1026_v51 = vmul.f32 %v1022_v50, %v2906_v18  ;;  %v2410_v50 = vld [vmem:[%s3570_s24 + $0x38] sm:$0xff] }
 0xab1   :  { %1225 = vmatpush.msrb.mxu2 %v2410_v50 }
 0xab2   :  { %v1028_v54 = vadd.f32 1e-05, %v1026_v51 }
 0xab4   :  { %2555 = vrsqrt.f32 %v1028_v54  ;;  %vm1036_vm15 = vweird.f32 %v1028_v54 }
 0xab7   :  { %v860_v61 = vpop.permute.xlu2 %859 }
 0xab8   :  { %880 = vmatpush.msra.mxu1 %v860_v61  ;;  %v2407_v61 = vld [vmem:[%s3570_s24 + $0x20] sm:$0xff] }
 0xab9   :  { %2395 = vmatmul.msk.f32.vlgmr.msra.gmra.mxu1 %vm169_vm3, %v858_v58  ;;  %v2408_v58 = vld [vmem:[%s3570_s24 + $0x28] sm:$0xff] }
 0xaba   :  { %v2556_v62 = vpop.eup %2555  ;;  %991 = vmatpush.msrb.mxu1 %v3022_v59 }
 0xabb   :  { %v1031_v0 = vmul.f32 %v2556_v62, %v1028_v54  ;;  %vm1037_vm14 = vweird.f32 %v2556_v62  ;;  %v2409_v54 = vld [vmem:[%s3570_s24 + $0x30] sm:$0xff] }
 0xabc   :  { %992 = vmatpush.msrb.mxu1 %v3031_v2  ;;  %vm1038_vm5 = vmor %vm1036_vm15, %vm1037_vm14  ;;  %1226 = vmatpush.msrb.mxu2 %v2409_v54 }
 0xabd   :  { %v1032_v3 = vmul.f32 %v2556_v62, %v1031_v0 }
 0xabe   :  { %1227 = vmatpush.msrb.mxu2 %v2408_v58 }
 0xabf   :  { %v1033_v5 = vmul.f32 0.5, %v1032_v3  ;;  %v922_v12 = vpop.xlane.xlu1 %921 }
 0xac0   :  { %2557 = vrcp.f32 %v922_v12  ;;  %1228 = vmatpush.msrb.mxu2 %v2407_v61 }
 0xac1   :  { %v1034_v60 = vsub.f32 1.5, %v1033_v5 }
 0xac3   :  { %v1035_v6 = vmul.f32 %v2556_v62, %v1034_v60 }
 0xac5   :  { %v1039_v7 = vsel %vm1038_vm5, %v2556_v62, %v1035_v6 }
 0xac6   :  { %v1050_v8 = vmul.f32 %v1039_v7, %v1016_v36  ;;  %v2558_v59 = vpop.eup %2557 }
 0xac7   :  { %v924_v13 = vmul.f32 %v2558_v59, %v2552_v42 }
 0xac8   :  { %v1052_v9 = vmul.f32 %v2949_v52, %v1050_v8 }
 0xaca   :  { %v1054_v11 = vadd.f32 %v2954_v55, %v1052_v9 }
 0xacc   :  { %2401 = vmatmul.msk.f32.vlgmr.msrb.gmra.mxu3 %vm103_vm0, %v1054_v11 }
 0xad7   :  { %v926_v2 = vpop.permute.xlu1 %925 }
 0xad8   :  { %946 = vmatpush.msra.mxu0 %v926_v2 }
 0xad9   :  { %2398 = vmatmul.msk.f32.vlgmr.msra.gmra.mxu0 %vm169_vm3, %v924_v13 }
 0xada   :  { %1122 = vmatpush.msrb.mxu0 %v1102_v14 }
 0xadc   :  { %1123 = vmatpush.msrb.mxu0 %v1101_v16 }
 0xade   :  { %1124 = vmatpush.msrb.mxu0 %v1100_v4 }
 0xae0   :  { %1125 = vmatpush.msrb.mxu0 %v1099_v17 }
 0xae2   :  { %1126 = vmatpush.msrb.mxu0 %v1098_v19 }
 0xae4   :  { %1127 = vmatpush.msrb.mxu0 %v1097_v1 }
 0xae6   :  { %1128 = vmatpush.msrb.mxu0 %v1096_v21 }
 0xae8   :  { %1129 = vmatpush.msrb.mxu0 %v1095_v23 }
 0xb36   :  { %v882_v24 = vpop.f32.mrf.mxu1 }
 0xb37   :  { %2400 = vmatmul.msk.f32.vlgmr.msrb.gmra.mxu1 %vm142_vm1, %v882_v24 }
 0xb4f   :  { %v1087_v26 = vpop.f32.mrf.mxu3 }
 0xb50   :  { %v1088_v27 = vadd.f32 %v3129_v25, %v1087_v26 }
 0xb52   :  { %v1093_v29 = vmax.f32 %v1088_v27, 0.0 }
 0xb54   :  { %2403 = vmatmul.msk.f32.vlgmr.msrb.gmra.mxu0 %vm1107_vm6, %v1093_v29 }
 0xb56   :  { %v948_v31 = vpop.f32.mrf.mxu0 }
 0xb57   :  { %2399 = vmatmul.msk.f32.vlgmr.msra.gmra.mxu2 %vm142_vm1, %v948_v31 }
 0xbb4   :  { %v994_v32 = vpop.f32.mrf.mxu1 }
 0xbd1   :  { %v1131_v28 = vpop.f32.mrf.mxu0 }
 0xbd2   :  { %v1132_v37 = vadd.f32 %v3138_v20, %v1131_v28 }
 0xbd4   :  { %v1137_v39 = vadd.f32 %v1132_v37, %v1054_v11 }
 0xbd6   :  { %v1139_v40 = vsel %vm103_vm0, %v1137_v39, 0.0 }
 0xbda   :  { %v971_v33 = vpop.f32.mrf.mxu2 }
 0xbdb   :  { %v995_v34 = vadd.f32 %v994_v32, %v971_v33  ;;  %v3177_v32 = vld [vmem:[%s3572_s0 + $0x1] ss:$0 sm:$0xff]  ;;  %s3581_s0 = smov 64  }
 0xbdd   :  { %997 = vst.msk [vmem:[#allocation2 + $0x8] sm:$0xff] %vm103_vm0, %v995_v34 }
 0xbe4   :  { %v999_v35 = vld [vmem:[#allocation2 + $0x8] sm:$0xff] }
 0xbe5   :  { %v1001_v57 = vadd.f32 %v999_v35, %v3014_v53 }
 0xbe7   :  { %v1007_v36 = vadd.f32 %v3065_v22, %v1001_v57 }
 0xbe9   :  { %v1011_v38 = vsel %vm103_vm0, %v1007_v36, 0.0 }
 0xbea   :  { %1012 = vadd.xlane.f32.xlu0 %v1011_v38 }
 0xbf2   :  { %1140 = vadd.xlane.f32.xlu0 %v1139_v40 }
 0xc5d   :  { %v1013_v41 = vpop.xlane.xlu0 %1012 }
 0xc5e   :  { %v1015_v42 = vmul.f32 %v1013_v41, %v2906_v18 }
 0xc60   :  { %v1017_v43 = vsub.f32 %v1007_v36, %v1015_v42 }
 0xc62   :  { %v1019_v44 = vmul.f32 %v1017_v43, %v1017_v43 }
 0xc64   :  { %v1023_v45 = vsel %vm103_vm0, %v1019_v44, 0.0 }
 0xc65   :  { %1024 = vadd.xlane.f32.xlu0 %v1023_v45  ;;  %v1141_v53 = vpop.xlane.xlu0 %1140 }
 0xc66   :  { %v1145_v22 = vmul.f32 %v1141_v53, %v2906_v18 }
 0xc68   :  { %v1147_v46 = vsub.f32 %v1137_v39, %v1145_v22 }
 0xc6a   :  { %v1149_v47 = vmul.f32 %v1147_v46, %v1147_v46 }
 0xc6c   :  { %v1151_v49 = vsel %vm103_vm0, %v1149_v47, 0.0 }
 0xc6d   :  { %1152 = vadd.xlane.f32.xlu2 %v1151_v49 }
 0xcd8   :  { %v1025_v51 = vpop.xlane.xlu0 %1024 }
 0xcd9   :  { %v1027_v56 = vmul.f32 %v1025_v51, %v2906_v18 }
 0xcdb   :  { %v1029_v62 = vadd.f32 1e-05, %v1027_v56 }
 0xcdd   :  { %2559 = vrsqrt.f32 %v1029_v62  ;;  %vm1046_vm8 = vweird.f32 %v1029_v62 }
 0xce0   :  { %v1153_v0 = vpop.xlane.xlu2 %1152 }
 0xce1   :  { %v1157_v3 = vmul.f32 %v1153_v0, %v2906_v18 }
 0xce3   :  { %v2560_v5 = vpop.eup %2559  ;;  %v1159_v60 = vadd.f32 1e-05, %v1157_v3 }
 0xce4   :  { %v1041_v6 = vmul.f32 %v2560_v5, %v1029_v62  ;;  %vm1047_vm7 = vweird.f32 %v2560_v5 }
 0xce5   :  { %2561 = vrsqrt.f32 %v1159_v60  ;;  %vm1048_vm10 = vmor %vm1046_vm8, %vm1047_vm7  ;;  %vm1167_vm12 = vweird.f32 %v1159_v60 }
 0xce6   :  { %v1042_v7 = vmul.f32 %v2560_v5, %v1041_v6 }
 0xce8   :  { %v1043_v8 = vmul.f32 0.5, %v1042_v7 }
 0xcea   :  { %v1044_v9 = vsub.f32 1.5, %v1043_v8 }
 0xceb   :  { %v2562_v11 = vpop.eup %2561 }
 0xcec   :  { %v1045_v12 = vmul.f32 %v2560_v5, %v1044_v9  ;;  %v1162_v59 = vmul.f32 %v2562_v11, %v1159_v60  ;;  %vm1168_vm11 = vweird.f32 %v2562_v11 }
 0xced   :  { %vm1169_vm14 = vmor %vm1167_vm12, %vm1168_vm11 }
 0xcee   :  { %v1049_v13 = vsel %vm1048_vm10, %v2560_v5, %v1045_v12  ;;  %v1163_v2 = vmul.f32 %v2562_v11, %v1162_v59 }
 0xcef   :  { %v1051_v14 = vmul.f32 %v1049_v13, %v1017_v43 }
 0xcf0   :  { %v1164_v16 = vmul.f32 0.5, %v1163_v2 }
 0xcf1   :  { %v1053_v4 = vmul.f32 %v2949_v52, %v1051_v14 }
 0xcf2   :  { %v1165_v17 = vsub.f32 1.5, %v1164_v16 }
 0xcf3   :  { %v1055_v19 = vadd.f32 %v2954_v55, %v1053_v4 }
 0xcf4   :  { %v1166_v1 = vmul.f32 %v2562_v11, %v1165_v17 }
 0xcf5   :  { %2402 = vmatmul.msk.f32.gmra.mxu3 %vm103_vm0, %v1055_v19 }
 0xcf6   :  { %v1170_v21 = vsel %vm1169_vm14, %v2562_v11, %v1166_v1 }
 0xcf7   :  { %v1181_v23 = vmul.f32 %v1170_v21, %v1147_v46 }
 0xcf9   :  { %v1183_v24 = vmul.f32 %v2949_v52, %v1181_v23 }
 0xcfb   :  { %v3168_v26 = vadd.f32 %v2954_v55, %v1183_v24 }
 0xcfd   :  { %2412 = vmatmul.msk.f32.vlgmr.msrb.gmra.mxu2 %vm103_vm0, %v3168_v26 }
 0xd78   :  { %v1090_v27 = vpop.f32.mrf.mxu3 }
 0xd79   :  { %v1091_v29 = vadd.f32 %v3129_v25, %v1090_v27 }
 0xd7b   :  { %v1094_v31 = vmax.f32 %v1091_v29, 0.0 }
 0xd7d   :  { %2404 = vmatmul.msk.f32.gmra.mxu0 %vm1107_vm6, %v1094_v31 }
 0xd80   :  { %v1230_v33 = vpop.f32.mrf.mxu2 }
 0xd81   :  { %v3180_v34 = vadd.f32 %v3177_v32, %v1230_v33  ;;  %v3241_v33 = vld [vmem:[%s3574_s5 + $0x20] sm:$0xff] }
 0xd83   :  { %1311 = vrot.lane.b32.xlu1 %v3180_v34, %s3578_s1  ;;  %v1236_v35 = vmul.f32 0.25, %v3180_v34 }
 0xd85   :  { %1309 = vrot.lane.b32.xlu0 %v1236_v35, %s3579_s27 }
 0xd8b   :  { %1244 = vrot.lane.b32.xlu1 %v3180_v34, %s3580_s25 }
 0xdf5   :  { %v1312_v25 = vpop.permute.xlu1 %1311 }
 0xdf6   :  { %2421 = vmatpush.xpose.msk.msra.mxu3 %vm142_vm1, %v1312_v25 }
 0xdf7   :  { %v1310_v57 = vpop.permute.xlu0 %1309 }
 0xdf9   :  { %2422 = vmatmul.msk.f32.vlgmr.msra.gmra.mxu3 %vm142_vm1, %v1310_v57 }
 0xdfa   :  { %v1134_v28 = vpop.f32.mrf.mxu0 }
 0xdfb   :  { %v1135_v36 = vadd.f32 %v3138_v20, %v1134_v28 }
 0xdfd   :  { %v1245_v37 = vpop.permute.xlu1 %1244  ;;  %v1138_v38 = vadd.f32 %v1135_v36, %v1055_v19  ;;  %v2417_v19 = vld [vmem:[%s3574_s5 + $0x38] sm:$0xff] }
 0xdfe   :  { %2418 = vmatpush.xpose.msk.msra.mxu1 %vm142_vm1, %v1245_v37 }
 0xdff   :  { %v1142_v39 = vsel %vm103_vm0, %v1138_v38, 0.0 }
 0xe00   :  { %1143 = vadd.xlane.f32.xlu1 %v1142_v39 }
 0xe01   :  { %2419 = vmatmul.msk.f32.vlgmr.msra.gmra.mxu1 %vm142_vm1, %v1236_v35 }
 0xe73   :  { %v1144_v40 = vpop.xlane.xlu1 %1143 }
 0xe74   :  { %v1146_v41 = vmul.f32 %v1144_v40, %v2906_v18 }
 0xe76   :  { %v1148_v42 = vsub.f32 %v1138_v38, %v1146_v41 }
 0xe78   :  { %v1150_v43 = vmul.f32 %v1148_v42, %v1148_v42 }
 0xe7a   :  { %v1154_v44 = vsel %vm103_vm0, %v1150_v43, 0.0 }
 0xe7b   :  { %1155 = vadd.xlane.f32.xlu0 %v1154_v44  ;;  %v3259_v44 = vld [vmem:[%s3575_s7 + $0x1] ss:$0 sm:$0xff] }
 0xe7c   :  { %v1334_v22 = vpop.f32.mrf.mxu3 }
 0xe7d   :  { %v1337_v46 = vsel %vm81_vm2, %v1334_v22, -1e+10 }
 0xe7e   :  { %v1268_v45 = vpop.f32.mrf.mxu1  ;;  %v1338_v47 = vsel %vm169_vm3, %v1337_v46, -inf }
 0xe7f   :  { %v1271_v20 = vsel %vm81_vm2, %v1268_v45, -1e+10 }
 0xe80   :  { %v1272_v53 = vsel %vm169_vm3, %v1271_v20, -inf }
 0xe81   :  { %1273 = vmax.xlane.f32.xlu2 %v1272_v53 }
 0xe89   :  { %1339 = vmax.xlane.f32.xlu2 %v1338_v47 }
 0xeee   :  { %v1156_v49 = vpop.xlane.xlu0 %1155 }
 0xeef   :  { %v1158_v50 = vmul.f32 %v1156_v49, %v2906_v18 }
 0xef1   :  { %v1160_v51 = vadd.f32 1e-05, %v1158_v50 }
 0xef3   :  { %2563 = vrsqrt.f32 %v1160_v51  ;;  %vm1177_vm15 = vweird.f32 %v1160_v51 }
 0xef4   :  { %v1274_v54 = vpop.xlane.xlu2 %1273 }
 0xef5   :  { %v1275_v56 = vsub.f32 %v1271_v20, %v1274_v54 }
 0xef7   :  { %v1276_v58 = vmul.f32 1.442695, %v1275_v56 }
 0xef9   :  { %v2564_v61 = vpop.eup %2563  ;;  %2565 = vpow2.f32 %v1276_v58 }
 0xefa   :  { %v1172_v62 = vmul.f32 %v2564_v61, %v1160_v51  ;;  %vm1178_vm2 = vweird.f32 %v2564_v61 }
 0xefb   :  { %vm1179_vm5 = vmor %vm1177_vm15, %vm1178_vm2 }
 0xefc   :  { %v1173_v0 = vmul.f32 %v2564_v61, %v1172_v62  ;;  %v1340_v3 = vpop.xlane.xlu2 %1339 }
 0xefd   :  { %v1341_v5 = vsub.f32 %v1337_v46, %v1340_v3 }
 0xefe   :  { %v1174_v60 = vmul.f32 0.5, %v1173_v0 }
 0xeff   :  { %v2566_v10 = vpop.eup %2565  ;;  %v1342_v6 = vmul.f32 1.442695, %v1341_v5 }
 0xf00   :  { %v1175_v7 = vsub.f32 1.5, %v1174_v60  ;;  %v1278_v8 = vsel %vm169_vm3, %v2566_v10, 0.0 }
 0xf01   :  { %2567 = vpow2.f32 %v1342_v6  ;;  %1279 = vadd.xlane.f32.xlu2 %v1278_v8  ;;  %v2438_v6 = vld [vmem:[%s3527_s8 + $0x38] sm:$0xff]  ;;  %v2436_v8 = vld [vmem:[%s3527_s8 + $0x28] sm:$0xff] }
 0xf02   :  { %v1176_v9 = vmul.f32 %v2564_v61, %v1175_v7  ;;  %v2437_v7 = vld [vmem:[%s3527_s8 + $0x30] sm:$0xff] }
 0xf04   :  { %v1180_v11 = vsel %vm1179_vm5, %v2564_v61, %v1176_v9 }
 0xf05   :  { %v1182_v12 = vmul.f32 %v1180_v11, %v1148_v42  ;;  %v2435_v11 = vld [vmem:[%s3527_s8 + $0x20] sm:$0xff]  ;;  %s2670_s8 = smov 8  }
 0xf07   :  { %v2568_v59 = vpop.eup %2567  ;;  %v1184_v13 = vmul.f32 %v2949_v52, %v1182_v12 }
 0xf08   :  { %v1344_v2 = vsel %vm169_vm3, %v2568_v59, 0.0 }
 0xf09   :  { %1345 = vadd.xlane.f32.xlu1 %v1344_v2  ;;  %v3207_v14 = vadd.f32 %v2954_v55, %v1184_v13  ;;  %v2416_v55 = vld [vmem:[%s3574_s5 + $0x30] sm:$0xff] }
 0xf0b   :  { %2413 = vmatmul.msk.f32.gmra.mxu2 %vm103_vm0, %v3207_v14 }
 0xf19   :  { %1283 = vrot.lane.b32.xlu2 %v3180_v34, %s3581_s0 }
 0xf22   :  { %1349 = vrot.lane.b32.xlu1 %v3180_v34, %s3582_s28 }
 0xf74   :  { %v1280_v16 = vpop.xlane.xlu2 %1279 }
 0xf75   :  { %2569 = vrcp.f32 %v1280_v16 }
 0xf7b   :  { %v2570_v4 = vpop.eup %2569 }
 0xf7c   :  { %v1282_v17 = vmul.f32 %v2570_v4, %v2566_v10  ;;  %v1284_v52 = vpop.permute.xlu2 %1283  ;;  %v1346_v1 = vpop.xlane.xlu1 %1345 }
 0xf7d   :  { %1304 = vmatpush.msrb.mxu1 %v1284_v52  ;;  %2571 = vrcp.f32 %v1346_v1  ;;  %v2444_v1 = vld [vmem:[%s3529_s10 + $0x30] sm:$0xff] }
 0xf7e   :  { %2420 = vmatmul.msk.f32.vlgmr.msrb.gmra.mxu1 %vm169_vm3, %v1282_v17 }
 0xf7f   :  { %1392 = vmatpush.msra.mxu1 %v2417_v19 }
 0xf81   :  { %1393 = vmatpush.msra.mxu1 %v2416_v55 }
 0xf83   :  { %v2572_v24 = vpop.eup %2571 }
 0xf84   :  { %v1348_v27 = vmul.f32 %v2572_v24, %v2568_v59  ;;  %v2443_v24 = vld [vmem:[%s3529_s10 + $0x28] sm:$0xff] }
 0xf8e   :  { %v1233_v21 = vpop.f32.mrf.mxu2 }
 0xf8f   :  { %v3223_v23 = vadd.f32 %v3177_v32, %v1233_v21  ;;  %v3235_v32 = vld [vmem:[%s3574_s5 + $0x28] sm:$0xff]  ;;  %s3583_s5 = sld [smem:[#allocation17_spill]] }
 0xf90   :  { %1415 = vmatpush.msrb.mxu3 %v3235_v32 }
 0xf91   :  { %1490 = vrot.lane.b32.xlu2 %v3223_v23, %s3578_s1  ;;  %1423 = vrot.lane.b32.xlu0 %v3223_v23, %s3580_s25  ;;  %v1237_v31 = vmul.f32 0.25, %v3223_v23 }
 0xf92   :  { %1416 = vmatpush.msrb.mxu3 %v3241_v33 }
 0xf94   :  { %v1350_v29 = vpop.permute.xlu1 %1349 }
 0xf95   :  { %1370 = vmatpush.msra.mxu2 %v1350_v29  ;;  %v2442_v29 = vld [vmem:[%s3529_s10 + $0x20] sm:$0xff]  ;;  %s2346_s29 = sshll.u32 %s3583_s5, 4  ;;  %s2347_s29 = int_to_ptr.hbm [resolvable:$true] %s2346_s29 }
 0xf96   :  { %2423 = vmatmul.msk.f32.vlgmr.msra.gmra.mxu2 %vm169_vm3, %v1348_v27 }
 0xf99   :  { %1488 = vrot.lane.b32.xlu0 %v1237_v31, %s3579_s27 }
 0xfeb   :  { %v1491_v34 = vpop.permute.xlu2 %1490 }
 0xfec   :  { %2429 = vmatpush.xpose.msk.msrb.mxu1 %vm142_vm1, %v1491_v34 }
 0xffb   :  { %v1306_v35 = vpop.f32.mrf.mxu1 }
 0xffc   :  { %2425 = vmatmul.msk.f32.vlgmr.msrb.gmra.mxu3 %vm142_vm1, %v1306_v35  ;;  %v3309_v35 = vld [vmem:[%s3537_s18 + $0x1] ss:$0 sm:$0xff] }
0x1003   :  { %v1424_v25 = vpop.permute.xlu0 %1423 }
0x1004   :  { %2426 = vmatpush.xpose.msk.msra.mxu0 %vm142_vm1, %v1424_v25 }
0x1007   :  { %2427 = vmatmul.msk.f32.vlgmr.msra.gmra.mxu0 %vm142_vm1, %v1237_v31 }
0x1008   :  { %1571 = vmatpush.msrb.mxu0 %v2417_v19 }
0x100a   :  { %1572 = vmatpush.msrb.mxu0 %v2416_v55  ;;  %v2445_v55 = vld [vmem:[%s3529_s10 + $0x38] sm:$0xff] }
0x100b   :  { %v1489_v28 = vpop.permute.xlu0 %1488 }
0x1019   :  { %v1372_v57 = vpop.f32.mrf.mxu2 }
0x101a   :  { %2424 = vmatmul.msk.f32.vlgmr.msra.gmra.mxu1 %vm142_vm1, %v1372_v57 }
0x101b   :  { %1688 = vmatpush.msra.mxu1 %v2438_v6 }
0x101d   :  { %1689 = vmatpush.msra.mxu1 %v2437_v7 }
0x101f   :  { %1690 = vmatpush.msra.mxu1 %v2436_v8 }
0x1021   :  { %1691 = vmatpush.msra.mxu1 %v2435_v11 }
0x1022   :  { %2430 = vmatmul.msk.f32.vlgmr.msrb.gmra.mxu1 %vm142_vm1, %v1489_v28  ;;  %v3314_v28 = vld [vmem:[%s3538_s19 + $0x1] ss:$0 sm:$0xff]  ;;  %s2333_s19 = sshll.u32 %s3541_s22, 4  ;;  %s2334_s19 = int_to_ptr.hbm [resolvable:$true] %s2333_s19 }
0x107f   :  { %v1418_v39 = vpop.f32.mrf.mxu3 }
0x1084   :  { %v1447_v36 = vpop.f32.mrf.mxu0 }
0x1085   :  { %v1450_v37 = vsel %vm82_vm4, %v1447_v36, -1e+10 }
0x1086   :  { %v1451_v38 = vsel %vm169_vm3, %v1450_v37, -inf }
0x1087   :  { %1452 = vmax.xlane.f32.xlu1 %v1451_v38 }
0x1097   :  { %v1395_v40 = vpop.f32.mrf.mxu1 }
0x1098   :  { %v1419_v41 = vadd.f32 %v1418_v39, %v1395_v40  ;;  %v3329_v40 = vld [vmem:[%s3530_s11 + $0x1] ss:$0 sm:$0xff] }
0x109a   :  { %1421 = vst.msk [vmem:[#allocation2] sm:$0xff] %vm103_vm0, %v1419_v41 }
0x109f   :  { %v1513_v42 = vpop.f32.mrf.mxu1 }
0x10a0   :  { %v1516_v43 = vsel %vm82_vm4, %v1513_v42, -1e+10  ;;  %v3335_v42 = vld [vmem:[%s3528_s9 + $0x1] ss:$0 sm:$0xff]  ;;  %s2671_s9 = smov [#allocation5]  }
0x10a1   :  { %v1517_v45 = vsel %vm169_vm3, %v1516_v43, -inf  ;;  %v1601_v20 = vld [vmem:[#allocation2] sm:$0xff]  ;;  %s2344_s11 = sshll.u32 %s2671_s9, 4  ;;  %s2345_s11 = int_to_ptr.vmem [resolvable:$true] %s2344_s11 }
0x10a2   :  { %1518 = vmax.xlane.f32.xlu2 %v1517_v45  ;;  %v1603_v53 = vadd.f32 %v1601_v20, %v3168_v26 }
0x10a4   :  { %v1610_v22 = vadd.f32 %v3259_v44, %v1603_v53 }
0x10a6   :  { %v1612_v46 = vsel %vm103_vm0, %v1610_v22, 0.0 }
0x10a7   :  { %1613 = vadd.xlane.f32.xlu0 %v1612_v46 }
0x10fa   :  { %v1453_v47 = vpop.xlane.xlu1 %1452 }
0x10fb   :  { %v1454_v49 = vsub.f32 %v1450_v37, %v1453_v47 }
0x10fd   :  { %v1455_v48 = vmul.f32 1.442695, %v1454_v49 }
0x10ff   :  { %2573 = vpow2.f32 %v1455_v48 }
0x1105   :  { %v2574_v50 = vpop.eup %2573 }
0x1106   :  { %v1457_v51 = vsel %vm169_vm3, %v2574_v50, 0.0 }
0x1107   :  { %1458 = vadd.xlane.f32.xlu1 %v1457_v51 }
0x1115   :  { %v1519_v54 = vpop.xlane.xlu2 %1518 }
0x1116   :  { %v1520_v56 = vsub.f32 %v1516_v43, %v1519_v54 }
0x1118   :  { %v1521_v58 = vmul.f32 1.442695, %v1520_v56 }
0x111a   :  { %2575 = vpow2.f32 %v1521_v58  ;;  %v1614_v61 = vpop.xlane.xlu0 %1613 }
0x111b   :  { %v1618_v26 = vmul.f32 %v1614_v61, %v2906_v18 }
0x111d   :  { %v1620_v62 = vsub.f32 %v1610_v22, %v1618_v26 }
0x111f   :  { %v1622_v0 = vmul.f32 %v1620_v62, %v1620_v62 }
0x1120   :  { %v2576_v3 = vpop.eup %2575  ;;  %1462 = vrot.lane.b32.xlu1 %v3223_v23, %s3581_s0 }
0x1121   :  { %v1523_v5 = vsel %vm169_vm3, %v2576_v3, 0.0  ;;  %v1624_v60 = vsel %vm103_vm0, %v1622_v0, 0.0 }
0x1122   :  { %1524 = vadd.xlane.f32.xlu2 %v1523_v5  ;;  %1625 = vadd.xlane.f32.xlu0 %v1624_v60 }
0x113a   :  { %1528 = vrot.lane.b32.xlu2 %v3223_v23, %s3582_s28 }
0x117a   :  { %v1459_v10 = vpop.xlane.xlu1 %1458 }
0x117b   :  { %2577 = vrcp.f32 %v1459_v10 }
0x1181   :  { %v2578_v9 = vpop.eup %2577 }
0x1182   :  { %v1461_v12 = vmul.f32 %v2578_v9, %v2574_v50 }
0x1192   :  { %v1463_v59 = vpop.permute.xlu1 %1462 }
0x1193   :  { %1483 = vmatpush.msrb.mxu2 %v1463_v59 }
0x1194   :  { %2428 = vmatmul.msk.f32.vlgmr.msrb.gmra.mxu2 %vm169_vm3, %v1461_v12 }
0x1195   :  { %v1525_v13 = vpop.xlane.xlu2 %1524  ;;  %v1626_v2 = vpop.xlane.xlu0 %1625  ;;  %1594 = vmatpush.msra.mxu2 %v3235_v32 }
0x1196   :  { %2579 = vrcp.f32 %v1525_v13  ;;  %v1630_v16 = vmul.f32 %v1626_v2, %v2906_v18 }
0x1197   :  { %1595 = vmatpush.msra.mxu2 %v3241_v33  ;;  %v2609_v33 = vld [vmem:[%s3576_s2] sm:$0xff]  ;;  %s2669_s2 = smov 128  }
0x1198   :  { %v1632_v4 = vadd.f32 1e-05, %v1630_v16 }
0x119a   :  { %2581 = vrsqrt.f32 %v1632_v4  ;;  %vm1640_vm7 = vweird.f32 %v1632_v4 }
0x119c   :  { %v2580_v17 = vpop.eup %2579 }
0x119d   :  { %v1527_v52 = vmul.f32 %v2580_v17, %v2576_v3  ;;  %v1529_v19 = vpop.permute.xlu2 %1528 }
0x119e   :  { %1549 = vmatpush.msra.mxu3 %v1529_v19 }
0x119f   :  { %2431 = vmatmul.msk.f32.vlgmr.msra.gmra.mxu3 %vm169_vm3, %v1527_v52 }
0x11a0   :  { %v2582_v21 = vpop.eup %2581  ;;  %1723 = vmatpush.msrb.mxu3 %v2445_v55 }
0x11a1   :  { %v1635_v23 = vmul.f32 %v2582_v21, %v1632_v4  ;;  %vm1641_vm4 = vweird.f32 %v2582_v21 }
0x11a2   :  { %1724 = vmatpush.msrb.mxu3 %v2444_v1  ;;  %vm1642_vm8 = vmor %vm1640_vm7, %vm1641_vm4 }
0x11a3   :  { %v1636_v27 = vmul.f32 %v2582_v21, %v1635_v23 }
0x11a4   :  { %1725 = vmatpush.msrb.mxu3 %v2443_v24 }
0x11a5   :  { %v1637_v31 = vmul.f32 0.5, %v1636_v27 }
0x11a6   :  { %1726 = vmatpush.msrb.mxu3 %v2442_v29 }
0x11a7   :  { %v1638_v32 = vsub.f32 1.5, %v1637_v31  ;;  %2447 = vmatmul.msk.f32.vlgmr.msrb.gmra.mxu3 %vm103_vm0, %v2609_v33 }
0x11a9   :  { %v1639_v34 = vmul.f32 %v2582_v21, %v1638_v32 }
0x11ab   :  { %v1643_v25 = vsel %vm1642_vm8, %v2582_v21, %v1639_v34 }
0x11ac   :  { %v1654_v57 = vmul.f32 %v1643_v25, %v1620_v62 }
0x11ae   :  { %v1656_v36 = vmul.f32 %v3309_v35, %v1654_v57  ;;  %v3371_v57 = vld [vmem:[%s3531_s12 + $0x28] sm:$0xff] }
0x11af   :  { %2448 = vmatmul.msk.f32.gmra.mxu3 %vm103_vm0, %v3006_v30 }
0x11b0   :  { %v3320_v37 = vadd.f32 %v3314_v28, %v1656_v36  ;;  %1909 = vmatpush.msra.mxu3 %v3371_v57  ;;  %v3377_v36 = vld [vmem:[%s3531_s12 + $0x20] sm:$0xff] }
0x11b2   :  { %2440 = vmatmul.msk.f32.vlgmr.msra.gmra.mxu1 %vm103_vm0, %v3320_v37  ;;  %1910 = vmatpush.msra.mxu3 %v3377_v36 }
0x1217   :  { %v1485_v38 = vpop.f32.mrf.mxu2 }
0x1218   :  { %2433 = vmatmul.msk.f32.vlgmr.msra.gmra.mxu2 %vm142_vm1, %v1485_v38 }
0x1222   :  { %v1551_v39 = vpop.f32.mrf.mxu3 }
0x1223   :  { %2432 = vmatmul.msk.f32.vlgmr.msrb.gmra.mxu0 %vm142_vm1, %v1551_v39 }
0x122a   :  { %v1728_v41 = vpop.f32.mrf.mxu3 }
0x122b   :  { %v1729_v30 = vadd.f32 %v3329_v40, %v1728_v41 }
0x122d   :  { %1805 = vrot.lane.b32.xlu0 %v1729_v30, %s3579_s27  ;;  %2453 = vmatpush.xpose.msk.msra.mxu0 %vm142_vm1, %v1729_v30 }
0x122f   :  { %v1693_v43 = vpop.f32.mrf.mxu1 }
0x1230   :  { %v1694_v45 = vadd.f32 %v3335_v42, %v1693_v43 }
0x1232   :  { %v1699_v20 = vmul.f32 0.25, %v1694_v45  ;;  %v1731_v38 = vpop.f32.mrf.mxu3 }
0x1233   :  { %v1732_v39 = vadd.f32 %v3329_v40, %v1731_v38 }
0x1234   :  { %2454 = vmatmul.msk.f32.vlgmr.msra.gmra.mxu0 %vm142_vm1, %v1699_v20  ;;  %1803 = vrot.lane.b32.xlu1 %v1699_v20, %s3579_s27 }
0x129b   :  { %v1597_v22 = vpop.f32.mrf.mxu2 }
0x129f   :  { %v1806_v53 = vpop.permute.xlu0 %1805 }
0x12a0   :  { %v1574_v46 = vpop.f32.mrf.mxu0  ;;  %2456 = vmatpush.xpose.msk.msrb.mxu0 %vm142_vm1, %v1806_v53 }
0x12a1   :  { %v1598_v47 = vadd.f32 %v1597_v22, %v1574_v46  ;;  %v2451_v46 = vld [vmem:[%s3531_s12 + $0x30] sm:$0xff] }
0x12a3   :  { %1600 = vst.msk [vmem:[#allocation2 + $0x8] sm:$0xff] %vm103_vm0, %v1598_v47 }
0x12a4   :  { %2461 = vmatpush.xpose.msk.msra.mxu0 %vm142_vm1, %v1732_v39 }
0x12a6   :  { %v1804_v49 = vpop.permute.xlu1 %1803 }
0x12a7   :  { %2457 = vmatmul.msk.f32.vlgmr.msrb.gmra.mxu0 %vm142_vm1, %v1804_v49 }
0x12aa   :  { %v1602_v48 = vld [vmem:[#allocation2 + $0x8] sm:$0xff] }
0x12ab   :  { %v1604_v50 = vadd.f32 %v1602_v48, %v3207_v14 }
0x12ad   :  { %v1611_v51 = vadd.f32 %v3259_v44, %v1604_v50 }
0x12af   :  { %v1615_v54 = vsel %vm103_vm0, %v1611_v51, 0.0 }
0x12b0   :  { %1616 = vadd.xlane.f32.xlu0 %v1615_v54 }
0x12b1   :  { %v1762_v56 = vpop.f32.mrf.mxu0 }
0x12b2   :  { %v1765_v58 = vsel %vm85_vm9, %v1762_v56, -1e+10 }
0x12b3   :  { %v1766_v61 = vsel %vm169_vm3, %v1765_v58, -inf }
0x12b4   :  { %1767 = vmax.xlane.f32.xlu2 %v1766_v61 }
0x1323   :  { %v1617_v26 = vpop.xlane.xlu0 %1616 }
0x1324   :  { %v1619_v62 = vmul.f32 %v1617_v26, %v2906_v18  ;;  %v1828_v0 = vpop.f32.mrf.mxu0 }
0x1325   :  { %v1831_v3 = vsel %vm85_vm9, %v1828_v0, -1e+10 }
0x1326   :  { %v1621_v14 = vsub.f32 %v1611_v51, %v1619_v62  ;;  %v1832_v44 = vsel %vm169_vm3, %v1831_v3, -inf }
0x1327   :  { %v1768_v5 = vpop.xlane.xlu2 %1767  ;;  %1833 = vmax.xlane.f32.xlu1 %v1832_v44 }
0x1328   :  { %v1769_v60 = vsub.f32 %v1765_v58, %v1768_v5  ;;  %v1623_v10 = vmul.f32 %v1621_v14, %v1621_v14 }
0x132a   :  { %v1770_v6 = vmul.f32 1.442695, %v1769_v60  ;;  %v1627_v7 = vsel %vm103_vm0, %v1623_v10, 0.0 }
0x132b   :  { %1628 = vadd.xlane.f32.xlu0 %v1627_v7 }
0x132c   :  { %2583 = vpow2.f32 %v1770_v6 }
0x1332   :  { %v2584_v8 = vpop.eup %2583 }
0x1333   :  { %v1772_v9 = vsel %vm169_vm3, %v2584_v8, 0.0 }
0x1334   :  { %1773 = vadd.xlane.f32.xlu2 %v1772_v9 }
0x133f   :  { %1777 = vrot.lane.b32.xlu0 %v1729_v30, %s3580_s25 }
0x134c   :  { %1843 = vrot.lane.b32.xlu2 %v1729_v30, %s3578_s1  ;;  %v2452_v30 = vld [vmem:[%s3531_s12 + $0x38] sm:$0xff] }
0x134d   :  { %1886 = vmatpush.msrb.mxu1 %v2452_v30  ;;  %2063 = vmatpush.msrb.mxu0 %v2452_v30 }
0x134f   :  { %1887 = vmatpush.msrb.mxu1 %v2451_v46  ;;  %2064 = vmatpush.msrb.mxu0 %v2451_v46  ;;  %v2484_v46 = vld [vmem:[%s3535_s16 + $0x78] sm:$0xff] }
0x139a   :  { %v1834_v15 = vpop.xlane.xlu1 %1833 }
0x139b   :  { %v1835_v11 = vsub.f32 %v1831_v3, %v1834_v15  ;;  %v3412_v15 = vld [vmem:[%s3532_s13 + $0x1] ss:$0 sm:$0xff] }
0x139d   :  { %v1836_v12 = vmul.f32 1.442695, %v1835_v11 }
0x139e   :  { %v1629_v59 = vpop.xlane.xlu0 %1628 }
0x139f   :  { %2585 = vpow2.f32 %v1836_v12  ;;  %v1631_v13 = vmul.f32 %v1629_v59, %v2906_v18 }
0x13a1   :  { %v1633_v2 = vadd.f32 1e-05, %v1631_v13 }
0x13a3   :  { %2587 = vrsqrt.f32 %v1633_v2  ;;  %vm1650_vm10 = vweird.f32 %v1633_v2 }
0x13a5   :  { %v2586_v16 = vpop.eup %2585 }
0x13a6   :  { %v1838_v4 = vsel %vm169_vm3, %v2586_v16, 0.0 }
0x13a7   :  { %v1774_v17 = vpop.xlane.xlu2 %1773  ;;  %1839 = vadd.xlane.f32.xlu1 %v1838_v4 }
0x13a8   :  { %2589 = vrcp.f32 %v1774_v17 }
0x13a9   :  { %v2588_v52 = vpop.eup %2587 }
0x13aa   :  { %v1645_v19 = vmul.f32 %v2588_v52, %v1633_v2  ;;  %vm1651_vm9 = vweird.f32 %v2588_v52 }
0x13ab   :  { %vm1652_vm11 = vmor %vm1650_vm10, %vm1651_vm9 }
0x13ac   :  { %v1646_v55 = vmul.f32 %v2588_v52, %v1645_v19 }
0x13ae   :  { %v2590_v1 = vpop.eup %2589  ;;  %v1647_v21 = vmul.f32 0.5, %v1646_v55 }
0x13af   :  { %v1776_v24 = vmul.f32 %v2590_v1, %v2584_v8  ;;  %v1844_v31 = vpop.permute.xlu2 %1843 }
0x13b0   :  { %v1648_v23 = vsub.f32 1.5, %v1647_v21 }
0x13b1   :  { %v1778_v27 = vpop.permute.xlu0 %1777 }
0x13b2   :  { %v1649_v29 = vmul.f32 %v2588_v52, %v1648_v23  ;;  %1798 = vmatpush.msrb.mxu2 %v1778_v27  ;;  %v2473_v27 = vld [vmem:[%s3533_s14 + $0x38] sm:$0xff] }
0x13b3   :  { %2455 = vmatmul.msk.f32.vlgmr.msrb.gmra.mxu2 %vm169_vm3, %v1776_v24 }
0x13b4   :  { %v1653_v32 = vsel %vm1652_vm11, %v2588_v52, %v1649_v29  ;;  %1864 = vmatpush.msra.mxu2 %v1844_v31  ;;  %v2472_v29 = vld [vmem:[%s3533_s14 + $0x30] sm:$0xff]  ;;  %v2471_v31 = vld [vmem:[%s3533_s14 + $0x28] sm:$0xff] }
0x13b5   :  { %v1655_v33 = vmul.f32 %v1653_v32, %v1621_v14  ;;  %v2470_v32 = vld [vmem:[%s3533_s14 + $0x20] sm:$0xff] }
0x13b7   :  { %v1657_v34 = vmul.f32 %v3309_v35, %v1655_v33 }
0x13b9   :  { %v3364_v25 = vadd.f32 %v3314_v28, %v1657_v34 }
0x13bb   :  { %2441 = vmatmul.msk.f32.gmra.mxu1 %vm103_vm0, %v3364_v25 }
0x13c0   :  { %1982 = vrot.lane.b32.xlu1 %v1732_v39, %s3579_s27 }
0x141a   :  { %v1840_v41 = vpop.xlane.xlu1 %1839 }
0x141b   :  { %2591 = vrcp.f32 %v1840_v41 }
0x1421   :  { %v2592_v43 = vpop.eup %2591 }
0x1422   :  { %v1842_v45 = vmul.f32 %v2592_v43, %v2586_v16 }
0x1424   :  { %2458 = vmatmul.msk.f32.vlgmr.msra.gmra.mxu2 %vm169_vm3, %v1842_v45 }
0x1432   :  { %v1983_v47 = vpop.permute.xlu1 %1982 }
0x1433   :  { %2464 = vmatpush.xpose.msk.msra.mxu1 %vm142_vm1, %v1983_v47  ;;  %v2483_v47 = vld [vmem:[%s3535_s16 + $0x70] sm:$0xff] }
0x1436   :  { %v1800_v20 = vpop.f32.mrf.mxu2 }
0x1437   :  { %2460 = vmatmul.msk.f32.vlgmr.msra.gmra.mxu3 %vm142_vm1, %v1800_v20 }
0x1438   :  { %v1696_v40 = vpop.f32.mrf.mxu1 }
0x1439   :  { %v1697_v53 = vadd.f32 %v3335_v42, %v1696_v40 }
0x143b   :  { %v1700_v22 = vmul.f32 0.25, %v1697_v53 }
0x143d   :  { %1980 = vrot.lane.b32.xlu0 %v1700_v22, %s3579_s27  ;;  %2462 = vmatmul.msk.f32.vlgmr.msra.gmra.mxu0 %vm142_vm1, %v1700_v22 }
0x14a7   :  { %v1866_v49 = vpop.f32.mrf.mxu2 }
0x14a8   :  { %2459 = vmatmul.msk.f32.vlgmr.msrb.gmra.mxu1 %vm142_vm1, %v1866_v49  ;;  %v2482_v49 = vld [vmem:[%s3535_s16 + $0x68] sm:$0xff] }
0x14a9   :  { %2180 = vmatpush.msrb.mxu1 %v2473_v27 }
0x14ab   :  { %2181 = vmatpush.msrb.mxu1 %v2472_v29 }
0x14ad   :  { %2182 = vmatpush.msrb.mxu1 %v2471_v31 }
0x14af   :  { %v1981_v48 = vpop.permute.xlu0 %1980  ;;  %2183 = vmatpush.msrb.mxu1 %v2470_v32 }
0x14b0   :  { %2465 = vmatmul.msk.f32.vlgmr.msra.gmra.mxu1 %vm142_vm1, %v1981_v48  ;;  %v2481_v48 = vld [vmem:[%s3535_s16 + $0x60] sm:$0xff] }
0x14ba   :  { %v1939_v42 = vpop.f32.mrf.mxu0  ;;  %v1912_v54 = vpop.f32.mrf.mxu3 }
0x14bb   :  { %v1942_v50 = vsel %vm86_vm13, %v1939_v42, -1e+10  ;;  %v2480_v42 = vld [vmem:[%s3535_s16 + $0x58] sm:$0xff] }
0x14bc   :  { %v1943_v51 = vsel %vm169_vm3, %v1942_v50, -inf }
0x14bd   :  { %1944 = vmax.xlane.f32.xlu2 %v1943_v51  ;;  %v2478_v51 = vld [vmem:[%s3535_s16 + $0x48] sm:$0xff] }
0x1525   :  { %v1889_v56 = vpop.f32.mrf.mxu1 }
0x1526   :  { %v1913_v58 = vadd.f32 %v1912_v54, %v1889_v56  ;;  %v2477_v54 = vld [vmem:[%s3535_s16 + $0x40] sm:$0xff] }
0x1528   :  { %1915 = vst.msk [vmem:[#allocation2] sm:$0xff] %vm103_vm0, %v1913_v58 }
0x152d   :  { %v2005_v61 = vpop.f32.mrf.mxu1 }
0x152e   :  { %v2008_v26 = vsel %vm86_vm13, %v2005_v61, -1e+10 }
0x152f   :  { %v2009_v62 = vsel %vm169_vm3, %v2008_v26, -inf  ;;  %v2093_v63 = vld [vmem:[#allocation2] sm:$0xff] }
0x1530   :  { %v1945_v0 = vpop.xlane.xlu2 %1944  ;;  %2010 = vmax.xlane.f32.xlu0 %v2009_v62  ;;  %v2095_v9 = vadd.f32 %v2093_v63, %v3320_v37 }
0x1531   :  { %v1946_v3 = vsub.f32 %v1942_v50, %v1945_v0  ;;  %v2479_v50 = vld [vmem:[%s3535_s16 + $0x50] sm:$0xff] }
0x1532   :  { %v2102_v12 = vadd.f32 %v3412_v15, %v2095_v9 }
0x1533   :  { %v1947_v14 = vmul.f32 1.442695, %v1946_v3 }
0x1534   :  { %v2104_v2 = vsel %vm103_vm0, %v2102_v12, 0.0 }
0x1535   :  { %2593 = vpow2.f32 %v1947_v14  ;;  %v2516_v14 = vld [vmem:[%s3534_s15 + $0x1] ss:$0 sm:$0xff] }
0x153b   :  { %v2594_v44 = vpop.eup %2593 }
0x153c   :  { %v1949_v5 = vsel %vm169_vm3, %v2594_v44, 0.0 }
0x153d   :  { %1950 = vadd.xlane.f32.xlu1 %v1949_v5 }
0x1544   :  { %1954 = vrot.lane.b32.xlu0 %v1732_v39, %s3580_s25 }
0x1556   :  { %2020 = vrot.lane.b32.xlu1 %v1732_v39, %s3578_s1 }
0x15a3   :  { %v2011_v60 = vpop.xlane.xlu0 %2010 }
0x15a4   :  { %v2012_v10 = vsub.f32 %v2008_v26, %v2011_v60 }
0x15a6   :  { %v2013_v6 = vmul.f32 1.442695, %v2012_v10 }
0x15a8   :  { %2595 = vpow2.f32 %v2013_v6 }
0x15ae   :  { %v2596_v7 = vpop.eup %2595 }
0x15af   :  { %v2015_v8 = vsel %vm169_vm3, %v2596_v7, 0.0 }
0x15b0   :  { %2016 = vadd.xlane.f32.xlu2 %v2015_v8  ;;  %v1951_v11 = vpop.xlane.xlu1 %1950  ;;  %v2517_v8 = vld [vmem:[%s3536_s17 + $0x1] ss:$0 sm:$0xff] }
0x15b1   :  { %2597 = vrcp.f32 %v1951_v11 }
0x15b6   :  { %v1955_v59 = vpop.permute.xlu0 %1954 }
0x15b7   :  { %v2598_v13 = vpop.eup %2597  ;;  %1975 = vmatpush.msrb.mxu2 %v1955_v59 }
0x15b8   :  { %v1953_v16 = vmul.f32 %v2598_v13, %v2594_v44  ;;  %2105 = vadd.xlane.f32.xlu2 %v2104_v2 }
0x15b9   :  { %2086 = vmatpush.msra.mxu2 %v3371_v57 }
0x15ba   :  { %2463 = vmatmul.msk.f32.vlgmr.msrb.gmra.mxu2 %vm169_vm3, %v1953_v16 }
0x15bb   :  { %2087 = vmatpush.msra.mxu2 %v3377_v36 }
0x15c8   :  { %v2021_v37 = vpop.permute.xlu1 %2020 }
0x15c9   :  { %2041 = vmatpush.msrb.mxu3 %v2021_v37 }
0x15cb   :  { %2221 = vmatpush.msra.mxu3 %v2484_v46 }
0x15cd   :  { %2222 = vmatpush.msra.mxu3 %v2483_v47 }
0x15cf   :  { %2223 = vmatpush.msra.mxu3 %v2482_v49 }
0x15d1   :  { %2224 = vmatpush.msra.mxu3 %v2481_v48 }
0x15d3   :  { %2225 = vmatpush.msra.mxu3 %v2480_v42 }
0x15d5   :  { %2226 = vmatpush.msra.mxu3 %v2479_v50 }
0x15d7   :  { %2227 = vmatpush.msra.mxu3 %v2478_v51 }
0x15d9   :  { %2228 = vmatpush.msra.mxu3 %v2477_v54 }
0x1623   :  { %v2017_v4 = vpop.xlane.xlu2 %2016 }
0x1624   :  { %2599 = vrcp.f32 %v2017_v4 }
0x162a   :  { %v2600_v17 = vpop.eup %2599 }
0x162b   :  { %v2019_v52 = vmul.f32 %v2600_v17, %v2596_v7  ;;  %v2106_v19 = vpop.xlane.xlu2 %2105 }
0x162c   :  { %v2110_v55 = vmul.f32 %v2106_v19, %v2906_v18 }
0x162d   :  { %2466 = vmatmul.msk.f32.vlgmr.msrb.gmra.mxu3 %vm169_vm3, %v2019_v52 }
0x162e   :  { %v2112_v1 = vsub.f32 %v2102_v12, %v2110_v55 }
0x1630   :  { %v2114_v21 = vmul.f32 %v2112_v1, %v2112_v1 }
0x1632   :  { %v2116_v23 = vsel %vm103_vm0, %v2114_v21, 0.0 }
0x1633   :  { %2117 = vadd.xlane.f32.xlu0 %v2116_v23 }
0x163d   :  { %v1977_v24 = vpop.f32.mrf.mxu2 }
0x163e   :  { %2468 = vmatmul.msk.f32.vlgmr.msra.gmra.mxu2 %vm142_vm1, %v1977_v24 }
0x16a6   :  { %v2118_v33 = vpop.xlane.xlu0 %2117 }
0x16a7   :  { %v2122_v34 = vmul.f32 %v2118_v33, %v2906_v18  ;;  %v2291_v33 = vld [vmem:[%s3539_s20 + $0x18] sm:$0xff] }
0x16a8   :  { %2314 = vmatpush.msra.mxu0 %v2291_v33 }
0x16a9   :  { %v2124_v57 = vadd.f32 1e-05, %v2122_v34  ;;  %v2290_v34 = vld [vmem:[%s3539_s20 + $0x10] sm:$0xff] }
0x16aa   :  { %2315 = vmatpush.msra.mxu0 %v2290_v34 }
0x16ab   :  { %2601 = vrsqrt.f32 %v2124_v57  ;;  %vm2132_vm13 = vweird.f32 %v2124_v57 }
0x16b0   :  { %v2043_v36 = vpop.f32.mrf.mxu3 }
0x16b1   :  { %v2602_v38 = vpop.eup %2601  ;;  %2467 = vmatmul.msk.f32.vlgmr.msrb.gmra.mxu0 %vm142_vm1, %v2043_v36  ;;  %v2288_v36 = vld [vmem:[%s3539_s20] sm:$0xff] }
0x16b2   :  { %v2127_v39 = vmul.f32 %v2602_v38, %v2124_v57  ;;  %vm2133_vm3 = vweird.f32 %v2602_v38  ;;  %v2289_v57 = vld [vmem:[%s3539_s20 + $0x8] sm:$0xff] }
0x16b3   :  { %vm2134_vm12 = vmor %vm2132_vm13, %vm2133_vm3  ;;  %2316 = vmatpush.msra.mxu0 %v2289_v57 }
0x16b4   :  { %v2128_v41 = vmul.f32 %v2602_v38, %v2127_v39 }
0x16b5   :  { %2317 = vmatpush.msra.mxu0 %v2288_v36 }
0x16b6   :  { %v2129_v30 = vmul.f32 0.5, %v2128_v41 }
0x16b8   :  { %v2130_v43 = vsub.f32 1.5, %v2129_v30 }
0x16ba   :  { %v2131_v45 = vmul.f32 %v2602_v38, %v2130_v43 }
0x16bc   :  { %v2135_v20 = vsel %vm2134_vm12, %v2602_v38, %v2131_v45 }
0x16bd   :  { %v2146_v40 = vmul.f32 %v2135_v20, %v2112_v1 }
0x16bf   :  { %v2148_v53 = vmul.f32 %v3309_v35, %v2146_v40 }
0x16c1   :  { %v2150_v22 = vadd.f32 %v3314_v28, %v2148_v53  ;;  %v2089_v56 = vpop.f32.mrf.mxu2 }
0x16c3   :  { %2475 = vmatmul.msk.f32.vlgmr.msrb.gmra.mxu1 %vm103_vm0, %v2150_v22 }
0x172e   :  { %v2066_v58 = vpop.f32.mrf.mxu0 }
0x172f   :  { %v2090_v61 = vadd.f32 %v2089_v56, %v2066_v58 }
0x1731   :  { %2092 = vst.msk [vmem:[#allocation2 + $0x8] sm:$0xff] %vm103_vm0, %v2090_v61  ;;  %v2518_v61 = vld [vmem:[%s3540_s21] ss:$0 sm:$0xff]  ;;  %s2668_s21 = smov [#allocation3]  }
0x1732   :  { %s2331_s10 = sshll.u32 %s2668_s21, 4  ;;  %s2332_s10 = int_to_ptr.vmem [resolvable:$true] %s2331_s10 }
0x1738   :  { %v2094_v26 = vld [vmem:[#allocation2 + $0x8] sm:$0xff] }
0x1739   :  { %v2096_v62 = vadd.f32 %v2094_v26, %v3364_v25 }
0x173b   :  { %v2103_v0 = vadd.f32 %v3412_v15, %v2096_v62 }
0x173d   :  { %v2107_v3 = vsel %vm103_vm0, %v2103_v0, 0.0 }
0x173e   :  { %2108 = vadd.xlane.f32.xlu2 %v2107_v3 }
0x1740   :  { %v2185_v44 = vpop.f32.mrf.mxu1 }
0x1741   :  { %v2186_v5 = vadd.f32 %v2516_v14, %v2185_v44 }
0x1743   :  { %v2191_v60 = vmax.f32 %v2186_v5, 0.0 }
0x1745   :  { %2486 = vmatmul.msk.f32.vlgmr.msra.gmra.mxu3 %vm1107_vm6, %v2191_v60 }
0x17b1   :  { %v2109_v10 = vpop.xlane.xlu2 %2108 }
0x17b2   :  { %v2111_v6 = vmul.f32 %v2109_v10, %v2906_v18 }
0x17b4   :  { %v2113_v63 = vsub.f32 %v2103_v0, %v2111_v6 }
0x17b6   :  { %v2115_v7 = vmul.f32 %v2113_v63, %v2113_v63 }
0x17b8   :  { %v2119_v25 = vsel %vm103_vm0, %v2115_v7, 0.0 }
0x17b9   :  { %2120 = vadd.xlane.f32.xlu2 %v2119_v25 }
0x17c8   :  { %v2230_v9 = vpop.f32.mrf.mxu3 }
0x17c9   :  { %v2231_v15 = vadd.f32 %v2517_v8, %v2230_v9 }
0x17cb   :  { %v2236_v11 = vadd.f32 %v2231_v15, %v2150_v22 }
0x17cd   :  { %v2238_v12 = vsel %vm103_vm0, %v2236_v11, 0.0 }
0x17ce   :  { %2239 = vadd.xlane.f32.xlu2 %v2238_v12 }
0x182c   :  { %v2121_v59 = vpop.xlane.xlu2 %2120 }
0x182d   :  { %v2123_v13 = vmul.f32 %v2121_v59, %v2906_v18 }
0x182f   :  { %v2125_v2 = vadd.f32 1e-05, %v2123_v13 }
0x1831   :  { %2603 = vrsqrt.f32 %v2125_v2  ;;  %vm2142_vm14 = vweird.f32 %v2125_v2 }
0x1837   :  { %v2604_v16 = vpop.eup %2603 }
0x1838   :  { %v2137_v37 = vmul.f32 %v2604_v16, %v2125_v2  ;;  %vm2143_vm1 = vweird.f32 %v2604_v16 }
0x1839   :  { %vm2144_vm2 = vmor %vm2142_vm14, %vm2143_vm1 }
0x183a   :  { %v2138_v4 = vmul.f32 %v2604_v16, %v2137_v37 }
0x183c   :  { %v2139_v17 = vmul.f32 0.5, %v2138_v4 }
0x183e   :  { %v2140_v52 = vsub.f32 1.5, %v2139_v17 }
0x1840   :  { %v2141_v19 = vmul.f32 %v2604_v16, %v2140_v52 }
0x1841   :  { %v2240_v55 = vpop.xlane.xlu2 %2239 }
0x1842   :  { %v2145_v1 = vsel %vm2144_vm2, %v2604_v16, %v2141_v19  ;;  %v2244_v21 = vmul.f32 %v2240_v55, %v2906_v18 }
0x1843   :  { %v2147_v23 = vmul.f32 %v2145_v1, %v2113_v63 }
0x1844   :  { %v2246_v24 = vsub.f32 %v2236_v11, %v2244_v21 }
0x1845   :  { %v2149_v27 = vmul.f32 %v3309_v35, %v2147_v23 }
0x1846   :  { %v2248_v29 = vmul.f32 %v2246_v24, %v2246_v24 }
0x1847   :  { %v2151_v31 = vadd.f32 %v3314_v28, %v2149_v27 }
0x1848   :  { %v2250_v32 = vsel %vm103_vm0, %v2248_v29, 0.0 }
0x1849   :  { %2476 = vmatmul.msk.f32.gmra.mxu1 %vm103_vm0, %v2151_v31  ;;  %2251 = vadd.xlane.f32.xlu2 %v2250_v32 }
0x18bc   :  { %v2252_v38 = vpop.xlane.xlu2 %2251 }
0x18bd   :  { %v2256_v39 = vmul.f32 %v2252_v38, %v2906_v18 }
0x18bf   :  { %v2258_v41 = vadd.f32 1e-05, %v2256_v39 }
0x18c1   :  { %2605 = vrsqrt.f32 %v2258_v41  ;;  %vm2266_vm5 = vweird.f32 %v2258_v41 }
0x18c6   :  { %v2188_v30 = vpop.f32.mrf.mxu1 }
0x18c7   :  { %v2606_v43 = vpop.eup %2605  ;;  %v2189_v45 = vadd.f32 %v2516_v14, %v2188_v30 }
0x18c8   :  { %v2261_v20 = vmul.f32 %v2606_v43, %v2258_v41  ;;  %vm2267_vm15 = vweird.f32 %v2606_v43 }
0x18c9   :  { %v2192_v40 = vmax.f32 %v2189_v45, 0.0  ;;  %vm2268_vm4 = vmor %vm2266_vm5, %vm2267_vm15 }
0x18ca   :  { %v2262_v53 = vmul.f32 %v2606_v43, %v2261_v20 }
0x18cb   :  { %2487 = vmatmul.msk.f32.gmra.mxu3 %vm1107_vm6, %v2192_v40 }
0x18cc   :  { %v2263_v22 = vmul.f32 0.5, %v2262_v53 }
0x18ce   :  { %v2264_v46 = vsub.f32 1.5, %v2263_v22 }
0x18d0   :  { %v2265_v47 = vmul.f32 %v2606_v43, %v2264_v46 }
0x18d2   :  { %v2269_v49 = vsel %vm2268_vm4, %v2606_v43, %v2265_v47 }
0x18d3   :  { %v2280_v48 = vmul.f32 %v2269_v49, %v2246_v24 }
0x18d5   :  { %v2282_v42 = vmul.f32 %v3309_v35, %v2280_v48 }
0x18d7   :  { %v2284_v50 = vadd.f32 %v3314_v28, %v2282_v42 }
0x18d9   :  { %2488 = vmatmul.msk.f32.vlgmr.msra.gmra.mxu0 %vm103_vm0, %v2284_v50  ;;  %2286 = vst.msk [vmem:[#allocation3] sm:$0xff] %vm103_vm0, %v2284_v50 }
0x194e   :  { %v2233_v51 = vpop.f32.mrf.mxu3 }
0x194f   :  { %v2234_v54 = vadd.f32 %v2517_v8, %v2233_v51 }
0x1951   :  { %v2237_v56 = vadd.f32 %v2234_v54, %v2151_v31 }
0x1953   :  { %v2241_v58 = vsel %vm103_vm0, %v2237_v56, 0.0 }
0x1954   :  { %2242 = vadd.xlane.f32.xlu1 %v2241_v58 }
0x1956   :  { %v2319_v26 = vpop.f32.mrf.mxu0 }
0x1957   :  { %v2320_v62 = vadd.f32 %v2518_v61, %v2319_v26 }
0x1959   :  { %2325 = vst [vmem:[#allocation5] sm:$0xff] %v2320_v62 }
0x19c7   :  { %v2243_v0 = vpop.xlane.xlu1 %2242 }
0x19c8   :  { %v2245_v3 = vmul.f32 %v2243_v0, %v2906_v18 }
0x19ca   :  { %v2247_v14 = vsub.f32 %v2237_v56, %v2245_v3 }
0x19cc   :  { %v2249_v44 = vmul.f32 %v2247_v14, %v2247_v14 }
0x19ce   :  { %v2253_v5 = vsel %vm103_vm0, %v2249_v44, 0.0 }
0x19cf   :  { %2254 = vadd.xlane.f32.xlu2 %v2253_v5 }
0x1a42   :  { %v2255_v60 = vpop.xlane.xlu2 %2254 }
0x1a43   :  { %v2257_v10 = vmul.f32 %v2255_v60, %v2906_v18 }
0x1a45   :  { %v2259_v6 = vadd.f32 1e-05, %v2257_v10 }
0x1a47   :  { %2607 = vrsqrt.f32 %v2259_v6  ;;  %vm2276_vm7 = vweird.f32 %v2259_v6 }
0x1a4d   :  { %v2608_v63 = vpop.eup %2607 }
0x1a4e   :  { %v2271_v7 = vmul.f32 %v2608_v63, %v2259_v6  ;;  %vm2277_vm6 = vweird.f32 %v2608_v63 }
0x1a4f   :  { %vm2278_vm8 = vmor %vm2276_vm7, %vm2277_vm6 }
0x1a50   :  { %v2272_v25 = vmul.f32 %v2608_v63, %v2271_v7 }
0x1a52   :  { %v2273_v8 = vmul.f32 0.5, %v2272_v25 }
0x1a54   :  { %v2274_v9 = vsub.f32 1.5, %v2273_v8 }
0x1a56   :  { %v2275_v15 = vmul.f32 %v2608_v63, %v2274_v9 }
0x1a58   :  { %v2279_v11 = vsel %vm2278_vm8, %v2608_v63, %v2275_v15 }
0x1a59   :  { %v2281_v12 = vmul.f32 %v2279_v11, %v2247_v14 }
0x1a5b   :  { %v2283_v59 = vmul.f32 %v3309_v35, %v2281_v12 }
0x1a5d   :  { %v2285_v13 = vadd.f32 %v3314_v28, %v2283_v59 }
0x1a5f   :  { %2287 = vst.msk [vmem:[#allocation3 + $0x8] sm:$0xff] %vm103_vm0, %v2285_v13  ;;  %2489 = vmatmul.msk.f32.gmra.mxu0 %vm103_vm0, %v2285_v13 }
0x1a60   :  { %2339 = dma.vmem_to_hbm [thread:$0]  %s2332_s10, 256, %s2334_s19, [#allocation4], %s2669_s2, %s2669_s2, %s2670_s8  }
0x1adc   :  { %v2322_v18 = vpop.f32.mrf.mxu0 }
0x1add   :  { %v2323_v35 = vadd.f32 %v2518_v61, %v2322_v18 }
0x1adf   :  { %2326 = vst [vmem:[#allocation5 + $0x8] sm:$0xff] %v2323_v35 }
0x1ae0   :  { %2352 = dma.vmem_to_hbm [thread:$0]  %s2345_s11, 256, %s2347_s29, [#allocation6], %s2669_s2, %s2669_s2, %s2670_s8  }
0x1ae1   :  { %2658 = dma.done.wait [#allocation4], 256  }
0x1ae2   :  { %2659 = vsyncadd [#allocation4], 4294967040 }
0x1ae3   :  { %2660 = dma.done.wait [#allocation6], 256  }
0x1ae4   :  { %2661 = vsyncadd [#allocation6], 4294967040 }
0x1ae5   :  { %2361 = vsyncpa [#allocation4], 1 }
0x1ae6   :  { %2362 = vsyncpa [#allocation6], 1 }

</bundles_post_ra>
